<compile_context>
chip_gen: v7x
topology: tpu7x:2x2x1
jax: 0.10.0
libtpu: 0.0.40
codegen_flags: <defaults>
</compile_context>

<pallas_src>
import jax
import jax.numpy as jnp
import numpy as np
from jax.experimental import pallas as pl
from jax.experimental.pallas import tpu as pltpu


# ----------------------------------------------------------------------------
# Fused kernel: whole autoencoder forward for one batch element per grid step
# ----------------------------------------------------------------------------
def _make_fused_kernel(conv_ch, n_enc, n_dec, w0):
    """conv_ch: tuple of (cin, cout) per conv, in execution order. w0: full-res row width."""
    n_pool, n_up = n_enc - 1, n_dec - 1

    def _rot(v, k):
        # out[..., i] = v[..., (i + k) % n]  -- circular lane rotation (static shift),
        # lowered by Mosaic to lane shifts/selects; stays on the vector path.
        n = v.shape[-1]
        k = k % n
        if k == 0:
            return v
        return jnp.concatenate([v[..., k:], v[..., :k]], axis=-1)

    def kernel(*refs):
        x_ref, w_ref = refs[0], refs[1]
        pool_refs = refs[2:2 + n_pool]
        up_refs = refs[2 + n_pool:2 + n_pool + n_up]
        o_ref = refs[-1]

        def conv3x3_swish(a, idx, w_sp):
            """3x3 circular conv + bias + swish on a lane-dense (Cin, H*W) value."""
            cin, cout = conv_ch[idx]
            hw = a.shape[-1]
            kk = 3 * cin + 1                       # 3 column taps * Cin channels + 1 bias row
            # Column (dw) taps as lane rotations; W-wrap needs a fix only at row boundaries.
            col = jax.lax.broadcasted_iota(jnp.int32, (1, hw), 1) % w_sp
            x_m1 = jnp.where(col == 0, _rot(a, w_sp - 1), _rot(a, -1))        # dw = -1
            x_p1 = jnp.where(col == w_sp - 1, _rot(a, 1 - w_sp), _rot(a, 1))  # dw = +1
            ones = jnp.ones((1, hw), jnp.float32)                             # bias row
            x3 = jnp.concatenate([x_m1, a, x_p1, ones], axis=0)               # (3*cin+1, hw)
            # One MXU dot per kernel row kh; output lanes = hw (full width).
            wconv = w_ref[idx]                                                # (3, MAXC, MAXK)
            p = []
            for d in range(3):                                                # kh = 0,1,2
                wmat = wconv[d, 0:cout, 0:kk]                                 # (cout, 3*cin+1)
                p.append(jnp.dot(wmat, x3, preferred_element_type=jnp.float32))
            # Row (dh) shifts are exact flat rotations, applied after the matmul.
            y = p[1] + _rot(p[0], -w_sp) + _rot(p[2], w_sp)
            return y * jax.nn.sigmoid(y)                                      # swish, full width

        a = x_ref[0].astype(jnp.float32)       # (C, H*W): channels on sublanes, pixels on lanes
        w_sp = w0
        ci = 0
        # Encoder: block -> pool -> block -> pool -> ... -> block
        for k in range(n_enc):
            a = conv3x3_swish(a, ci, w_sp); ci += 1
            a = conv3x3_swish(a, ci, w_sp); ci += 1
            if k < n_pool:
                a = jnp.dot(a, pool_refs[k][...], preferred_element_type=jnp.float32)
                w_sp //= 2
        # Decoder: block -> upsample -> block -> upsample -> ... -> block
        for k in range(n_dec):
            a = conv3x3_swish(a, ci, w_sp); ci += 1
            a = conv3x3_swish(a, ci, w_sp); ci += 1
            if k < n_up:
                a = jnp.dot(a, up_refs[k][...], preferred_element_type=jnp.float32)
                w_sp *= 2
        o_ref[0] = a.astype(o_ref.dtype)

    return kernel


def autoencoder2d_forward(params, x_nchw):
    """Full AutoEncoder2d forward. x_nchw: (N, C, H, W) -> (N, C, H, W)."""
    enc, dec = params["enc"], params["dec"]
    n_enc, n_dec = len(enc), len(dec)
    conv_ch = []
    for blk in enc + dec:
        conv_ch.append((blk["w1"].shape[1], blk["w1"].shape[0]))
        conv_ch.append((blk["w2"].shape[1], blk["w2"].shape[0]))
    conv_ch = tuple(conv_ch)

    N, C, H, W = x_nchw.shape
    assert C == conv_ch[0][0], (C, conv_ch[0][0])
    assert H % (1 << (n_enc - 1)) == 0 and W % (1 << (n_enc - 1)) == 0, (
        "spatial dims must stay even at every encoder pooling level")
    c_out = conv_ch[-1][1]
    h_out = (H >> (n_enc - 1)) << (n_dec - 1)
    w_out = (W >> (n_enc - 1)) << (n_dec - 1)

    wpack = params["wpack"]
    pool_mats, up_mats = params["pool_mats"], params["up_mats"]
    assert len(pool_mats) == n_enc - 1 and len(up_mats) == n_dec - 1

    x = x_nchw.reshape(N, C, H * W)        # lane-dense view of NCHW (free reshape, no transpose)

    in_specs = [pl.BlockSpec((1, C, H * W), lambda n: (n, 0, 0)),
                pl.BlockSpec(wpack.shape, lambda n: (0, 0, 0, 0))]
    in_specs += [pl.BlockSpec(m.shape, lambda n: (0, 0)) for m in (*pool_mats, *up_mats)]

    out = pl.pallas_call(
        _make_fused_kernel(conv_ch, n_enc, n_dec, W),
        out_shape=jax.ShapeDtypeStruct((N, c_out, h_out * w_out), x_nchw.dtype),
        grid=(N,),
        in_specs=in_specs,
        out_specs=pl.BlockSpec((1, c_out, h_out * w_out), lambda n: (n, 0, 0)),
        compiler_params=pltpu.CompilerParams(
            dimension_semantics=("parallel",),             # v7x: one batch element per TC
            vmem_limit_bytes=32 * 1024 * 1024),
    )(x, wpack, *pool_mats, *up_mats)
    return out.reshape(N, c_out, h_out, w_out)


# ----------------------------------------------------------------------------
# Parameter init + host-side packing (deterministic, synthetic)
# ----------------------------------------------------------------------------
def _init_conv(key, cin, cout, k=3):
    kw, kb = jax.random.split(key)
    # PyTorch Conv2d weight layout (Cout, Cin, kH, kW).
    w = jax.random.normal(kw, (cout, cin, k, k), jnp.float32) / (k * np.sqrt(cin))
    b = jax.random.normal(kb, (cout,), jnp.float32) * 0.01
    return w, b


def _init_block(key, cin, cout, k=3):
    k1, k2 = jax.random.split(key)
    w1, b1 = _init_conv(k1, cin, cout, k)
    w2, b2 = _init_conv(k2, cout, cout, k)
    return {"w1": w1, "b1": b1, "w2": w2, "b2": b2}


def _pack_weights(blocks):
    """Pack all convs into one (n_convs, 3, MAXC, MAXK) array, bias folded as extra column.

    wpack[i, kh, co, kw*cin + ci] = weight_i[co, ci, kh, kw];  wpack[i, 1, co, 3*cin] = bias_i[co].
    Matches the kernel's tap matrix layout [x(dw=-1); x(dw=0); x(dw=+1); ones].
    """
    convs = []
    for blk in blocks:
        convs.append((np.asarray(blk["w1"]), np.asarray(blk["b1"])))
        convs.append((np.asarray(blk["w2"]), np.asarray(blk["b2"])))
    maxc = max(w.shape[0] for w, _ in convs)
    maxk = max(3 * w.shape[1] + 1 for w, _ in convs)
    wpack = np.zeros((len(convs), 3, maxc, maxk), np.float32)
    for i, (w, b) in enumerate(convs):
        cout, cin = w.shape[:2]
        wt = np.transpose(w, (2, 3, 1, 0)).reshape(3, 3 * cin, cout)  # (kh, kw*cin+ci, cout)
        wt = np.transpose(wt, (0, 2, 1))                              # (kh, cout, 3*cin)
        wpack[i, :, :cout, :3 * cin] = wt
        wpack[i, 1, :cout, 3 * cin] = b                               # bias on the kh=1 (dh=0) row
    return jnp.asarray(wpack)


def _pool_matrix(h, w):
    """(h*w, (h//2)*(w//2)) matrix implementing 2x2 stride-2 average pooling on flat pixels."""
    p = np.zeros((h * w, (h // 2) * (w // 2)), np.float32)
    for i in range(h):
        for j in range(w):
            p[i * w + j, (i // 2) * (w // 2) + (j // 2)] = 0.25
    return p


def _upsample_matrix(h, w):
    """(h*w, (2h)*(2w)) matrix implementing nearest-neighbour 2x upsampling on flat pixels."""
    u = np.zeros((h * w, (2 * h) * (2 * w)), np.float32)
    for oh in range(2 * h):
        for ow in range(2 * w):
            u[(oh // 2) * w + (ow // 2), oh * (2 * w) + ow] = 1.0
    return u


def init_autoencoder_params(key, state_dims, state_channels, latent_channels,
                            encoder_hidden_channels, decoder_hidden_channels=None,
                            kernel_size=3):
    # TODO(synk): only kernel_size=3 and circular ('periodic') padding are implemented;
    #             'reflect'/'replicate' padding variants of Conv2dBlock are not translated.
    assert kernel_size == 3
    if decoder_hidden_channels is None:
        decoder_hidden_channels = encoder_hidden_channels[::-1]
    enc_ch = [state_channels] + list(encoder_hidden_channels) + [latent_channels]
    dec_ch = [latent_channels] + list(decoder_hidden_channels) + [state_channels]
    n_enc, n_dec = len(enc_ch) - 1, len(dec_ch) - 1
    H, W = state_dims
    assert H % (1 << (n_enc - 1)) == 0 and W % (1 << (n_enc - 1)) == 0, (
        "state_dims must be divisible by 2**(encoder_depth-1) for the pooling schedule")

    keys = jax.random.split(key, n_enc + n_dec)
    enc = [_init_block(keys[i], enc_ch[i], enc_ch[i + 1], kernel_size) for i in range(n_enc)]
    dec = [_init_block(keys[n_enc + i], dec_ch[i], dec_ch[i + 1], kernel_size)
           for i in range(n_dec)]

    wpack = _pack_weights(enc + dec)
    pool_mats, hh, ww = [], H, W
    for _ in range(n_enc - 1):
        pool_mats.append(jnp.asarray(_pool_matrix(hh, ww)))
        hh //= 2; ww //= 2
    up_mats = []
    for _ in range(n_dec - 1):
        up_mats.append(jnp.asarray(_upsample_matrix(hh, ww)))
        hh *= 2; ww *= 2

    return {"enc": enc, "dec": dec, "wpack": wpack,
            "pool_mats": pool_mats, "up_mats": up_mats}


# ----------------------------------------------------------------------------
# Pure-JAX reference (for correctness check)
# ----------------------------------------------------------------------------
def _ref_conv_swish(x, w_oihw, b):
    xp = jnp.pad(x, ((0, 0), (0, 0), (1, 1), (1, 1)), mode="wrap")   # circular padding
    y = jax.lax.conv_general_dilated(
        xp, w_oihw, window_strides=(1, 1), padding="VALID",
        dimension_numbers=("NCHW", "OIHW", "NCHW"),
        precision=jax.lax.Precision.HIGHEST) + b[None, :, None, None]
    return y * jax.nn.sigmoid(y)


def _ref_pool(x):
    N, C, H, W = x.shape
    return x.reshape(N, C, H // 2, 2, W // 2, 2).mean(axis=(3, 5))


def _ref_upsample(x):
    return jnp.repeat(jnp.repeat(x, 2, axis=2), 2, axis=3)


def autoencoder2d_reference(params, x):
    enc, dec = params["enc"], params["dec"]
    for i, blk in enumerate(enc):
        x = _ref_conv_swish(x, blk["w1"], blk["b1"])
        x = _ref_conv_swish(x, blk["w2"], blk["b2"])
        if i < len(enc) - 1:
            x = _ref_pool(x)
    for i, blk in enumerate(dec):
        x = _ref_conv_swish(x, blk["w1"], blk["b1"])
        x = _ref_conv_swish(x, blk["w2"], blk["b2"])
        if i < len(dec) - 1:
            x = _ref_upsample(x)
    return x


# ----------------------------------------------------------------------------
# Main
# ----------------------------------------------------------------------------
if __name__ == "__main__":
    # Module config (small, consistent with AutoEncoder2d forward):
    state_dims = (16, 16)
    state_channels = 4
    latent_channels = 4
    kernel_size = 3
    encoder_hidden_channels = [8, 16]
    decoder_hidden_channels = encoder_hidden_channels[::-1]

    key = jax.random.PRNGKey(0)
    kp, kx = jax.random.split(key)
    params = init_autoencoder_params(kp, state_dims, state_channels, latent_channels,
                                     encoder_hidden_channels, decoder_hidden_channels,
                                     kernel_size=kernel_size)
    x = jax.random.normal(kx, (2, state_channels, *state_dims), jnp.float32)

    fwd = jax.jit(autoencoder2d_forward)
    out = jax.block_until_ready(fwd(params, x))
    assert out.shape == x.shape, (out.shape, x.shape)

    ref = jax.block_until_ready(autoencoder2d_reference(params, x))
    np.testing.assert_allclose(np.asarray(out), np.asarray(ref), rtol=2e-2, atol=2e-2)

    print("KERNEL_OK")
</pallas_src>

<mosaic_0001>
module attributes {stable_mosaic.version = 11 : i64} {
  func.func @kernel(%arg0: i32, %arg1: memref<1x4x256xf32, #tpu.memory_space<vmem>>, %arg2: memref<12x3x16x49xf32, #tpu.memory_space<vmem>>, %arg3: memref<256x64xf32, #tpu.memory_space<vmem>>, %arg4: memref<64x16xf32, #tpu.memory_space<vmem>>, %arg5: memref<16x64xf32, #tpu.memory_space<vmem>>, %arg6: memref<64x256xf32, #tpu.memory_space<vmem>>, %arg7: memref<1x4x256xf32, #tpu.memory_space<vmem>>) attributes {dimension_semantics = [#tpu.dimension_semantics<parallel>], iteration_bounds = array<i64: 2>, scalar_prefetch = 0 : i64, scratch_operands = 0 : i64, tpu.core_type = #tpu.core_type<tc>, window_params = [{transform_indices = @transform_0, window_bounds = array<i64: 1, 4, 256>}, {pipeline_mode = #tpu.pipeline_mode<synchronous>, transform_indices = @transform_1, window_bounds = array<i64: 12, 3, 16, 49>}, {pipeline_mode = #tpu.pipeline_mode<synchronous>, transform_indices = @transform_2, window_bounds = array<i64: 256, 64>}, {pipeline_mode = #tpu.pipeline_mode<synchronous>, transform_indices = @transform_3, window_bounds = array<i64: 64, 16>}, {pipeline_mode = #tpu.pipeline_mode<synchronous>, transform_indices = @transform_4, window_bounds = array<i64: 16, 64>}, {pipeline_mode = #tpu.pipeline_mode<synchronous>, transform_indices = @transform_5, window_bounds = array<i64: 64, 256>}, {transform_indices = @transform_6, window_bounds = array<i64: 1, 4, 256>}]} {
    %c0 = arith.constant 0 : index
    %c0_0 = arith.constant 0 : index
    %c0_1 = arith.constant 0 : index
    %0 = vector.load %arg1[%c0, %c0_0, %c0_1] : memref<1x4x256xf32, #tpu.memory_space<vmem>>, vector<1x4x256xf32>
    %1 = vector.shape_cast %0 : vector<1x4x256xf32> to vector<4x256xf32>
    %2 = tpu.iota {dimensions = array<i32: 1>} : vector<1x256xi32>
    %c16_i32 = arith.constant 16 : i32
    %c0_i32 = arith.constant 0 : i32
    %3 = arith.cmpi eq, %c16_i32, %c0_i32 : i32
    %c1_i32 = arith.constant 1 : i32
    %4 = arith.select %3, %c1_i32, %c16_i32 : i32
    %5 = vector.broadcast %4 : i32 to vector<1x256xi32>
    %6 = arith.remsi %2, %5 : vector<1x256xi32>
    %c0_i32_2 = arith.constant 0 : i32
    %7 = vector.broadcast %c0_i32_2 : i32 to vector<1x256xi32>
    %8 = arith.cmpi ne, %6, %7 : vector<1x256xi32>
    %c0_i32_3 = arith.constant 0 : i32
    %9 = vector.broadcast %c0_i32_3 : i32 to vector<1x256xi32>
    %10 = arith.cmpi slt, %6, %9 : vector<1x256xi32>
    %c0_i32_4 = arith.constant 0 : i32
    %11 = arith.cmpi slt, %4, %c0_i32_4 : i32
    %12 = vector.broadcast %11 : i1 to vector<1x256xi1>
    %13 = vector.broadcast %12 : vector<1x256xi1> to vector<1x256xi1>
    %14 = arith.xori %10, %13 : vector<1x256xi1>
    %15 = arith.andi %14, %8 : vector<1x256xi1>
    %16 = vector.broadcast %4 : i32 to vector<1x256xi32>
    %17 = arith.addi %6, %16 : vector<1x256xi32>
    %18 = arith.select %15, %17, %6 : vector<1x256xi1>, vector<1x256xi32>
    %c0_i32_5 = arith.constant 0 : i32
    %19 = vector.broadcast %c0_i32_5 : i32 to vector<1x256xi32>
    %20 = arith.cmpi eq, %18, %19 : vector<1x256xi32>
    %21 = vector.extract_strided_slice %1 {offsets = [0, 15], sizes = [4, 241], strides = [1, 1]} : vector<4x256xf32> to vector<4x241xf32>
    %22 = vector.extract_strided_slice %1 {offsets = [0, 0], sizes = [4, 15], strides = [1, 1]} : vector<4x256xf32> to vector<4x15xf32>
    %23 = tpu.concatenate %21, %22 in 1 : vector<4x241xf32>, vector<4x15xf32> -> vector<4x256xf32>
    %24 = vector.extract_strided_slice %1 {offsets = [0, 255], sizes = [4, 1], strides = [1, 1]} : vector<4x256xf32> to vector<4x1xf32>
    %25 = vector.extract_strided_slice %1 {offsets = [0, 0], sizes = [4, 255], strides = [1, 1]} : vector<4x256xf32> to vector<4x255xf32>
    %26 = tpu.concatenate %24, %25 in 1 : vector<4x1xf32>, vector<4x255xf32> -> vector<4x256xf32>
    %27 = vector.shape_cast %20 : vector<1x256xi1> to vector<1x256xi1>
    %28 = vector.broadcast %27 : vector<1x256xi1> to vector<4x256xi1>
    %29 = arith.select %28, %23, %26 : vector<4x256xi1>, vector<4x256xf32>
    %c15_i32 = arith.constant 15 : i32
    %30 = vector.broadcast %c15_i32 : i32 to vector<1x256xi32>
    %31 = arith.cmpi eq, %18, %30 : vector<1x256xi32>
    %32 = vector.extract_strided_slice %1 {offsets = [0, 241], sizes = [4, 15], strides = [1, 1]} : vector<4x256xf32> to vector<4x15xf32>
    %33 = vector.extract_strided_slice %1 {offsets = [0, 0], sizes = [4, 241], strides = [1, 1]} : vector<4x256xf32> to vector<4x241xf32>
    %34 = tpu.concatenate %32, %33 in 1 : vector<4x15xf32>, vector<4x241xf32> -> vector<4x256xf32>
    %35 = vector.extract_strided_slice %1 {offsets = [0, 1], sizes = [4, 255], strides = [1, 1]} : vector<4x256xf32> to vector<4x255xf32>
    %36 = vector.extract_strided_slice %1 {offsets = [0, 0], sizes = [4, 1], strides = [1, 1]} : vector<4x256xf32> to vector<4x1xf32>
    %37 = tpu.concatenate %35, %36 in 1 : vector<4x255xf32>, vector<4x1xf32> -> vector<4x256xf32>
    %38 = vector.shape_cast %31 : vector<1x256xi1> to vector<1x256xi1>
    %39 = vector.broadcast %38 : vector<1x256xi1> to vector<4x256xi1>
    %40 = arith.select %39, %34, %37 : vector<4x256xi1>, vector<4x256xf32>
    %cst = arith.constant 1.000000e+00 : f32
    %41 = vector.broadcast %cst : f32 to vector<1x256xf32>
    %42 = tpu.concatenate %29, %1, %40, %41 in 0 : vector<4x256xf32>, vector<4x256xf32>, vector<4x256xf32>, vector<1x256xf32> -> vector<13x256xf32>
    %c0_6 = arith.constant 0 : index
    %c0_7 = arith.constant 0 : index
    %c0_8 = arith.constant 0 : index
    %c0_9 = arith.constant 0 : index
    %43 = vector.load %arg2[%c0_6, %c0_7, %c0_8, %c0_9] : memref<12x3x16x49xf32, #tpu.memory_space<vmem>>, vector<1x3x16x49xf32>
    %44 = vector.shape_cast %43 : vector<1x3x16x49xf32> to vector<3x16x49xf32>
    %45 = vector.extract_strided_slice %44 {offsets = [0, 0, 0], sizes = [1, 8, 13], strides = [1, 1, 1]} : vector<3x16x49xf32> to vector<1x8x13xf32>
    %46 = vector.shape_cast %45 : vector<1x8x13xf32> to vector<8x13xf32>
    %cst_10 = arith.constant dense<0.000000e+00> : vector<8x256xf32>
    %47 = tpu.matmul %46, %42, %cst_10 {dimension_numbers = #tpu.dot_dimension_numbers<[1], [0], [0], [1], [0, 0, 1, 1], [], []>} : vector<8x13xf32>, vector<13x256xf32>, vector<8x256xf32> -> vector<8x256xf32>
    %48 = vector.extract_strided_slice %44 {offsets = [1, 0, 0], sizes = [1, 8, 13], strides = [1, 1, 1]} : vector<3x16x49xf32> to vector<1x8x13xf32>
    %49 = vector.shape_cast %48 : vector<1x8x13xf32> to vector<8x13xf32>
    %cst_11 = arith.constant dense<0.000000e+00> : vector<8x256xf32>
    %50 = tpu.matmul %49, %42, %cst_11 {dimension_numbers = #tpu.dot_dimension_numbers<[1], [0], [0], [1], [0, 0, 1, 1], [], []>} : vector<8x13xf32>, vector<13x256xf32>, vector<8x256xf32> -> vector<8x256xf32>
    %51 = vector.extract_strided_slice %44 {offsets = [2, 0, 0], sizes = [1, 8, 13], strides = [1, 1, 1]} : vector<3x16x49xf32> to vector<1x8x13xf32>
    %52 = vector.shape_cast %51 : vector<1x8x13xf32> to vector<8x13xf32>
    %cst_12 = arith.constant dense<0.000000e+00> : vector<8x256xf32>
    %53 = tpu.matmul %52, %42, %cst_12 {dimension_numbers = #tpu.dot_dimension_numbers<[1], [0], [0], [1], [0, 0, 1, 1], [], []>} : vector<8x13xf32>, vector<13x256xf32>, vector<8x256xf32> -> vector<8x256xf32>
    %54 = vector.extract_strided_slice %47 {offsets = [0, 240], sizes = [8, 16], strides = [1, 1]} : vector<8x256xf32> to vector<8x16xf32>
    %55 = vector.extract_strided_slice %47 {offsets = [0, 0], sizes = [8, 240], strides = [1, 1]} : vector<8x256xf32> to vector<8x240xf32>
    %56 = tpu.concatenate %54, %55 in 1 : vector<8x16xf32>, vector<8x240xf32> -> vector<8x256xf32>
    %57 = arith.addf %50, %56 : vector<8x256xf32>
    %58 = vector.extract_strided_slice %53 {offsets = [0, 16], sizes = [8, 240], strides = [1, 1]} : vector<8x256xf32> to vector<8x240xf32>
    %59 = vector.extract_strided_slice %53 {offsets = [0, 0], sizes = [8, 16], strides = [1, 1]} : vector<8x256xf32> to vector<8x16xf32>
    %60 = tpu.concatenate %58, %59 in 1 : vector<8x240xf32>, vector<8x16xf32> -> vector<8x256xf32>
    %61 = arith.addf %57, %60 : vector<8x256xf32>
    %62 = arith.negf %61 : vector<8x256xf32>
    %63 = math.exp %62 : vector<8x256xf32>
    %cst_13 = arith.constant 1.000000e+00 : f32
    %64 = vector.broadcast %cst_13 : f32 to vector<8x256xf32>
    %65 = arith.addf %64, %63 : vector<8x256xf32>
    %66 = arith.divf %64, %65 : vector<8x256xf32>
    %67 = arith.mulf %61, %66 : vector<8x256xf32>
    %68 = tpu.iota {dimensions = array<i32: 1>} : vector<1x256xi32>
    %c16_i32_14 = arith.constant 16 : i32
    %c0_i32_15 = arith.constant 0 : i32
    %69 = arith.cmpi eq, %c16_i32_14, %c0_i32_15 : i32
    %c1_i32_16 = arith.constant 1 : i32
    %70 = arith.select %69, %c1_i32_16, %c16_i32_14 : i32
    %71 = vector.broadcast %70 : i32 to vector<1x256xi32>
    %72 = arith.remsi %68, %71 : vector<1x256xi32>
    %c0_i32_17 = arith.constant 0 : i32
    %73 = vector.broadcast %c0_i32_17 : i32 to vector<1x256xi32>
    %74 = arith.cmpi ne, %72, %73 : vector<1x256xi32>
    %c0_i32_18 = arith.constant 0 : i32
    %75 = vector.broadcast %c0_i32_18 : i32 to vector<1x256xi32>
    %76 = arith.cmpi slt, %72, %75 : vector<1x256xi32>
    %c0_i32_19 = arith.constant 0 : i32
    %77 = arith.cmpi slt, %70, %c0_i32_19 : i32
    %78 = vector.broadcast %77 : i1 to vector<1x256xi1>
    %79 = vector.broadcast %78 : vector<1x256xi1> to vector<1x256xi1>
    %80 = arith.xori %76, %79 : vector<1x256xi1>
    %81 = arith.andi %80, %74 : vector<1x256xi1>
    %82 = vector.broadcast %70 : i32 to vector<1x256xi32>
    %83 = arith.addi %72, %82 : vector<1x256xi32>
    %84 = arith.select %81, %83, %72 : vector<1x256xi1>, vector<1x256xi32>
    %c0_i32_20 = arith.constant 0 : i32
    %85 = vector.broadcast %c0_i32_20 : i32 to vector<1x256xi32>
    %86 = arith.cmpi eq, %84, %85 : vector<1x256xi32>
    %87 = vector.extract_strided_slice %67 {offsets = [0, 15], sizes = [8, 241], strides = [1, 1]} : vector<8x256xf32> to vector<8x241xf32>
    %88 = vector.extract_strided_slice %67 {offsets = [0, 0], sizes = [8, 15], strides = [1, 1]} : vector<8x256xf32> to vector<8x15xf32>
    %89 = tpu.concatenate %87, %88 in 1 : vector<8x241xf32>, vector<8x15xf32> -> vector<8x256xf32>
    %90 = vector.extract_strided_slice %67 {offsets = [0, 255], sizes = [8, 1], strides = [1, 1]} : vector<8x256xf32> to vector<8x1xf32>
    %91 = vector.extract_strided_slice %67 {offsets = [0, 0], sizes = [8, 255], strides = [1, 1]} : vector<8x256xf32> to vector<8x255xf32>
    %92 = tpu.concatenate %90, %91 in 1 : vector<8x1xf32>, vector<8x255xf32> -> vector<8x256xf32>
    %93 = vector.shape_cast %86 : vector<1x256xi1> to vector<1x256xi1>
    %94 = vector.broadcast %93 : vector<1x256xi1> to vector<8x256xi1>
    %95 = arith.select %94, %89, %92 : vector<8x256xi1>, vector<8x256xf32>
    %c15_i32_21 = arith.constant 15 : i32
    %96 = vector.broadcast %c15_i32_21 : i32 to vector<1x256xi32>
    %97 = arith.cmpi eq, %84, %96 : vector<1x256xi32>
    %98 = vector.extract_strided_slice %67 {offsets = [0, 241], sizes = [8, 15], strides = [1, 1]} : vector<8x256xf32> to vector<8x15xf32>
    %99 = vector.extract_strided_slice %67 {offsets = [0, 0], sizes = [8, 241], strides = [1, 1]} : vector<8x256xf32> to vector<8x241xf32>
    %100 = tpu.concatenate %98, %99 in 1 : vector<8x15xf32>, vector<8x241xf32> -> vector<8x256xf32>
    %101 = vector.extract_strided_slice %67 {offsets = [0, 1], sizes = [8, 255], strides = [1, 1]} : vector<8x256xf32> to vector<8x255xf32>
    %102 = vector.extract_strided_slice %67 {offsets = [0, 0], sizes = [8, 1], strides = [1, 1]} : vector<8x256xf32> to vector<8x1xf32>
    %103 = tpu.concatenate %101, %102 in 1 : vector<8x255xf32>, vector<8x1xf32> -> vector<8x256xf32>
    %104 = vector.shape_cast %97 : vector<1x256xi1> to vector<1x256xi1>
    %105 = vector.broadcast %104 : vector<1x256xi1> to vector<8x256xi1>
    %106 = arith.select %105, %100, %103 : vector<8x256xi1>, vector<8x256xf32>
    %cst_22 = arith.constant 1.000000e+00 : f32
    %107 = vector.broadcast %cst_22 : f32 to vector<1x256xf32>
    %108 = tpu.concatenate %95, %67, %106, %107 in 0 : vector<8x256xf32>, vector<8x256xf32>, vector<8x256xf32>, vector<1x256xf32> -> vector<25x256xf32>
    %c1 = arith.constant 1 : index
    %c0_23 = arith.constant 0 : index
    %c0_24 = arith.constant 0 : index
    %c0_25 = arith.constant 0 : index
    %109 = vector.load %arg2[%c1, %c0_23, %c0_24, %c0_25] : memref<12x3x16x49xf32, #tpu.memory_space<vmem>>, vector<1x3x16x49xf32>
    %110 = vector.shape_cast %109 : vector<1x3x16x49xf32> to vector<3x16x49xf32>
    %111 = vector.extract_strided_slice %110 {offsets = [0, 0, 0], sizes = [1, 8, 25], strides = [1, 1, 1]} : vector<3x16x49xf32> to vector<1x8x25xf32>
    %112 = vector.shape_cast %111 : vector<1x8x25xf32> to vector<8x25xf32>
    %cst_26 = arith.constant dense<0.000000e+00> : vector<8x256xf32>
    %113 = tpu.matmul %112, %108, %cst_26 {dimension_numbers = #tpu.dot_dimension_numbers<[1], [0], [0], [1], [0, 0, 1, 1], [], []>} : vector<8x25xf32>, vector<25x256xf32>, vector<8x256xf32> -> vector<8x256xf32>
    %114 = vector.extract_strided_slice %110 {offsets = [1, 0, 0], sizes = [1, 8, 25], strides = [1, 1, 1]} : vector<3x16x49xf32> to vector<1x8x25xf32>
    %115 = vector.shape_cast %114 : vector<1x8x25xf32> to vector<8x25xf32>
    %cst_27 = arith.constant dense<0.000000e+00> : vector<8x256xf32>
    %116 = tpu.matmul %115, %108, %cst_27 {dimension_numbers = #tpu.dot_dimension_numbers<[1], [0], [0], [1], [0, 0, 1, 1], [], []>} : vector<8x25xf32>, vector<25x256xf32>, vector<8x256xf32> -> vector<8x256xf32>
    %117 = vector.extract_strided_slice %110 {offsets = [2, 0, 0], sizes = [1, 8, 25], strides = [1, 1, 1]} : vector<3x16x49xf32> to vector<1x8x25xf32>
    %118 = vector.shape_cast %117 : vector<1x8x25xf32> to vector<8x25xf32>
    %cst_28 = arith.constant dense<0.000000e+00> : vector<8x256xf32>
    %119 = tpu.matmul %118, %108, %cst_28 {dimension_numbers = #tpu.dot_dimension_numbers<[1], [0], [0], [1], [0, 0, 1, 1], [], []>} : vector<8x25xf32>, vector<25x256xf32>, vector<8x256xf32> -> vector<8x256xf32>
    %120 = vector.extract_strided_slice %113 {offsets = [0, 240], sizes = [8, 16], strides = [1, 1]} : vector<8x256xf32> to vector<8x16xf32>
    %121 = vector.extract_strided_slice %113 {offsets = [0, 0], sizes = [8, 240], strides = [1, 1]} : vector<8x256xf32> to vector<8x240xf32>
    %122 = tpu.concatenate %120, %121 in 1 : vector<8x16xf32>, vector<8x240xf32> -> vector<8x256xf32>
    %123 = arith.addf %116, %122 : vector<8x256xf32>
    %124 = vector.extract_strided_slice %119 {offsets = [0, 16], sizes = [8, 240], strides = [1, 1]} : vector<8x256xf32> to vector<8x240xf32>
    %125 = vector.extract_strided_slice %119 {offsets = [0, 0], sizes = [8, 16], strides = [1, 1]} : vector<8x256xf32> to vector<8x16xf32>
    %126 = tpu.concatenate %124, %125 in 1 : vector<8x240xf32>, vector<8x16xf32> -> vector<8x256xf32>
    %127 = arith.addf %123, %126 : vector<8x256xf32>
    %128 = arith.negf %127 : vector<8x256xf32>
    %129 = math.exp %128 : vector<8x256xf32>
    %cst_29 = arith.constant 1.000000e+00 : f32
    %130 = vector.broadcast %cst_29 : f32 to vector<8x256xf32>
    %131 = arith.addf %130, %129 : vector<8x256xf32>
    %132 = arith.divf %130, %131 : vector<8x256xf32>
    %133 = arith.mulf %127, %132 : vector<8x256xf32>
    %c0_30 = arith.constant 0 : index
    %c0_31 = arith.constant 0 : index
    %134 = vector.load %arg3[%c0_30, %c0_31] : memref<256x64xf32, #tpu.memory_space<vmem>>, vector<256x64xf32>
    %cst_32 = arith.constant dense<0.000000e+00> : vector<8x64xf32>
    %135 = tpu.matmul %133, %134, %cst_32 {dimension_numbers = #tpu.dot_dimension_numbers<[1], [0], [0], [1], [0, 0, 1, 1], [], []>} : vector<8x256xf32>, vector<256x64xf32>, vector<8x64xf32> -> vector<8x64xf32>
    %136 = tpu.iota {dimensions = array<i32: 1>} : vector<1x64xi32>
    %c8_i32 = arith.constant 8 : i32
    %c0_i32_33 = arith.constant 0 : i32
    %137 = arith.cmpi eq, %c8_i32, %c0_i32_33 : i32
    %c1_i32_34 = arith.constant 1 : i32
    %138 = arith.select %137, %c1_i32_34, %c8_i32 : i32
    %139 = vector.broadcast %138 : i32 to vector<1x64xi32>
    %140 = arith.remsi %136, %139 : vector<1x64xi32>
    %c0_i32_35 = arith.constant 0 : i32
    %141 = vector.broadcast %c0_i32_35 : i32 to vector<1x64xi32>
    %142 = arith.cmpi ne, %140, %141 : vector<1x64xi32>
    %c0_i32_36 = arith.constant 0 : i32
    %143 = vector.broadcast %c0_i32_36 : i32 to vector<1x64xi32>
    %144 = arith.cmpi slt, %140, %143 : vector<1x64xi32>
    %c0_i32_37 = arith.constant 0 : i32
    %145 = arith.cmpi slt, %138, %c0_i32_37 : i32
    %146 = vector.broadcast %145 : i1 to vector<1x64xi1>
    %147 = vector.broadcast %146 : vector<1x64xi1> to vector<1x64xi1>
    %148 = arith.xori %144, %147 : vector<1x64xi1>
    %149 = arith.andi %148, %142 : vector<1x64xi1>
    %150 = vector.broadcast %138 : i32 to vector<1x64xi32>
    %151 = arith.addi %140, %150 : vector<1x64xi32>
    %152 = arith.select %149, %151, %140 : vector<1x64xi1>, vector<1x64xi32>
    %c0_i32_38 = arith.constant 0 : i32
    %153 = vector.broadcast %c0_i32_38 : i32 to vector<1x64xi32>
    %154 = arith.cmpi eq, %152, %153 : vector<1x64xi32>
    %155 = vector.extract_strided_slice %135 {offsets = [0, 7], sizes = [8, 57], strides = [1, 1]} : vector<8x64xf32> to vector<8x57xf32>
    %156 = vector.extract_strided_slice %135 {offsets = [0, 0], sizes = [8, 7], strides = [1, 1]} : vector<8x64xf32> to vector<8x7xf32>
    %157 = tpu.concatenate %155, %156 in 1 : vector<8x57xf32>, vector<8x7xf32> -> vector<8x64xf32>
    %158 = vector.extract_strided_slice %135 {offsets = [0, 63], sizes = [8, 1], strides = [1, 1]} : vector<8x64xf32> to vector<8x1xf32>
    %159 = vector.extract_strided_slice %135 {offsets = [0, 0], sizes = [8, 63], strides = [1, 1]} : vector<8x64xf32> to vector<8x63xf32>
    %160 = tpu.concatenate %158, %159 in 1 : vector<8x1xf32>, vector<8x63xf32> -> vector<8x64xf32>
    %161 = vector.shape_cast %154 : vector<1x64xi1> to vector<1x64xi1>
    %162 = vector.broadcast %161 : vector<1x64xi1> to vector<8x64xi1>
    %163 = arith.select %162, %157, %160 : vector<8x64xi1>, vector<8x64xf32>
    %c7_i32 = arith.constant 7 : i32
    %164 = vector.broadcast %c7_i32 : i32 to vector<1x64xi32>
    %165 = arith.cmpi eq, %152, %164 : vector<1x64xi32>
    %166 = vector.extract_strided_slice %135 {offsets = [0, 57], sizes = [8, 7], strides = [1, 1]} : vector<8x64xf32> to vector<8x7xf32>
    %167 = vector.extract_strided_slice %135 {offsets = [0, 0], sizes = [8, 57], strides = [1, 1]} : vector<8x64xf32> to vector<8x57xf32>
    %168 = tpu.concatenate %166, %167 in 1 : vector<8x7xf32>, vector<8x57xf32> -> vector<8x64xf32>
    %169 = vector.extract_strided_slice %135 {offsets = [0, 1], sizes = [8, 63], strides = [1, 1]} : vector<8x64xf32> to vector<8x63xf32>
    %170 = vector.extract_strided_slice %135 {offsets = [0, 0], sizes = [8, 1], strides = [1, 1]} : vector<8x64xf32> to vector<8x1xf32>
    %171 = tpu.concatenate %169, %170 in 1 : vector<8x63xf32>, vector<8x1xf32> -> vector<8x64xf32>
    %172 = vector.shape_cast %165 : vector<1x64xi1> to vector<1x64xi1>
    %173 = vector.broadcast %172 : vector<1x64xi1> to vector<8x64xi1>
    %174 = arith.select %173, %168, %171 : vector<8x64xi1>, vector<8x64xf32>
    %cst_39 = arith.constant 1.000000e+00 : f32
    %175 = vector.broadcast %cst_39 : f32 to vector<1x64xf32>
    %176 = tpu.concatenate %163, %135, %174, %175 in 0 : vector<8x64xf32>, vector<8x64xf32>, vector<8x64xf32>, vector<1x64xf32> -> vector<25x64xf32>
    %c2 = arith.constant 2 : index
    %c0_40 = arith.constant 0 : index
    %c0_41 = arith.constant 0 : index
    %c0_42 = arith.constant 0 : index
    %177 = vector.load %arg2[%c2, %c0_40, %c0_41, %c0_42] : memref<12x3x16x49xf32, #tpu.memory_space<vmem>>, vector<1x3x16x49xf32>
    %178 = vector.shape_cast %177 : vector<1x3x16x49xf32> to vector<3x16x49xf32>
    %179 = vector.extract_strided_slice %178 {offsets = [0, 0, 0], sizes = [1, 16, 25], strides = [1, 1, 1]} : vector<3x16x49xf32> to vector<1x16x25xf32>
    %180 = vector.shape_cast %179 : vector<1x16x25xf32> to vector<16x25xf32>
    %cst_43 = arith.constant dense<0.000000e+00> : vector<16x64xf32>
    %181 = tpu.matmul %180, %176, %cst_43 {dimension_numbers = #tpu.dot_dimension_numbers<[1], [0], [0], [1], [0, 0, 1, 1], [], []>} : vector<16x25xf32>, vector<25x64xf32>, vector<16x64xf32> -> vector<16x64xf32>
    %182 = vector.extract_strided_slice %178 {offsets = [1, 0, 0], sizes = [1, 16, 25], strides = [1, 1, 1]} : vector<3x16x49xf32> to vector<1x16x25xf32>
    %183 = vector.shape_cast %182 : vector<1x16x25xf32> to vector<16x25xf32>
    %cst_44 = arith.constant dense<0.000000e+00> : vector<16x64xf32>
    %184 = tpu.matmul %183, %176, %cst_44 {dimension_numbers = #tpu.dot_dimension_numbers<[1], [0], [0], [1], [0, 0, 1, 1], [], []>} : vector<16x25xf32>, vector<25x64xf32>, vector<16x64xf32> -> vector<16x64xf32>
    %185 = vector.extract_strided_slice %178 {offsets = [2, 0, 0], sizes = [1, 16, 25], strides = [1, 1, 1]} : vector<3x16x49xf32> to vector<1x16x25xf32>
    %186 = vector.shape_cast %185 : vector<1x16x25xf32> to vector<16x25xf32>
    %cst_45 = arith.constant dense<0.000000e+00> : vector<16x64xf32>
    %187 = tpu.matmul %186, %176, %cst_45 {dimension_numbers = #tpu.dot_dimension_numbers<[1], [0], [0], [1], [0, 0, 1, 1], [], []>} : vector<16x25xf32>, vector<25x64xf32>, vector<16x64xf32> -> vector<16x64xf32>
    %188 = vector.extract_strided_slice %181 {offsets = [0, 56], sizes = [16, 8], strides = [1, 1]} : vector<16x64xf32> to vector<16x8xf32>
    %189 = vector.extract_strided_slice %181 {offsets = [0, 0], sizes = [16, 56], strides = [1, 1]} : vector<16x64xf32> to vector<16x56xf32>
    %190 = tpu.concatenate %188, %189 in 1 : vector<16x8xf32>, vector<16x56xf32> -> vector<16x64xf32>
    %191 = arith.addf %184, %190 : vector<16x64xf32>
    %192 = vector.extract_strided_slice %187 {offsets = [0, 8], sizes = [16, 56], strides = [1, 1]} : vector<16x64xf32> to vector<16x56xf32>
    %193 = vector.extract_strided_slice %187 {offsets = [0, 0], sizes = [16, 8], strides = [1, 1]} : vector<16x64xf32> to vector<16x8xf32>
    %194 = tpu.concatenate %192, %193 in 1 : vector<16x56xf32>, vector<16x8xf32> -> vector<16x64xf32>
    %195 = arith.addf %191, %194 : vector<16x64xf32>
    %196 = arith.negf %195 : vector<16x64xf32>
    %197 = math.exp %196 : vector<16x64xf32>
    %cst_46 = arith.constant 1.000000e+00 : f32
    %198 = vector.broadcast %cst_46 : f32 to vector<16x64xf32>
    %199 = arith.addf %198, %197 : vector<16x64xf32>
    %200 = arith.divf %198, %199 : vector<16x64xf32>
    %201 = arith.mulf %195, %200 : vector<16x64xf32>
    %202 = tpu.iota {dimensions = array<i32: 1>} : vector<1x64xi32>
    %c8_i32_47 = arith.constant 8 : i32
    %c0_i32_48 = arith.constant 0 : i32
    %203 = arith.cmpi eq, %c8_i32_47, %c0_i32_48 : i32
    %c1_i32_49 = arith.constant 1 : i32
    %204 = arith.select %203, %c1_i32_49, %c8_i32_47 : i32
    %205 = vector.broadcast %204 : i32 to vector<1x64xi32>
    %206 = arith.remsi %202, %205 : vector<1x64xi32>
    %c0_i32_50 = arith.constant 0 : i32
    %207 = vector.broadcast %c0_i32_50 : i32 to vector<1x64xi32>
    %208 = arith.cmpi ne, %206, %207 : vector<1x64xi32>
    %c0_i32_51 = arith.constant 0 : i32
    %209 = vector.broadcast %c0_i32_51 : i32 to vector<1x64xi32>
    %210 = arith.cmpi slt, %206, %209 : vector<1x64xi32>
    %c0_i32_52 = arith.constant 0 : i32
    %211 = arith.cmpi slt, %204, %c0_i32_52 : i32
    %212 = vector.broadcast %211 : i1 to vector<1x64xi1>
    %213 = vector.broadcast %212 : vector<1x64xi1> to vector<1x64xi1>
    %214 = arith.xori %210, %213 : vector<1x64xi1>
    %215 = arith.andi %214, %208 : vector<1x64xi1>
    %216 = vector.broadcast %204 : i32 to vector<1x64xi32>
    %217 = arith.addi %206, %216 : vector<1x64xi32>
    %218 = arith.select %215, %217, %206 : vector<1x64xi1>, vector<1x64xi32>
    %c0_i32_53 = arith.constant 0 : i32
    %219 = vector.broadcast %c0_i32_53 : i32 to vector<1x64xi32>
    %220 = arith.cmpi eq, %218, %219 : vector<1x64xi32>
    %221 = vector.extract_strided_slice %201 {offsets = [0, 7], sizes = [16, 57], strides = [1, 1]} : vector<16x64xf32> to vector<16x57xf32>
    %222 = vector.extract_strided_slice %201 {offsets = [0, 0], sizes = [16, 7], strides = [1, 1]} : vector<16x64xf32> to vector<16x7xf32>
    %223 = tpu.concatenate %221, %222 in 1 : vector<16x57xf32>, vector<16x7xf32> -> vector<16x64xf32>
    %224 = vector.extract_strided_slice %201 {offsets = [0, 63], sizes = [16, 1], strides = [1, 1]} : vector<16x64xf32> to vector<16x1xf32>
    %225 = vector.extract_strided_slice %201 {offsets = [0, 0], sizes = [16, 63], strides = [1, 1]} : vector<16x64xf32> to vector<16x63xf32>
    %226 = tpu.concatenate %224, %225 in 1 : vector<16x1xf32>, vector<16x63xf32> -> vector<16x64xf32>
    %227 = vector.shape_cast %220 : vector<1x64xi1> to vector<1x64xi1>
    %228 = vector.broadcast %227 : vector<1x64xi1> to vector<16x64xi1>
    %229 = arith.select %228, %223, %226 : vector<16x64xi1>, vector<16x64xf32>
    %c7_i32_54 = arith.constant 7 : i32
    %230 = vector.broadcast %c7_i32_54 : i32 to vector<1x64xi32>
    %231 = arith.cmpi eq, %218, %230 : vector<1x64xi32>
    %232 = vector.extract_strided_slice %201 {offsets = [0, 57], sizes = [16, 7], strides = [1, 1]} : vector<16x64xf32> to vector<16x7xf32>
    %233 = vector.extract_strided_slice %201 {offsets = [0, 0], sizes = [16, 57], strides = [1, 1]} : vector<16x64xf32> to vector<16x57xf32>
    %234 = tpu.concatenate %232, %233 in 1 : vector<16x7xf32>, vector<16x57xf32> -> vector<16x64xf32>
    %235 = vector.extract_strided_slice %201 {offsets = [0, 1], sizes = [16, 63], strides = [1, 1]} : vector<16x64xf32> to vector<16x63xf32>
    %236 = vector.extract_strided_slice %201 {offsets = [0, 0], sizes = [16, 1], strides = [1, 1]} : vector<16x64xf32> to vector<16x1xf32>
    %237 = tpu.concatenate %235, %236 in 1 : vector<16x63xf32>, vector<16x1xf32> -> vector<16x64xf32>
    %238 = vector.shape_cast %231 : vector<1x64xi1> to vector<1x64xi1>
    %239 = vector.broadcast %238 : vector<1x64xi1> to vector<16x64xi1>
    %240 = arith.select %239, %234, %237 : vector<16x64xi1>, vector<16x64xf32>
    %cst_55 = arith.constant 1.000000e+00 : f32
    %241 = vector.broadcast %cst_55 : f32 to vector<1x64xf32>
    %242 = tpu.concatenate %229, %201, %240, %241 in 0 : vector<16x64xf32>, vector<16x64xf32>, vector<16x64xf32>, vector<1x64xf32> -> vector<49x64xf32>
    %c3 = arith.constant 3 : index
    %c0_56 = arith.constant 0 : index
    %c0_57 = arith.constant 0 : index
    %c0_58 = arith.constant 0 : index
    %243 = vector.load %arg2[%c3, %c0_56, %c0_57, %c0_58] : memref<12x3x16x49xf32, #tpu.memory_space<vmem>>, vector<1x3x16x49xf32>
    %244 = vector.shape_cast %243 : vector<1x3x16x49xf32> to vector<3x16x49xf32>
    %245 = vector.extract_strided_slice %244 {offsets = [0, 0, 0], sizes = [1, 16, 49], strides = [1, 1, 1]} : vector<3x16x49xf32> to vector<1x16x49xf32>
    %246 = vector.shape_cast %245 : vector<1x16x49xf32> to vector<16x49xf32>
    %cst_59 = arith.constant dense<0.000000e+00> : vector<16x64xf32>
    %247 = tpu.matmul %246, %242, %cst_59 {dimension_numbers = #tpu.dot_dimension_numbers<[1], [0], [0], [1], [0, 0, 1, 1], [], []>} : vector<16x49xf32>, vector<49x64xf32>, vector<16x64xf32> -> vector<16x64xf32>
    %248 = vector.extract_strided_slice %244 {offsets = [1, 0, 0], sizes = [1, 16, 49], strides = [1, 1, 1]} : vector<3x16x49xf32> to vector<1x16x49xf32>
    %249 = vector.shape_cast %248 : vector<1x16x49xf32> to vector<16x49xf32>
    %cst_60 = arith.constant dense<0.000000e+00> : vector<16x64xf32>
    %250 = tpu.matmul %249, %242, %cst_60 {dimension_numbers = #tpu.dot_dimension_numbers<[1], [0], [0], [1], [0, 0, 1, 1], [], []>} : vector<16x49xf32>, vector<49x64xf32>, vector<16x64xf32> -> vector<16x64xf32>
    %251 = vector.extract_strided_slice %244 {offsets = [2, 0, 0], sizes = [1, 16, 49], strides = [1, 1, 1]} : vector<3x16x49xf32> to vector<1x16x49xf32>
    %252 = vector.shape_cast %251 : vector<1x16x49xf32> to vector<16x49xf32>
    %cst_61 = arith.constant dense<0.000000e+00> : vector<16x64xf32>
    %253 = tpu.matmul %252, %242, %cst_61 {dimension_numbers = #tpu.dot_dimension_numbers<[1], [0], [0], [1], [0, 0, 1, 1], [], []>} : vector<16x49xf32>, vector<49x64xf32>, vector<16x64xf32> -> vector<16x64xf32>
    %254 = vector.extract_strided_slice %247 {offsets = [0, 56], sizes = [16, 8], strides = [1, 1]} : vector<16x64xf32> to vector<16x8xf32>
    %255 = vector.extract_strided_slice %247 {offsets = [0, 0], sizes = [16, 56], strides = [1, 1]} : vector<16x64xf32> to vector<16x56xf32>
    %256 = tpu.concatenate %254, %255 in 1 : vector<16x8xf32>, vector<16x56xf32> -> vector<16x64xf32>
    %257 = arith.addf %250, %256 : vector<16x64xf32>
    %258 = vector.extract_strided_slice %253 {offsets = [0, 8], sizes = [16, 56], strides = [1, 1]} : vector<16x64xf32> to vector<16x56xf32>
    %259 = vector.extract_strided_slice %253 {offsets = [0, 0], sizes = [16, 8], strides = [1, 1]} : vector<16x64xf32> to vector<16x8xf32>
    %260 = tpu.concatenate %258, %259 in 1 : vector<16x56xf32>, vector<16x8xf32> -> vector<16x64xf32>
    %261 = arith.addf %257, %260 : vector<16x64xf32>
    %262 = arith.negf %261 : vector<16x64xf32>
    %263 = math.exp %262 : vector<16x64xf32>
    %cst_62 = arith.constant 1.000000e+00 : f32
    %264 = vector.broadcast %cst_62 : f32 to vector<16x64xf32>
    %265 = arith.addf %264, %263 : vector<16x64xf32>
    %266 = arith.divf %264, %265 : vector<16x64xf32>
    %267 = arith.mulf %261, %266 : vector<16x64xf32>
    %c0_63 = arith.constant 0 : index
    %c0_64 = arith.constant 0 : index
    %268 = vector.load %arg4[%c0_63, %c0_64] : memref<64x16xf32, #tpu.memory_space<vmem>>, vector<64x16xf32>
    %cst_65 = arith.constant dense<0.000000e+00> : vector<16x16xf32>
    %269 = tpu.matmul %267, %268, %cst_65 {dimension_numbers = #tpu.dot_dimension_numbers<[1], [0], [0], [1], [0, 0, 1, 1], [], []>} : vector<16x64xf32>, vector<64x16xf32>, vector<16x16xf32> -> vector<16x16xf32>
    %270 = tpu.iota {dimensions = array<i32: 1>} : vector<1x16xi32>
    %c4_i32 = arith.constant 4 : i32
    %c0_i32_66 = arith.constant 0 : i32
    %271 = arith.cmpi eq, %c4_i32, %c0_i32_66 : i32
    %c1_i32_67 = arith.constant 1 : i32
    %272 = arith.select %271, %c1_i32_67, %c4_i32 : i32
    %273 = vector.broadcast %272 : i32 to vector<1x16xi32>
    %274 = arith.remsi %270, %273 : vector<1x16xi32>
    %c0_i32_68 = arith.constant 0 : i32
    %275 = vector.broadcast %c0_i32_68 : i32 to vector<1x16xi32>
    %276 = arith.cmpi ne, %274, %275 : vector<1x16xi32>
    %c0_i32_69 = arith.constant 0 : i32
    %277 = vector.broadcast %c0_i32_69 : i32 to vector<1x16xi32>
    %278 = arith.cmpi slt, %274, %277 : vector<1x16xi32>
    %c0_i32_70 = arith.constant 0 : i32
    %279 = arith.cmpi slt, %272, %c0_i32_70 : i32
    %280 = vector.broadcast %279 : i1 to vector<1x16xi1>
    %281 = vector.broadcast %280 : vector<1x16xi1> to vector<1x16xi1>
    %282 = arith.xori %278, %281 : vector<1x16xi1>
    %283 = arith.andi %282, %276 : vector<1x16xi1>
    %284 = vector.broadcast %272 : i32 to vector<1x16xi32>
    %285 = arith.addi %274, %284 : vector<1x16xi32>
    %286 = arith.select %283, %285, %274 : vector<1x16xi1>, vector<1x16xi32>
    %c0_i32_71 = arith.constant 0 : i32
    %287 = vector.broadcast %c0_i32_71 : i32 to vector<1x16xi32>
    %288 = arith.cmpi eq, %286, %287 : vector<1x16xi32>
    %289 = vector.extract_strided_slice %269 {offsets = [0, 3], sizes = [16, 13], strides = [1, 1]} : vector<16x16xf32> to vector<16x13xf32>
    %290 = vector.extract_strided_slice %269 {offsets = [0, 0], sizes = [16, 3], strides = [1, 1]} : vector<16x16xf32> to vector<16x3xf32>
    %291 = tpu.concatenate %289, %290 in 1 : vector<16x13xf32>, vector<16x3xf32> -> vector<16x16xf32>
    %292 = vector.extract_strided_slice %269 {offsets = [0, 15], sizes = [16, 1], strides = [1, 1]} : vector<16x16xf32> to vector<16x1xf32>
    %293 = vector.extract_strided_slice %269 {offsets = [0, 0], sizes = [16, 15], strides = [1, 1]} : vector<16x16xf32> to vector<16x15xf32>
    %294 = tpu.concatenate %292, %293 in 1 : vector<16x1xf32>, vector<16x15xf32> -> vector<16x16xf32>
    %295 = vector.shape_cast %288 : vector<1x16xi1> to vector<1x16xi1>
    %296 = vector.broadcast %295 : vector<1x16xi1> to vector<16x16xi1>
    %297 = arith.select %296, %291, %294 : vector<16x16xi1>, vector<16x16xf32>
    %c3_i32 = arith.constant 3 : i32
    %298 = vector.broadcast %c3_i32 : i32 to vector<1x16xi32>
    %299 = arith.cmpi eq, %286, %298 : vector<1x16xi32>
    %300 = vector.extract_strided_slice %269 {offsets = [0, 13], sizes = [16, 3], strides = [1, 1]} : vector<16x16xf32> to vector<16x3xf32>
    %301 = vector.extract_strided_slice %269 {offsets = [0, 0], sizes = [16, 13], strides = [1, 1]} : vector<16x16xf32> to vector<16x13xf32>
    %302 = tpu.concatenate %300, %301 in 1 : vector<16x3xf32>, vector<16x13xf32> -> vector<16x16xf32>
    %303 = vector.extract_strided_slice %269 {offsets = [0, 1], sizes = [16, 15], strides = [1, 1]} : vector<16x16xf32> to vector<16x15xf32>
    %304 = vector.extract_strided_slice %269 {offsets = [0, 0], sizes = [16, 1], strides = [1, 1]} : vector<16x16xf32> to vector<16x1xf32>
    %305 = tpu.concatenate %303, %304 in 1 : vector<16x15xf32>, vector<16x1xf32> -> vector<16x16xf32>
    %306 = vector.shape_cast %299 : vector<1x16xi1> to vector<1x16xi1>
    %307 = vector.broadcast %306 : vector<1x16xi1> to vector<16x16xi1>
    %308 = arith.select %307, %302, %305 : vector<16x16xi1>, vector<16x16xf32>
    %cst_72 = arith.constant 1.000000e+00 : f32
    %309 = vector.broadcast %cst_72 : f32 to vector<1x16xf32>
    %310 = tpu.concatenate %297, %269, %308, %309 in 0 : vector<16x16xf32>, vector<16x16xf32>, vector<16x16xf32>, vector<1x16xf32> -> vector<49x16xf32>
    %c4 = arith.constant 4 : index
    %c0_73 = arith.constant 0 : index
    %c0_74 = arith.constant 0 : index
    %c0_75 = arith.constant 0 : index
    %311 = vector.load %arg2[%c4, %c0_73, %c0_74, %c0_75] : memref<12x3x16x49xf32, #tpu.memory_space<vmem>>, vector<1x3x16x49xf32>
    %312 = vector.shape_cast %311 : vector<1x3x16x49xf32> to vector<3x16x49xf32>
    %313 = vector.extract_strided_slice %312 {offsets = [0, 0, 0], sizes = [1, 4, 49], strides = [1, 1, 1]} : vector<3x16x49xf32> to vector<1x4x49xf32>
    %314 = vector.shape_cast %313 : vector<1x4x49xf32> to vector<4x49xf32>
    %cst_76 = arith.constant dense<0.000000e+00> : vector<4x16xf32>
    %315 = tpu.matmul %314, %310, %cst_76 {dimension_numbers = #tpu.dot_dimension_numbers<[1], [0], [0], [1], [0, 0, 1, 1], [], []>} : vector<4x49xf32>, vector<49x16xf32>, vector<4x16xf32> -> vector<4x16xf32>
    %316 = vector.extract_strided_slice %312 {offsets = [1, 0, 0], sizes = [1, 4, 49], strides = [1, 1, 1]} : vector<3x16x49xf32> to vector<1x4x49xf32>
    %317 = vector.shape_cast %316 : vector<1x4x49xf32> to vector<4x49xf32>
    %cst_77 = arith.constant dense<0.000000e+00> : vector<4x16xf32>
    %318 = tpu.matmul %317, %310, %cst_77 {dimension_numbers = #tpu.dot_dimension_numbers<[1], [0], [0], [1], [0, 0, 1, 1], [], []>} : vector<4x49xf32>, vector<49x16xf32>, vector<4x16xf32> -> vector<4x16xf32>
    %319 = vector.extract_strided_slice %312 {offsets = [2, 0, 0], sizes = [1, 4, 49], strides = [1, 1, 1]} : vector<3x16x49xf32> to vector<1x4x49xf32>
    %320 = vector.shape_cast %319 : vector<1x4x49xf32> to vector<4x49xf32>
    %cst_78 = arith.constant dense<0.000000e+00> : vector<4x16xf32>
    %321 = tpu.matmul %320, %310, %cst_78 {dimension_numbers = #tpu.dot_dimension_numbers<[1], [0], [0], [1], [0, 0, 1, 1], [], []>} : vector<4x49xf32>, vector<49x16xf32>, vector<4x16xf32> -> vector<4x16xf32>
    %322 = vector.extract_strided_slice %315 {offsets = [0, 12], sizes = [4, 4], strides = [1, 1]} : vector<4x16xf32> to vector<4x4xf32>
    %323 = vector.extract_strided_slice %315 {offsets = [0, 0], sizes = [4, 12], strides = [1, 1]} : vector<4x16xf32> to vector<4x12xf32>
    %324 = tpu.concatenate %322, %323 in 1 : vector<4x4xf32>, vector<4x12xf32> -> vector<4x16xf32>
    %325 = arith.addf %318, %324 : vector<4x16xf32>
    %326 = vector.extract_strided_slice %321 {offsets = [0, 4], sizes = [4, 12], strides = [1, 1]} : vector<4x16xf32> to vector<4x12xf32>
    %327 = vector.extract_strided_slice %321 {offsets = [0, 0], sizes = [4, 4], strides = [1, 1]} : vector<4x16xf32> to vector<4x4xf32>
    %328 = tpu.concatenate %326, %327 in 1 : vector<4x12xf32>, vector<4x4xf32> -> vector<4x16xf32>
    %329 = arith.addf %325, %328 : vector<4x16xf32>
    %330 = arith.negf %329 : vector<4x16xf32>
    %331 = math.exp %330 : vector<4x16xf32>
    %cst_79 = arith.constant 1.000000e+00 : f32
    %332 = vector.broadcast %cst_79 : f32 to vector<4x16xf32>
    %333 = arith.addf %332, %331 : vector<4x16xf32>
    %334 = arith.divf %332, %333 : vector<4x16xf32>
    %335 = arith.mulf %329, %334 : vector<4x16xf32>
    %336 = tpu.iota {dimensions = array<i32: 1>} : vector<1x16xi32>
    %c4_i32_80 = arith.constant 4 : i32
    %c0_i32_81 = arith.constant 0 : i32
    %337 = arith.cmpi eq, %c4_i32_80, %c0_i32_81 : i32
    %c1_i32_82 = arith.constant 1 : i32
    %338 = arith.select %337, %c1_i32_82, %c4_i32_80 : i32
    %339 = vector.broadcast %338 : i32 to vector<1x16xi32>
    %340 = arith.remsi %336, %339 : vector<1x16xi32>
    %c0_i32_83 = arith.constant 0 : i32
    %341 = vector.broadcast %c0_i32_83 : i32 to vector<1x16xi32>
    %342 = arith.cmpi ne, %340, %341 : vector<1x16xi32>
    %c0_i32_84 = arith.constant 0 : i32
    %343 = vector.broadcast %c0_i32_84 : i32 to vector<1x16xi32>
    %344 = arith.cmpi slt, %340, %343 : vector<1x16xi32>
    %c0_i32_85 = arith.constant 0 : i32
    %345 = arith.cmpi slt, %338, %c0_i32_85 : i32
    %346 = vector.broadcast %345 : i1 to vector<1x16xi1>
    %347 = vector.broadcast %346 : vector<1x16xi1> to vector<1x16xi1>
    %348 = arith.xori %344, %347 : vector<1x16xi1>
    %349 = arith.andi %348, %342 : vector<1x16xi1>
    %350 = vector.broadcast %338 : i32 to vector<1x16xi32>
    %351 = arith.addi %340, %350 : vector<1x16xi32>
    %352 = arith.select %349, %351, %340 : vector<1x16xi1>, vector<1x16xi32>
    %c0_i32_86 = arith.constant 0 : i32
    %353 = vector.broadcast %c0_i32_86 : i32 to vector<1x16xi32>
    %354 = arith.cmpi eq, %352, %353 : vector<1x16xi32>
    %355 = vector.extract_strided_slice %335 {offsets = [0, 3], sizes = [4, 13], strides = [1, 1]} : vector<4x16xf32> to vector<4x13xf32>
    %356 = vector.extract_strided_slice %335 {offsets = [0, 0], sizes = [4, 3], strides = [1, 1]} : vector<4x16xf32> to vector<4x3xf32>
    %357 = tpu.concatenate %355, %356 in 1 : vector<4x13xf32>, vector<4x3xf32> -> vector<4x16xf32>
    %358 = vector.extract_strided_slice %335 {offsets = [0, 15], sizes = [4, 1], strides = [1, 1]} : vector<4x16xf32> to vector<4x1xf32>
    %359 = vector.extract_strided_slice %335 {offsets = [0, 0], sizes = [4, 15], strides = [1, 1]} : vector<4x16xf32> to vector<4x15xf32>
    %360 = tpu.concatenate %358, %359 in 1 : vector<4x1xf32>, vector<4x15xf32> -> vector<4x16xf32>
    %361 = vector.shape_cast %354 : vector<1x16xi1> to vector<1x16xi1>
    %362 = vector.broadcast %361 : vector<1x16xi1> to vector<4x16xi1>
    %363 = arith.select %362, %357, %360 : vector<4x16xi1>, vector<4x16xf32>
    %c3_i32_87 = arith.constant 3 : i32
    %364 = vector.broadcast %c3_i32_87 : i32 to vector<1x16xi32>
    %365 = arith.cmpi eq, %352, %364 : vector<1x16xi32>
    %366 = vector.extract_strided_slice %335 {offsets = [0, 13], sizes = [4, 3], strides = [1, 1]} : vector<4x16xf32> to vector<4x3xf32>
    %367 = vector.extract_strided_slice %335 {offsets = [0, 0], sizes = [4, 13], strides = [1, 1]} : vector<4x16xf32> to vector<4x13xf32>
    %368 = tpu.concatenate %366, %367 in 1 : vector<4x3xf32>, vector<4x13xf32> -> vector<4x16xf32>
    %369 = vector.extract_strided_slice %335 {offsets = [0, 1], sizes = [4, 15], strides = [1, 1]} : vector<4x16xf32> to vector<4x15xf32>
    %370 = vector.extract_strided_slice %335 {offsets = [0, 0], sizes = [4, 1], strides = [1, 1]} : vector<4x16xf32> to vector<4x1xf32>
    %371 = tpu.concatenate %369, %370 in 1 : vector<4x15xf32>, vector<4x1xf32> -> vector<4x16xf32>
    %372 = vector.shape_cast %365 : vector<1x16xi1> to vector<1x16xi1>
    %373 = vector.broadcast %372 : vector<1x16xi1> to vector<4x16xi1>
    %374 = arith.select %373, %368, %371 : vector<4x16xi1>, vector<4x16xf32>
    %cst_88 = arith.constant 1.000000e+00 : f32
    %375 = vector.broadcast %cst_88 : f32 to vector<1x16xf32>
    %376 = tpu.concatenate %363, %335, %374, %375 in 0 : vector<4x16xf32>, vector<4x16xf32>, vector<4x16xf32>, vector<1x16xf32> -> vector<13x16xf32>
    %c5 = arith.constant 5 : index
    %c0_89 = arith.constant 0 : index
    %c0_90 = arith.constant 0 : index
    %c0_91 = arith.constant 0 : index
    %377 = vector.load %arg2[%c5, %c0_89, %c0_90, %c0_91] : memref<12x3x16x49xf32, #tpu.memory_space<vmem>>, vector<1x3x16x49xf32>
    %378 = vector.shape_cast %377 : vector<1x3x16x49xf32> to vector<3x16x49xf32>
    %379 = vector.extract_strided_slice %378 {offsets = [0, 0, 0], sizes = [1, 4, 13], strides = [1, 1, 1]} : vector<3x16x49xf32> to vector<1x4x13xf32>
    %380 = vector.shape_cast %379 : vector<1x4x13xf32> to vector<4x13xf32>
    %cst_92 = arith.constant dense<0.000000e+00> : vector<4x16xf32>
    %381 = tpu.matmul %380, %376, %cst_92 {dimension_numbers = #tpu.dot_dimension_numbers<[1], [0], [0], [1], [0, 0, 1, 1], [], []>} : vector<4x13xf32>, vector<13x16xf32>, vector<4x16xf32> -> vector<4x16xf32>
    %382 = vector.extract_strided_slice %378 {offsets = [1, 0, 0], sizes = [1, 4, 13], strides = [1, 1, 1]} : vector<3x16x49xf32> to vector<1x4x13xf32>
    %383 = vector.shape_cast %382 : vector<1x4x13xf32> to vector<4x13xf32>
    %cst_93 = arith.constant dense<0.000000e+00> : vector<4x16xf32>
    %384 = tpu.matmul %383, %376, %cst_93 {dimension_numbers = #tpu.dot_dimension_numbers<[1], [0], [0], [1], [0, 0, 1, 1], [], []>} : vector<4x13xf32>, vector<13x16xf32>, vector<4x16xf32> -> vector<4x16xf32>
    %385 = vector.extract_strided_slice %378 {offsets = [2, 0, 0], sizes = [1, 4, 13], strides = [1, 1, 1]} : vector<3x16x49xf32> to vector<1x4x13xf32>
    %386 = vector.shape_cast %385 : vector<1x4x13xf32> to vector<4x13xf32>
    %cst_94 = arith.constant dense<0.000000e+00> : vector<4x16xf32>
    %387 = tpu.matmul %386, %376, %cst_94 {dimension_numbers = #tpu.dot_dimension_numbers<[1], [0], [0], [1], [0, 0, 1, 1], [], []>} : vector<4x13xf32>, vector<13x16xf32>, vector<4x16xf32> -> vector<4x16xf32>
    %388 = vector.extract_strided_slice %381 {offsets = [0, 12], sizes = [4, 4], strides = [1, 1]} : vector<4x16xf32> to vector<4x4xf32>
    %389 = vector.extract_strided_slice %381 {offsets = [0, 0], sizes = [4, 12], strides = [1, 1]} : vector<4x16xf32> to vector<4x12xf32>
    %390 = tpu.concatenate %388, %389 in 1 : vector<4x4xf32>, vector<4x12xf32> -> vector<4x16xf32>
    %391 = arith.addf %384, %390 : vector<4x16xf32>
    %392 = vector.extract_strided_slice %387 {offsets = [0, 4], sizes = [4, 12], strides = [1, 1]} : vector<4x16xf32> to vector<4x12xf32>
    %393 = vector.extract_strided_slice %387 {offsets = [0, 0], sizes = [4, 4], strides = [1, 1]} : vector<4x16xf32> to vector<4x4xf32>
    %394 = tpu.concatenate %392, %393 in 1 : vector<4x12xf32>, vector<4x4xf32> -> vector<4x16xf32>
    %395 = arith.addf %391, %394 : vector<4x16xf32>
    %396 = arith.negf %395 : vector<4x16xf32>
    %397 = math.exp %396 : vector<4x16xf32>
    %cst_95 = arith.constant 1.000000e+00 : f32
    %398 = vector.broadcast %cst_95 : f32 to vector<4x16xf32>
    %399 = arith.addf %398, %397 : vector<4x16xf32>
    %400 = arith.divf %398, %399 : vector<4x16xf32>
    %401 = arith.mulf %395, %400 : vector<4x16xf32>
    %402 = tpu.iota {dimensions = array<i32: 1>} : vector<1x16xi32>
    %c4_i32_96 = arith.constant 4 : i32
    %c0_i32_97 = arith.constant 0 : i32
    %403 = arith.cmpi eq, %c4_i32_96, %c0_i32_97 : i32
    %c1_i32_98 = arith.constant 1 : i32
    %404 = arith.select %403, %c1_i32_98, %c4_i32_96 : i32
    %405 = vector.broadcast %404 : i32 to vector<1x16xi32>
    %406 = arith.remsi %402, %405 : vector<1x16xi32>
    %c0_i32_99 = arith.constant 0 : i32
    %407 = vector.broadcast %c0_i32_99 : i32 to vector<1x16xi32>
    %408 = arith.cmpi ne, %406, %407 : vector<1x16xi32>
    %c0_i32_100 = arith.constant 0 : i32
    %409 = vector.broadcast %c0_i32_100 : i32 to vector<1x16xi32>
    %410 = arith.cmpi slt, %406, %409 : vector<1x16xi32>
    %c0_i32_101 = arith.constant 0 : i32
    %411 = arith.cmpi slt, %404, %c0_i32_101 : i32
    %412 = vector.broadcast %411 : i1 to vector<1x16xi1>
    %413 = vector.broadcast %412 : vector<1x16xi1> to vector<1x16xi1>
    %414 = arith.xori %410, %413 : vector<1x16xi1>
    %415 = arith.andi %414, %408 : vector<1x16xi1>
    %416 = vector.broadcast %404 : i32 to vector<1x16xi32>
    %417 = arith.addi %406, %416 : vector<1x16xi32>
    %418 = arith.select %415, %417, %406 : vector<1x16xi1>, vector<1x16xi32>
    %c0_i32_102 = arith.constant 0 : i32
    %419 = vector.broadcast %c0_i32_102 : i32 to vector<1x16xi32>
    %420 = arith.cmpi eq, %418, %419 : vector<1x16xi32>
    %421 = vector.extract_strided_slice %401 {offsets = [0, 3], sizes = [4, 13], strides = [1, 1]} : vector<4x16xf32> to vector<4x13xf32>
    %422 = vector.extract_strided_slice %401 {offsets = [0, 0], sizes = [4, 3], strides = [1, 1]} : vector<4x16xf32> to vector<4x3xf32>
    %423 = tpu.concatenate %421, %422 in 1 : vector<4x13xf32>, vector<4x3xf32> -> vector<4x16xf32>
    %424 = vector.extract_strided_slice %401 {offsets = [0, 15], sizes = [4, 1], strides = [1, 1]} : vector<4x16xf32> to vector<4x1xf32>
    %425 = vector.extract_strided_slice %401 {offsets = [0, 0], sizes = [4, 15], strides = [1, 1]} : vector<4x16xf32> to vector<4x15xf32>
    %426 = tpu.concatenate %424, %425 in 1 : vector<4x1xf32>, vector<4x15xf32> -> vector<4x16xf32>
    %427 = vector.shape_cast %420 : vector<1x16xi1> to vector<1x16xi1>
    %428 = vector.broadcast %427 : vector<1x16xi1> to vector<4x16xi1>
    %429 = arith.select %428, %423, %426 : vector<4x16xi1>, vector<4x16xf32>
    %c3_i32_103 = arith.constant 3 : i32
    %430 = vector.broadcast %c3_i32_103 : i32 to vector<1x16xi32>
    %431 = arith.cmpi eq, %418, %430 : vector<1x16xi32>
    %432 = vector.extract_strided_slice %401 {offsets = [0, 13], sizes = [4, 3], strides = [1, 1]} : vector<4x16xf32> to vector<4x3xf32>
    %433 = vector.extract_strided_slice %401 {offsets = [0, 0], sizes = [4, 13], strides = [1, 1]} : vector<4x16xf32> to vector<4x13xf32>
    %434 = tpu.concatenate %432, %433 in 1 : vector<4x3xf32>, vector<4x13xf32> -> vector<4x16xf32>
    %435 = vector.extract_strided_slice %401 {offsets = [0, 1], sizes = [4, 15], strides = [1, 1]} : vector<4x16xf32> to vector<4x15xf32>
    %436 = vector.extract_strided_slice %401 {offsets = [0, 0], sizes = [4, 1], strides = [1, 1]} : vector<4x16xf32> to vector<4x1xf32>
    %437 = tpu.concatenate %435, %436 in 1 : vector<4x15xf32>, vector<4x1xf32> -> vector<4x16xf32>
    %438 = vector.shape_cast %431 : vector<1x16xi1> to vector<1x16xi1>
    %439 = vector.broadcast %438 : vector<1x16xi1> to vector<4x16xi1>
    %440 = arith.select %439, %434, %437 : vector<4x16xi1>, vector<4x16xf32>
    %cst_104 = arith.constant 1.000000e+00 : f32
    %441 = vector.broadcast %cst_104 : f32 to vector<1x16xf32>
    %442 = tpu.concatenate %429, %401, %440, %441 in 0 : vector<4x16xf32>, vector<4x16xf32>, vector<4x16xf32>, vector<1x16xf32> -> vector<13x16xf32>
    %c6 = arith.constant 6 : index
    %c0_105 = arith.constant 0 : index
    %c0_106 = arith.constant 0 : index
    %c0_107 = arith.constant 0 : index
    %443 = vector.load %arg2[%c6, %c0_105, %c0_106, %c0_107] : memref<12x3x16x49xf32, #tpu.memory_space<vmem>>, vector<1x3x16x49xf32>
    %444 = vector.shape_cast %443 : vector<1x3x16x49xf32> to vector<3x16x49xf32>
    %445 = vector.extract_strided_slice %444 {offsets = [0, 0, 0], sizes = [1, 16, 13], strides = [1, 1, 1]} : vector<3x16x49xf32> to vector<1x16x13xf32>
    %446 = vector.shape_cast %445 : vector<1x16x13xf32> to vector<16x13xf32>
    %cst_108 = arith.constant dense<0.000000e+00> : vector<16x16xf32>
    %447 = tpu.matmul %446, %442, %cst_108 {dimension_numbers = #tpu.dot_dimension_numbers<[1], [0], [0], [1], [0, 0, 1, 1], [], []>} : vector<16x13xf32>, vector<13x16xf32>, vector<16x16xf32> -> vector<16x16xf32>
    %448 = vector.extract_strided_slice %444 {offsets = [1, 0, 0], sizes = [1, 16, 13], strides = [1, 1, 1]} : vector<3x16x49xf32> to vector<1x16x13xf32>
    %449 = vector.shape_cast %448 : vector<1x16x13xf32> to vector<16x13xf32>
    %cst_109 = arith.constant dense<0.000000e+00> : vector<16x16xf32>
    %450 = tpu.matmul %449, %442, %cst_109 {dimension_numbers = #tpu.dot_dimension_numbers<[1], [0], [0], [1], [0, 0, 1, 1], [], []>} : vector<16x13xf32>, vector<13x16xf32>, vector<16x16xf32> -> vector<16x16xf32>
    %451 = vector.extract_strided_slice %444 {offsets = [2, 0, 0], sizes = [1, 16, 13], strides = [1, 1, 1]} : vector<3x16x49xf32> to vector<1x16x13xf32>
    %452 = vector.shape_cast %451 : vector<1x16x13xf32> to vector<16x13xf32>
    %cst_110 = arith.constant dense<0.000000e+00> : vector<16x16xf32>
    %453 = tpu.matmul %452, %442, %cst_110 {dimension_numbers = #tpu.dot_dimension_numbers<[1], [0], [0], [1], [0, 0, 1, 1], [], []>} : vector<16x13xf32>, vector<13x16xf32>, vector<16x16xf32> -> vector<16x16xf32>
    %454 = vector.extract_strided_slice %447 {offsets = [0, 12], sizes = [16, 4], strides = [1, 1]} : vector<16x16xf32> to vector<16x4xf32>
    %455 = vector.extract_strided_slice %447 {offsets = [0, 0], sizes = [16, 12], strides = [1, 1]} : vector<16x16xf32> to vector<16x12xf32>
    %456 = tpu.concatenate %454, %455 in 1 : vector<16x4xf32>, vector<16x12xf32> -> vector<16x16xf32>
    %457 = arith.addf %450, %456 : vector<16x16xf32>
    %458 = vector.extract_strided_slice %453 {offsets = [0, 4], sizes = [16, 12], strides = [1, 1]} : vector<16x16xf32> to vector<16x12xf32>
    %459 = vector.extract_strided_slice %453 {offsets = [0, 0], sizes = [16, 4], strides = [1, 1]} : vector<16x16xf32> to vector<16x4xf32>
    %460 = tpu.concatenate %458, %459 in 1 : vector<16x12xf32>, vector<16x4xf32> -> vector<16x16xf32>
    %461 = arith.addf %457, %460 : vector<16x16xf32>
    %462 = arith.negf %461 : vector<16x16xf32>
    %463 = math.exp %462 : vector<16x16xf32>
    %cst_111 = arith.constant 1.000000e+00 : f32
    %464 = vector.broadcast %cst_111 : f32 to vector<16x16xf32>
    %465 = arith.addf %464, %463 : vector<16x16xf32>
    %466 = arith.divf %464, %465 : vector<16x16xf32>
    %467 = arith.mulf %461, %466 : vector<16x16xf32>
    %468 = tpu.iota {dimensions = array<i32: 1>} : vector<1x16xi32>
    %c4_i32_112 = arith.constant 4 : i32
    %c0_i32_113 = arith.constant 0 : i32
    %469 = arith.cmpi eq, %c4_i32_112, %c0_i32_113 : i32
    %c1_i32_114 = arith.constant 1 : i32
    %470 = arith.select %469, %c1_i32_114, %c4_i32_112 : i32
    %471 = vector.broadcast %470 : i32 to vector<1x16xi32>
    %472 = arith.remsi %468, %471 : vector<1x16xi32>
    %c0_i32_115 = arith.constant 0 : i32
    %473 = vector.broadcast %c0_i32_115 : i32 to vector<1x16xi32>
    %474 = arith.cmpi ne, %472, %473 : vector<1x16xi32>
    %c0_i32_116 = arith.constant 0 : i32
    %475 = vector.broadcast %c0_i32_116 : i32 to vector<1x16xi32>
    %476 = arith.cmpi slt, %472, %475 : vector<1x16xi32>
    %c0_i32_117 = arith.constant 0 : i32
    %477 = arith.cmpi slt, %470, %c0_i32_117 : i32
    %478 = vector.broadcast %477 : i1 to vector<1x16xi1>
    %479 = vector.broadcast %478 : vector<1x16xi1> to vector<1x16xi1>
    %480 = arith.xori %476, %479 : vector<1x16xi1>
    %481 = arith.andi %480, %474 : vector<1x16xi1>
    %482 = vector.broadcast %470 : i32 to vector<1x16xi32>
    %483 = arith.addi %472, %482 : vector<1x16xi32>
    %484 = arith.select %481, %483, %472 : vector<1x16xi1>, vector<1x16xi32>
    %c0_i32_118 = arith.constant 0 : i32
    %485 = vector.broadcast %c0_i32_118 : i32 to vector<1x16xi32>
    %486 = arith.cmpi eq, %484, %485 : vector<1x16xi32>
    %487 = vector.extract_strided_slice %467 {offsets = [0, 3], sizes = [16, 13], strides = [1, 1]} : vector<16x16xf32> to vector<16x13xf32>
    %488 = vector.extract_strided_slice %467 {offsets = [0, 0], sizes = [16, 3], strides = [1, 1]} : vector<16x16xf32> to vector<16x3xf32>
    %489 = tpu.concatenate %487, %488 in 1 : vector<16x13xf32>, vector<16x3xf32> -> vector<16x16xf32>
    %490 = vector.extract_strided_slice %467 {offsets = [0, 15], sizes = [16, 1], strides = [1, 1]} : vector<16x16xf32> to vector<16x1xf32>
    %491 = vector.extract_strided_slice %467 {offsets = [0, 0], sizes = [16, 15], strides = [1, 1]} : vector<16x16xf32> to vector<16x15xf32>
    %492 = tpu.concatenate %490, %491 in 1 : vector<16x1xf32>, vector<16x15xf32> -> vector<16x16xf32>
    %493 = vector.shape_cast %486 : vector<1x16xi1> to vector<1x16xi1>
    %494 = vector.broadcast %493 : vector<1x16xi1> to vector<16x16xi1>
    %495 = arith.select %494, %489, %492 : vector<16x16xi1>, vector<16x16xf32>
    %c3_i32_119 = arith.constant 3 : i32
    %496 = vector.broadcast %c3_i32_119 : i32 to vector<1x16xi32>
    %497 = arith.cmpi eq, %484, %496 : vector<1x16xi32>
    %498 = vector.extract_strided_slice %467 {offsets = [0, 13], sizes = [16, 3], strides = [1, 1]} : vector<16x16xf32> to vector<16x3xf32>
    %499 = vector.extract_strided_slice %467 {offsets = [0, 0], sizes = [16, 13], strides = [1, 1]} : vector<16x16xf32> to vector<16x13xf32>
    %500 = tpu.concatenate %498, %499 in 1 : vector<16x3xf32>, vector<16x13xf32> -> vector<16x16xf32>
    %501 = vector.extract_strided_slice %467 {offsets = [0, 1], sizes = [16, 15], strides = [1, 1]} : vector<16x16xf32> to vector<16x15xf32>
    %502 = vector.extract_strided_slice %467 {offsets = [0, 0], sizes = [16, 1], strides = [1, 1]} : vector<16x16xf32> to vector<16x1xf32>
    %503 = tpu.concatenate %501, %502 in 1 : vector<16x15xf32>, vector<16x1xf32> -> vector<16x16xf32>
    %504 = vector.shape_cast %497 : vector<1x16xi1> to vector<1x16xi1>
    %505 = vector.broadcast %504 : vector<1x16xi1> to vector<16x16xi1>
    %506 = arith.select %505, %500, %503 : vector<16x16xi1>, vector<16x16xf32>
    %cst_120 = arith.constant 1.000000e+00 : f32
    %507 = vector.broadcast %cst_120 : f32 to vector<1x16xf32>
    %508 = tpu.concatenate %495, %467, %506, %507 in 0 : vector<16x16xf32>, vector<16x16xf32>, vector<16x16xf32>, vector<1x16xf32> -> vector<49x16xf32>
    %c7 = arith.constant 7 : index
    %c0_121 = arith.constant 0 : index
    %c0_122 = arith.constant 0 : index
    %c0_123 = arith.constant 0 : index
    %509 = vector.load %arg2[%c7, %c0_121, %c0_122, %c0_123] : memref<12x3x16x49xf32, #tpu.memory_space<vmem>>, vector<1x3x16x49xf32>
    %510 = vector.shape_cast %509 : vector<1x3x16x49xf32> to vector<3x16x49xf32>
    %511 = vector.extract_strided_slice %510 {offsets = [0, 0, 0], sizes = [1, 16, 49], strides = [1, 1, 1]} : vector<3x16x49xf32> to vector<1x16x49xf32>
    %512 = vector.shape_cast %511 : vector<1x16x49xf32> to vector<16x49xf32>
    %cst_124 = arith.constant dense<0.000000e+00> : vector<16x16xf32>
    %513 = tpu.matmul %512, %508, %cst_124 {dimension_numbers = #tpu.dot_dimension_numbers<[1], [0], [0], [1], [0, 0, 1, 1], [], []>} : vector<16x49xf32>, vector<49x16xf32>, vector<16x16xf32> -> vector<16x16xf32>
    %514 = vector.extract_strided_slice %510 {offsets = [1, 0, 0], sizes = [1, 16, 49], strides = [1, 1, 1]} : vector<3x16x49xf32> to vector<1x16x49xf32>
    %515 = vector.shape_cast %514 : vector<1x16x49xf32> to vector<16x49xf32>
    %cst_125 = arith.constant dense<0.000000e+00> : vector<16x16xf32>
    %516 = tpu.matmul %515, %508, %cst_125 {dimension_numbers = #tpu.dot_dimension_numbers<[1], [0], [0], [1], [0, 0, 1, 1], [], []>} : vector<16x49xf32>, vector<49x16xf32>, vector<16x16xf32> -> vector<16x16xf32>
    %517 = vector.extract_strided_slice %510 {offsets = [2, 0, 0], sizes = [1, 16, 49], strides = [1, 1, 1]} : vector<3x16x49xf32> to vector<1x16x49xf32>
    %518 = vector.shape_cast %517 : vector<1x16x49xf32> to vector<16x49xf32>
    %cst_126 = arith.constant dense<0.000000e+00> : vector<16x16xf32>
    %519 = tpu.matmul %518, %508, %cst_126 {dimension_numbers = #tpu.dot_dimension_numbers<[1], [0], [0], [1], [0, 0, 1, 1], [], []>} : vector<16x49xf32>, vector<49x16xf32>, vector<16x16xf32> -> vector<16x16xf32>
    %520 = vector.extract_strided_slice %513 {offsets = [0, 12], sizes = [16, 4], strides = [1, 1]} : vector<16x16xf32> to vector<16x4xf32>
    %521 = vector.extract_strided_slice %513 {offsets = [0, 0], sizes = [16, 12], strides = [1, 1]} : vector<16x16xf32> to vector<16x12xf32>
    %522 = tpu.concatenate %520, %521 in 1 : vector<16x4xf32>, vector<16x12xf32> -> vector<16x16xf32>
    %523 = arith.addf %516, %522 : vector<16x16xf32>
    %524 = vector.extract_strided_slice %519 {offsets = [0, 4], sizes = [16, 12], strides = [1, 1]} : vector<16x16xf32> to vector<16x12xf32>
    %525 = vector.extract_strided_slice %519 {offsets = [0, 0], sizes = [16, 4], strides = [1, 1]} : vector<16x16xf32> to vector<16x4xf32>
    %526 = tpu.concatenate %524, %525 in 1 : vector<16x12xf32>, vector<16x4xf32> -> vector<16x16xf32>
    %527 = arith.addf %523, %526 : vector<16x16xf32>
    %528 = arith.negf %527 : vector<16x16xf32>
    %529 = math.exp %528 : vector<16x16xf32>
    %cst_127 = arith.constant 1.000000e+00 : f32
    %530 = vector.broadcast %cst_127 : f32 to vector<16x16xf32>
    %531 = arith.addf %530, %529 : vector<16x16xf32>
    %532 = arith.divf %530, %531 : vector<16x16xf32>
    %533 = arith.mulf %527, %532 : vector<16x16xf32>
    %c0_128 = arith.constant 0 : index
    %c0_129 = arith.constant 0 : index
    %534 = vector.load %arg5[%c0_128, %c0_129] : memref<16x64xf32, #tpu.memory_space<vmem>>, vector<16x64xf32>
    %cst_130 = arith.constant dense<0.000000e+00> : vector<16x64xf32>
    %535 = tpu.matmul %533, %534, %cst_130 {dimension_numbers = #tpu.dot_dimension_numbers<[1], [0], [0], [1], [0, 0, 1, 1], [], []>} : vector<16x16xf32>, vector<16x64xf32>, vector<16x64xf32> -> vector<16x64xf32>
    %536 = tpu.iota {dimensions = array<i32: 1>} : vector<1x64xi32>
    %c8_i32_131 = arith.constant 8 : i32
    %c0_i32_132 = arith.constant 0 : i32
    %537 = arith.cmpi eq, %c8_i32_131, %c0_i32_132 : i32
    %c1_i32_133 = arith.constant 1 : i32
    %538 = arith.select %537, %c1_i32_133, %c8_i32_131 : i32
    %539 = vector.broadcast %538 : i32 to vector<1x64xi32>
    %540 = arith.remsi %536, %539 : vector<1x64xi32>
    %c0_i32_134 = arith.constant 0 : i32
    %541 = vector.broadcast %c0_i32_134 : i32 to vector<1x64xi32>
    %542 = arith.cmpi ne, %540, %541 : vector<1x64xi32>
    %c0_i32_135 = arith.constant 0 : i32
    %543 = vector.broadcast %c0_i32_135 : i32 to vector<1x64xi32>
    %544 = arith.cmpi slt, %540, %543 : vector<1x64xi32>
    %c0_i32_136 = arith.constant 0 : i32
    %545 = arith.cmpi slt, %538, %c0_i32_136 : i32
    %546 = vector.broadcast %545 : i1 to vector<1x64xi1>
    %547 = vector.broadcast %546 : vector<1x64xi1> to vector<1x64xi1>
    %548 = arith.xori %544, %547 : vector<1x64xi1>
    %549 = arith.andi %548, %542 : vector<1x64xi1>
    %550 = vector.broadcast %538 : i32 to vector<1x64xi32>
    %551 = arith.addi %540, %550 : vector<1x64xi32>
    %552 = arith.select %549, %551, %540 : vector<1x64xi1>, vector<1x64xi32>
    %c0_i32_137 = arith.constant 0 : i32
    %553 = vector.broadcast %c0_i32_137 : i32 to vector<1x64xi32>
    %554 = arith.cmpi eq, %552, %553 : vector<1x64xi32>
    %555 = vector.extract_strided_slice %535 {offsets = [0, 7], sizes = [16, 57], strides = [1, 1]} : vector<16x64xf32> to vector<16x57xf32>
    %556 = vector.extract_strided_slice %535 {offsets = [0, 0], sizes = [16, 7], strides = [1, 1]} : vector<16x64xf32> to vector<16x7xf32>
    %557 = tpu.concatenate %555, %556 in 1 : vector<16x57xf32>, vector<16x7xf32> -> vector<16x64xf32>
    %558 = vector.extract_strided_slice %535 {offsets = [0, 63], sizes = [16, 1], strides = [1, 1]} : vector<16x64xf32> to vector<16x1xf32>
    %559 = vector.extract_strided_slice %535 {offsets = [0, 0], sizes = [16, 63], strides = [1, 1]} : vector<16x64xf32> to vector<16x63xf32>
    %560 = tpu.concatenate %558, %559 in 1 : vector<16x1xf32>, vector<16x63xf32> -> vector<16x64xf32>
    %561 = vector.shape_cast %554 : vector<1x64xi1> to vector<1x64xi1>
    %562 = vector.broadcast %561 : vector<1x64xi1> to vector<16x64xi1>
    %563 = arith.select %562, %557, %560 : vector<16x64xi1>, vector<16x64xf32>
    %c7_i32_138 = arith.constant 7 : i32
    %564 = vector.broadcast %c7_i32_138 : i32 to vector<1x64xi32>
    %565 = arith.cmpi eq, %552, %564 : vector<1x64xi32>
    %566 = vector.extract_strided_slice %535 {offsets = [0, 57], sizes = [16, 7], strides = [1, 1]} : vector<16x64xf32> to vector<16x7xf32>
    %567 = vector.extract_strided_slice %535 {offsets = [0, 0], sizes = [16, 57], strides = [1, 1]} : vector<16x64xf32> to vector<16x57xf32>
    %568 = tpu.concatenate %566, %567 in 1 : vector<16x7xf32>, vector<16x57xf32> -> vector<16x64xf32>
    %569 = vector.extract_strided_slice %535 {offsets = [0, 1], sizes = [16, 63], strides = [1, 1]} : vector<16x64xf32> to vector<16x63xf32>
    %570 = vector.extract_strided_slice %535 {offsets = [0, 0], sizes = [16, 1], strides = [1, 1]} : vector<16x64xf32> to vector<16x1xf32>
    %571 = tpu.concatenate %569, %570 in 1 : vector<16x63xf32>, vector<16x1xf32> -> vector<16x64xf32>
    %572 = vector.shape_cast %565 : vector<1x64xi1> to vector<1x64xi1>
    %573 = vector.broadcast %572 : vector<1x64xi1> to vector<16x64xi1>
    %574 = arith.select %573, %568, %571 : vector<16x64xi1>, vector<16x64xf32>
    %cst_139 = arith.constant 1.000000e+00 : f32
    %575 = vector.broadcast %cst_139 : f32 to vector<1x64xf32>
    %576 = tpu.concatenate %563, %535, %574, %575 in 0 : vector<16x64xf32>, vector<16x64xf32>, vector<16x64xf32>, vector<1x64xf32> -> vector<49x64xf32>
    %c8 = arith.constant 8 : index
    %c0_140 = arith.constant 0 : index
    %c0_141 = arith.constant 0 : index
    %c0_142 = arith.constant 0 : index
    %577 = vector.load %arg2[%c8, %c0_140, %c0_141, %c0_142] : memref<12x3x16x49xf32, #tpu.memory_space<vmem>>, vector<1x3x16x49xf32>
    %578 = vector.shape_cast %577 : vector<1x3x16x49xf32> to vector<3x16x49xf32>
    %579 = vector.extract_strided_slice %578 {offsets = [0, 0, 0], sizes = [1, 8, 49], strides = [1, 1, 1]} : vector<3x16x49xf32> to vector<1x8x49xf32>
    %580 = vector.shape_cast %579 : vector<1x8x49xf32> to vector<8x49xf32>
    %cst_143 = arith.constant dense<0.000000e+00> : vector<8x64xf32>
    %581 = tpu.matmul %580, %576, %cst_143 {dimension_numbers = #tpu.dot_dimension_numbers<[1], [0], [0], [1], [0, 0, 1, 1], [], []>} : vector<8x49xf32>, vector<49x64xf32>, vector<8x64xf32> -> vector<8x64xf32>
    %582 = vector.extract_strided_slice %578 {offsets = [1, 0, 0], sizes = [1, 8, 49], strides = [1, 1, 1]} : vector<3x16x49xf32> to vector<1x8x49xf32>
    %583 = vector.shape_cast %582 : vector<1x8x49xf32> to vector<8x49xf32>
    %cst_144 = arith.constant dense<0.000000e+00> : vector<8x64xf32>
    %584 = tpu.matmul %583, %576, %cst_144 {dimension_numbers = #tpu.dot_dimension_numbers<[1], [0], [0], [1], [0, 0, 1, 1], [], []>} : vector<8x49xf32>, vector<49x64xf32>, vector<8x64xf32> -> vector<8x64xf32>
    %585 = vector.extract_strided_slice %578 {offsets = [2, 0, 0], sizes = [1, 8, 49], strides = [1, 1, 1]} : vector<3x16x49xf32> to vector<1x8x49xf32>
    %586 = vector.shape_cast %585 : vector<1x8x49xf32> to vector<8x49xf32>
    %cst_145 = arith.constant dense<0.000000e+00> : vector<8x64xf32>
    %587 = tpu.matmul %586, %576, %cst_145 {dimension_numbers = #tpu.dot_dimension_numbers<[1], [0], [0], [1], [0, 0, 1, 1], [], []>} : vector<8x49xf32>, vector<49x64xf32>, vector<8x64xf32> -> vector<8x64xf32>
    %588 = vector.extract_strided_slice %581 {offsets = [0, 56], sizes = [8, 8], strides = [1, 1]} : vector<8x64xf32> to vector<8x8xf32>
    %589 = vector.extract_strided_slice %581 {offsets = [0, 0], sizes = [8, 56], strides = [1, 1]} : vector<8x64xf32> to vector<8x56xf32>
    %590 = tpu.concatenate %588, %589 in 1 : vector<8x8xf32>, vector<8x56xf32> -> vector<8x64xf32>
    %591 = arith.addf %584, %590 : vector<8x64xf32>
    %592 = vector.extract_strided_slice %587 {offsets = [0, 8], sizes = [8, 56], strides = [1, 1]} : vector<8x64xf32> to vector<8x56xf32>
    %593 = vector.extract_strided_slice %587 {offsets = [0, 0], sizes = [8, 8], strides = [1, 1]} : vector<8x64xf32> to vector<8x8xf32>
    %594 = tpu.concatenate %592, %593 in 1 : vector<8x56xf32>, vector<8x8xf32> -> vector<8x64xf32>
    %595 = arith.addf %591, %594 : vector<8x64xf32>
    %596 = arith.negf %595 : vector<8x64xf32>
    %597 = math.exp %596 : vector<8x64xf32>
    %cst_146 = arith.constant 1.000000e+00 : f32
    %598 = vector.broadcast %cst_146 : f32 to vector<8x64xf32>
    %599 = arith.addf %598, %597 : vector<8x64xf32>
    %600 = arith.divf %598, %599 : vector<8x64xf32>
    %601 = arith.mulf %595, %600 : vector<8x64xf32>
    %602 = tpu.iota {dimensions = array<i32: 1>} : vector<1x64xi32>
    %c8_i32_147 = arith.constant 8 : i32
    %c0_i32_148 = arith.constant 0 : i32
    %603 = arith.cmpi eq, %c8_i32_147, %c0_i32_148 : i32
    %c1_i32_149 = arith.constant 1 : i32
    %604 = arith.select %603, %c1_i32_149, %c8_i32_147 : i32
    %605 = vector.broadcast %604 : i32 to vector<1x64xi32>
    %606 = arith.remsi %602, %605 : vector<1x64xi32>
    %c0_i32_150 = arith.constant 0 : i32
    %607 = vector.broadcast %c0_i32_150 : i32 to vector<1x64xi32>
    %608 = arith.cmpi ne, %606, %607 : vector<1x64xi32>
    %c0_i32_151 = arith.constant 0 : i32
    %609 = vector.broadcast %c0_i32_151 : i32 to vector<1x64xi32>
    %610 = arith.cmpi slt, %606, %609 : vector<1x64xi32>
    %c0_i32_152 = arith.constant 0 : i32
    %611 = arith.cmpi slt, %604, %c0_i32_152 : i32
    %612 = vector.broadcast %611 : i1 to vector<1x64xi1>
    %613 = vector.broadcast %612 : vector<1x64xi1> to vector<1x64xi1>
    %614 = arith.xori %610, %613 : vector<1x64xi1>
    %615 = arith.andi %614, %608 : vector<1x64xi1>
    %616 = vector.broadcast %604 : i32 to vector<1x64xi32>
    %617 = arith.addi %606, %616 : vector<1x64xi32>
    %618 = arith.select %615, %617, %606 : vector<1x64xi1>, vector<1x64xi32>
    %c0_i32_153 = arith.constant 0 : i32
    %619 = vector.broadcast %c0_i32_153 : i32 to vector<1x64xi32>
    %620 = arith.cmpi eq, %618, %619 : vector<1x64xi32>
    %621 = vector.extract_strided_slice %601 {offsets = [0, 7], sizes = [8, 57], strides = [1, 1]} : vector<8x64xf32> to vector<8x57xf32>
    %622 = vector.extract_strided_slice %601 {offsets = [0, 0], sizes = [8, 7], strides = [1, 1]} : vector<8x64xf32> to vector<8x7xf32>
    %623 = tpu.concatenate %621, %622 in 1 : vector<8x57xf32>, vector<8x7xf32> -> vector<8x64xf32>
    %624 = vector.extract_strided_slice %601 {offsets = [0, 63], sizes = [8, 1], strides = [1, 1]} : vector<8x64xf32> to vector<8x1xf32>
    %625 = vector.extract_strided_slice %601 {offsets = [0, 0], sizes = [8, 63], strides = [1, 1]} : vector<8x64xf32> to vector<8x63xf32>
    %626 = tpu.concatenate %624, %625 in 1 : vector<8x1xf32>, vector<8x63xf32> -> vector<8x64xf32>
    %627 = vector.shape_cast %620 : vector<1x64xi1> to vector<1x64xi1>
    %628 = vector.broadcast %627 : vector<1x64xi1> to vector<8x64xi1>
    %629 = arith.select %628, %623, %626 : vector<8x64xi1>, vector<8x64xf32>
    %c7_i32_154 = arith.constant 7 : i32
    %630 = vector.broadcast %c7_i32_154 : i32 to vector<1x64xi32>
    %631 = arith.cmpi eq, %618, %630 : vector<1x64xi32>
    %632 = vector.extract_strided_slice %601 {offsets = [0, 57], sizes = [8, 7], strides = [1, 1]} : vector<8x64xf32> to vector<8x7xf32>
    %633 = vector.extract_strided_slice %601 {offsets = [0, 0], sizes = [8, 57], strides = [1, 1]} : vector<8x64xf32> to vector<8x57xf32>
    %634 = tpu.concatenate %632, %633 in 1 : vector<8x7xf32>, vector<8x57xf32> -> vector<8x64xf32>
    %635 = vector.extract_strided_slice %601 {offsets = [0, 1], sizes = [8, 63], strides = [1, 1]} : vector<8x64xf32> to vector<8x63xf32>
    %636 = vector.extract_strided_slice %601 {offsets = [0, 0], sizes = [8, 1], strides = [1, 1]} : vector<8x64xf32> to vector<8x1xf32>
    %637 = tpu.concatenate %635, %636 in 1 : vector<8x63xf32>, vector<8x1xf32> -> vector<8x64xf32>
    %638 = vector.shape_cast %631 : vector<1x64xi1> to vector<1x64xi1>
    %639 = vector.broadcast %638 : vector<1x64xi1> to vector<8x64xi1>
    %640 = arith.select %639, %634, %637 : vector<8x64xi1>, vector<8x64xf32>
    %cst_155 = arith.constant 1.000000e+00 : f32
    %641 = vector.broadcast %cst_155 : f32 to vector<1x64xf32>
    %642 = tpu.concatenate %629, %601, %640, %641 in 0 : vector<8x64xf32>, vector<8x64xf32>, vector<8x64xf32>, vector<1x64xf32> -> vector<25x64xf32>
    %c9 = arith.constant 9 : index
    %c0_156 = arith.constant 0 : index
    %c0_157 = arith.constant 0 : index
    %c0_158 = arith.constant 0 : index
    %643 = vector.load %arg2[%c9, %c0_156, %c0_157, %c0_158] : memref<12x3x16x49xf32, #tpu.memory_space<vmem>>, vector<1x3x16x49xf32>
    %644 = vector.shape_cast %643 : vector<1x3x16x49xf32> to vector<3x16x49xf32>
    %645 = vector.extract_strided_slice %644 {offsets = [0, 0, 0], sizes = [1, 8, 25], strides = [1, 1, 1]} : vector<3x16x49xf32> to vector<1x8x25xf32>
    %646 = vector.shape_cast %645 : vector<1x8x25xf32> to vector<8x25xf32>
    %cst_159 = arith.constant dense<0.000000e+00> : vector<8x64xf32>
    %647 = tpu.matmul %646, %642, %cst_159 {dimension_numbers = #tpu.dot_dimension_numbers<[1], [0], [0], [1], [0, 0, 1, 1], [], []>} : vector<8x25xf32>, vector<25x64xf32>, vector<8x64xf32> -> vector<8x64xf32>
    %648 = vector.extract_strided_slice %644 {offsets = [1, 0, 0], sizes = [1, 8, 25], strides = [1, 1, 1]} : vector<3x16x49xf32> to vector<1x8x25xf32>
    %649 = vector.shape_cast %648 : vector<1x8x25xf32> to vector<8x25xf32>
    %cst_160 = arith.constant dense<0.000000e+00> : vector<8x64xf32>
    %650 = tpu.matmul %649, %642, %cst_160 {dimension_numbers = #tpu.dot_dimension_numbers<[1], [0], [0], [1], [0, 0, 1, 1], [], []>} : vector<8x25xf32>, vector<25x64xf32>, vector<8x64xf32> -> vector<8x64xf32>
    %651 = vector.extract_strided_slice %644 {offsets = [2, 0, 0], sizes = [1, 8, 25], strides = [1, 1, 1]} : vector<3x16x49xf32> to vector<1x8x25xf32>
    %652 = vector.shape_cast %651 : vector<1x8x25xf32> to vector<8x25xf32>
    %cst_161 = arith.constant dense<0.000000e+00> : vector<8x64xf32>
    %653 = tpu.matmul %652, %642, %cst_161 {dimension_numbers = #tpu.dot_dimension_numbers<[1], [0], [0], [1], [0, 0, 1, 1], [], []>} : vector<8x25xf32>, vector<25x64xf32>, vector<8x64xf32> -> vector<8x64xf32>
    %654 = vector.extract_strided_slice %647 {offsets = [0, 56], sizes = [8, 8], strides = [1, 1]} : vector<8x64xf32> to vector<8x8xf32>
    %655 = vector.extract_strided_slice %647 {offsets = [0, 0], sizes = [8, 56], strides = [1, 1]} : vector<8x64xf32> to vector<8x56xf32>
    %656 = tpu.concatenate %654, %655 in 1 : vector<8x8xf32>, vector<8x56xf32> -> vector<8x64xf32>
    %657 = arith.addf %650, %656 : vector<8x64xf32>
    %658 = vector.extract_strided_slice %653 {offsets = [0, 8], sizes = [8, 56], strides = [1, 1]} : vector<8x64xf32> to vector<8x56xf32>
    %659 = vector.extract_strided_slice %653 {offsets = [0, 0], sizes = [8, 8], strides = [1, 1]} : vector<8x64xf32> to vector<8x8xf32>
    %660 = tpu.concatenate %658, %659 in 1 : vector<8x56xf32>, vector<8x8xf32> -> vector<8x64xf32>
    %661 = arith.addf %657, %660 : vector<8x64xf32>
    %662 = arith.negf %661 : vector<8x64xf32>
    %663 = math.exp %662 : vector<8x64xf32>
    %cst_162 = arith.constant 1.000000e+00 : f32
    %664 = vector.broadcast %cst_162 : f32 to vector<8x64xf32>
    %665 = arith.addf %664, %663 : vector<8x64xf32>
    %666 = arith.divf %664, %665 : vector<8x64xf32>
    %667 = arith.mulf %661, %666 : vector<8x64xf32>
    %c0_163 = arith.constant 0 : index
    %c0_164 = arith.constant 0 : index
    %668 = vector.load %arg6[%c0_163, %c0_164] : memref<64x256xf32, #tpu.memory_space<vmem>>, vector<64x256xf32>
    %cst_165 = arith.constant dense<0.000000e+00> : vector<8x256xf32>
    %669 = tpu.matmul %667, %668, %cst_165 {dimension_numbers = #tpu.dot_dimension_numbers<[1], [0], [0], [1], [0, 0, 1, 1], [], []>} : vector<8x64xf32>, vector<64x256xf32>, vector<8x256xf32> -> vector<8x256xf32>
    %670 = tpu.iota {dimensions = array<i32: 1>} : vector<1x256xi32>
    %c16_i32_166 = arith.constant 16 : i32
    %c0_i32_167 = arith.constant 0 : i32
    %671 = arith.cmpi eq, %c16_i32_166, %c0_i32_167 : i32
    %c1_i32_168 = arith.constant 1 : i32
    %672 = arith.select %671, %c1_i32_168, %c16_i32_166 : i32
    %673 = vector.broadcast %672 : i32 to vector<1x256xi32>
    %674 = arith.remsi %670, %673 : vector<1x256xi32>
    %c0_i32_169 = arith.constant 0 : i32
    %675 = vector.broadcast %c0_i32_169 : i32 to vector<1x256xi32>
    %676 = arith.cmpi ne, %674, %675 : vector<1x256xi32>
    %c0_i32_170 = arith.constant 0 : i32
    %677 = vector.broadcast %c0_i32_170 : i32 to vector<1x256xi32>
    %678 = arith.cmpi slt, %674, %677 : vector<1x256xi32>
    %c0_i32_171 = arith.constant 0 : i32
    %679 = arith.cmpi slt, %672, %c0_i32_171 : i32
    %680 = vector.broadcast %679 : i1 to vector<1x256xi1>
    %681 = vector.broadcast %680 : vector<1x256xi1> to vector<1x256xi1>
    %682 = arith.xori %678, %681 : vector<1x256xi1>
    %683 = arith.andi %682, %676 : vector<1x256xi1>
    %684 = vector.broadcast %672 : i32 to vector<1x256xi32>
    %685 = arith.addi %674, %684 : vector<1x256xi32>
    %686 = arith.select %683, %685, %674 : vector<1x256xi1>, vector<1x256xi32>
    %c0_i32_172 = arith.constant 0 : i32
    %687 = vector.broadcast %c0_i32_172 : i32 to vector<1x256xi32>
    %688 = arith.cmpi eq, %686, %687 : vector<1x256xi32>
    %689 = vector.extract_strided_slice %669 {offsets = [0, 15], sizes = [8, 241], strides = [1, 1]} : vector<8x256xf32> to vector<8x241xf32>
    %690 = vector.extract_strided_slice %669 {offsets = [0, 0], sizes = [8, 15], strides = [1, 1]} : vector<8x256xf32> to vector<8x15xf32>
    %691 = tpu.concatenate %689, %690 in 1 : vector<8x241xf32>, vector<8x15xf32> -> vector<8x256xf32>
    %692 = vector.extract_strided_slice %669 {offsets = [0, 255], sizes = [8, 1], strides = [1, 1]} : vector<8x256xf32> to vector<8x1xf32>
    %693 = vector.extract_strided_slice %669 {offsets = [0, 0], sizes = [8, 255], strides = [1, 1]} : vector<8x256xf32> to vector<8x255xf32>
    %694 = tpu.concatenate %692, %693 in 1 : vector<8x1xf32>, vector<8x255xf32> -> vector<8x256xf32>
    %695 = vector.shape_cast %688 : vector<1x256xi1> to vector<1x256xi1>
    %696 = vector.broadcast %695 : vector<1x256xi1> to vector<8x256xi1>
    %697 = arith.select %696, %691, %694 : vector<8x256xi1>, vector<8x256xf32>
    %c15_i32_173 = arith.constant 15 : i32
    %698 = vector.broadcast %c15_i32_173 : i32 to vector<1x256xi32>
    %699 = arith.cmpi eq, %686, %698 : vector<1x256xi32>
    %700 = vector.extract_strided_slice %669 {offsets = [0, 241], sizes = [8, 15], strides = [1, 1]} : vector<8x256xf32> to vector<8x15xf32>
    %701 = vector.extract_strided_slice %669 {offsets = [0, 0], sizes = [8, 241], strides = [1, 1]} : vector<8x256xf32> to vector<8x241xf32>
    %702 = tpu.concatenate %700, %701 in 1 : vector<8x15xf32>, vector<8x241xf32> -> vector<8x256xf32>
    %703 = vector.extract_strided_slice %669 {offsets = [0, 1], sizes = [8, 255], strides = [1, 1]} : vector<8x256xf32> to vector<8x255xf32>
    %704 = vector.extract_strided_slice %669 {offsets = [0, 0], sizes = [8, 1], strides = [1, 1]} : vector<8x256xf32> to vector<8x1xf32>
    %705 = tpu.concatenate %703, %704 in 1 : vector<8x255xf32>, vector<8x1xf32> -> vector<8x256xf32>
    %706 = vector.shape_cast %699 : vector<1x256xi1> to vector<1x256xi1>
    %707 = vector.broadcast %706 : vector<1x256xi1> to vector<8x256xi1>
    %708 = arith.select %707, %702, %705 : vector<8x256xi1>, vector<8x256xf32>
    %cst_174 = arith.constant 1.000000e+00 : f32
    %709 = vector.broadcast %cst_174 : f32 to vector<1x256xf32>
    %710 = tpu.concatenate %697, %669, %708, %709 in 0 : vector<8x256xf32>, vector<8x256xf32>, vector<8x256xf32>, vector<1x256xf32> -> vector<25x256xf32>
    %c10 = arith.constant 10 : index
    %c0_175 = arith.constant 0 : index
    %c0_176 = arith.constant 0 : index
    %c0_177 = arith.constant 0 : index
    %711 = vector.load %arg2[%c10, %c0_175, %c0_176, %c0_177] : memref<12x3x16x49xf32, #tpu.memory_space<vmem>>, vector<1x3x16x49xf32>
    %712 = vector.shape_cast %711 : vector<1x3x16x49xf32> to vector<3x16x49xf32>
    %713 = vector.extract_strided_slice %712 {offsets = [0, 0, 0], sizes = [1, 4, 25], strides = [1, 1, 1]} : vector<3x16x49xf32> to vector<1x4x25xf32>
    %714 = vector.shape_cast %713 : vector<1x4x25xf32> to vector<4x25xf32>
    %cst_178 = arith.constant dense<0.000000e+00> : vector<4x256xf32>
    %715 = tpu.matmul %714, %710, %cst_178 {dimension_numbers = #tpu.dot_dimension_numbers<[1], [0], [0], [1], [0, 0, 1, 1], [], []>} : vector<4x25xf32>, vector<25x256xf32>, vector<4x256xf32> -> vector<4x256xf32>
    %716 = vector.extract_strided_slice %712 {offsets = [1, 0, 0], sizes = [1, 4, 25], strides = [1, 1, 1]} : vector<3x16x49xf32> to vector<1x4x25xf32>
    %717 = vector.shape_cast %716 : vector<1x4x25xf32> to vector<4x25xf32>
    %cst_179 = arith.constant dense<0.000000e+00> : vector<4x256xf32>
    %718 = tpu.matmul %717, %710, %cst_179 {dimension_numbers = #tpu.dot_dimension_numbers<[1], [0], [0], [1], [0, 0, 1, 1], [], []>} : vector<4x25xf32>, vector<25x256xf32>, vector<4x256xf32> -> vector<4x256xf32>
    %719 = vector.extract_strided_slice %712 {offsets = [2, 0, 0], sizes = [1, 4, 25], strides = [1, 1, 1]} : vector<3x16x49xf32> to vector<1x4x25xf32>
    %720 = vector.shape_cast %719 : vector<1x4x25xf32> to vector<4x25xf32>
    %cst_180 = arith.constant dense<0.000000e+00> : vector<4x256xf32>
    %721 = tpu.matmul %720, %710, %cst_180 {dimension_numbers = #tpu.dot_dimension_numbers<[1], [0], [0], [1], [0, 0, 1, 1], [], []>} : vector<4x25xf32>, vector<25x256xf32>, vector<4x256xf32> -> vector<4x256xf32>
    %722 = vector.extract_strided_slice %715 {offsets = [0, 240], sizes = [4, 16], strides = [1, 1]} : vector<4x256xf32> to vector<4x16xf32>
    %723 = vector.extract_strided_slice %715 {offsets = [0, 0], sizes = [4, 240], strides = [1, 1]} : vector<4x256xf32> to vector<4x240xf32>
    %724 = tpu.concatenate %722, %723 in 1 : vector<4x16xf32>, vector<4x240xf32> -> vector<4x256xf32>
    %725 = arith.addf %718, %724 : vector<4x256xf32>
    %726 = vector.extract_strided_slice %721 {offsets = [0, 16], sizes = [4, 240], strides = [1, 1]} : vector<4x256xf32> to vector<4x240xf32>
    %727 = vector.extract_strided_slice %721 {offsets = [0, 0], sizes = [4, 16], strides = [1, 1]} : vector<4x256xf32> to vector<4x16xf32>
    %728 = tpu.concatenate %726, %727 in 1 : vector<4x240xf32>, vector<4x16xf32> -> vector<4x256xf32>
    %729 = arith.addf %725, %728 : vector<4x256xf32>
    %730 = arith.negf %729 : vector<4x256xf32>
    %731 = math.exp %730 : vector<4x256xf32>
    %cst_181 = arith.constant 1.000000e+00 : f32
    %732 = vector.broadcast %cst_181 : f32 to vector<4x256xf32>
    %733 = arith.addf %732, %731 : vector<4x256xf32>
    %734 = arith.divf %732, %733 : vector<4x256xf32>
    %735 = arith.mulf %729, %734 : vector<4x256xf32>
    %736 = tpu.iota {dimensions = array<i32: 1>} : vector<1x256xi32>
    %c16_i32_182 = arith.constant 16 : i32
    %c0_i32_183 = arith.constant 0 : i32
    %737 = arith.cmpi eq, %c16_i32_182, %c0_i32_183 : i32
    %c1_i32_184 = arith.constant 1 : i32
    %738 = arith.select %737, %c1_i32_184, %c16_i32_182 : i32
    %739 = vector.broadcast %738 : i32 to vector<1x256xi32>
    %740 = arith.remsi %736, %739 : vector<1x256xi32>
    %c0_i32_185 = arith.constant 0 : i32
    %741 = vector.broadcast %c0_i32_185 : i32 to vector<1x256xi32>
    %742 = arith.cmpi ne, %740, %741 : vector<1x256xi32>
    %c0_i32_186 = arith.constant 0 : i32
    %743 = vector.broadcast %c0_i32_186 : i32 to vector<1x256xi32>
    %744 = arith.cmpi slt, %740, %743 : vector<1x256xi32>
    %c0_i32_187 = arith.constant 0 : i32
    %745 = arith.cmpi slt, %738, %c0_i32_187 : i32
    %746 = vector.broadcast %745 : i1 to vector<1x256xi1>
    %747 = vector.broadcast %746 : vector<1x256xi1> to vector<1x256xi1>
    %748 = arith.xori %744, %747 : vector<1x256xi1>
    %749 = arith.andi %748, %742 : vector<1x256xi1>
    %750 = vector.broadcast %738 : i32 to vector<1x256xi32>
    %751 = arith.addi %740, %750 : vector<1x256xi32>
    %752 = arith.select %749, %751, %740 : vector<1x256xi1>, vector<1x256xi32>
    %c0_i32_188 = arith.constant 0 : i32
    %753 = vector.broadcast %c0_i32_188 : i32 to vector<1x256xi32>
    %754 = arith.cmpi eq, %752, %753 : vector<1x256xi32>
    %755 = vector.extract_strided_slice %735 {offsets = [0, 15], sizes = [4, 241], strides = [1, 1]} : vector<4x256xf32> to vector<4x241xf32>
    %756 = vector.extract_strided_slice %735 {offsets = [0, 0], sizes = [4, 15], strides = [1, 1]} : vector<4x256xf32> to vector<4x15xf32>
    %757 = tpu.concatenate %755, %756 in 1 : vector<4x241xf32>, vector<4x15xf32> -> vector<4x256xf32>
    %758 = vector.extract_strided_slice %735 {offsets = [0, 255], sizes = [4, 1], strides = [1, 1]} : vector<4x256xf32> to vector<4x1xf32>
    %759 = vector.extract_strided_slice %735 {offsets = [0, 0], sizes = [4, 255], strides = [1, 1]} : vector<4x256xf32> to vector<4x255xf32>
    %760 = tpu.concatenate %758, %759 in 1 : vector<4x1xf32>, vector<4x255xf32> -> vector<4x256xf32>
    %761 = vector.shape_cast %754 : vector<1x256xi1> to vector<1x256xi1>
    %762 = vector.broadcast %761 : vector<1x256xi1> to vector<4x256xi1>
    %763 = arith.select %762, %757, %760 : vector<4x256xi1>, vector<4x256xf32>
    %c15_i32_189 = arith.constant 15 : i32
    %764 = vector.broadcast %c15_i32_189 : i32 to vector<1x256xi32>
    %765 = arith.cmpi eq, %752, %764 : vector<1x256xi32>
    %766 = vector.extract_strided_slice %735 {offsets = [0, 241], sizes = [4, 15], strides = [1, 1]} : vector<4x256xf32> to vector<4x15xf32>
    %767 = vector.extract_strided_slice %735 {offsets = [0, 0], sizes = [4, 241], strides = [1, 1]} : vector<4x256xf32> to vector<4x241xf32>
    %768 = tpu.concatenate %766, %767 in 1 : vector<4x15xf32>, vector<4x241xf32> -> vector<4x256xf32>
    %769 = vector.extract_strided_slice %735 {offsets = [0, 1], sizes = [4, 255], strides = [1, 1]} : vector<4x256xf32> to vector<4x255xf32>
    %770 = vector.extract_strided_slice %735 {offsets = [0, 0], sizes = [4, 1], strides = [1, 1]} : vector<4x256xf32> to vector<4x1xf32>
    %771 = tpu.concatenate %769, %770 in 1 : vector<4x255xf32>, vector<4x1xf32> -> vector<4x256xf32>
    %772 = vector.shape_cast %765 : vector<1x256xi1> to vector<1x256xi1>
    %773 = vector.broadcast %772 : vector<1x256xi1> to vector<4x256xi1>
    %774 = arith.select %773, %768, %771 : vector<4x256xi1>, vector<4x256xf32>
    %cst_190 = arith.constant 1.000000e+00 : f32
    %775 = vector.broadcast %cst_190 : f32 to vector<1x256xf32>
    %776 = tpu.concatenate %763, %735, %774, %775 in 0 : vector<4x256xf32>, vector<4x256xf32>, vector<4x256xf32>, vector<1x256xf32> -> vector<13x256xf32>
    %c11 = arith.constant 11 : index
    %c0_191 = arith.constant 0 : index
    %c0_192 = arith.constant 0 : index
    %c0_193 = arith.constant 0 : index
    %777 = vector.load %arg2[%c11, %c0_191, %c0_192, %c0_193] : memref<12x3x16x49xf32, #tpu.memory_space<vmem>>, vector<1x3x16x49xf32>
    %778 = vector.shape_cast %777 : vector<1x3x16x49xf32> to vector<3x16x49xf32>
    %779 = vector.extract_strided_slice %778 {offsets = [0, 0, 0], sizes = [1, 4, 13], strides = [1, 1, 1]} : vector<3x16x49xf32> to vector<1x4x13xf32>
    %780 = vector.shape_cast %779 : vector<1x4x13xf32> to vector<4x13xf32>
    %cst_194 = arith.constant dense<0.000000e+00> : vector<4x256xf32>
    %781 = tpu.matmul %780, %776, %cst_194 {dimension_numbers = #tpu.dot_dimension_numbers<[1], [0], [0], [1], [0, 0, 1, 1], [], []>} : vector<4x13xf32>, vector<13x256xf32>, vector<4x256xf32> -> vector<4x256xf32>
    %782 = vector.extract_strided_slice %778 {offsets = [1, 0, 0], sizes = [1, 4, 13], strides = [1, 1, 1]} : vector<3x16x49xf32> to vector<1x4x13xf32>
    %783 = vector.shape_cast %782 : vector<1x4x13xf32> to vector<4x13xf32>
    %cst_195 = arith.constant dense<0.000000e+00> : vector<4x256xf32>
    %784 = tpu.matmul %783, %776, %cst_195 {dimension_numbers = #tpu.dot_dimension_numbers<[1], [0], [0], [1], [0, 0, 1, 1], [], []>} : vector<4x13xf32>, vector<13x256xf32>, vector<4x256xf32> -> vector<4x256xf32>
    %785 = vector.extract_strided_slice %778 {offsets = [2, 0, 0], sizes = [1, 4, 13], strides = [1, 1, 1]} : vector<3x16x49xf32> to vector<1x4x13xf32>
    %786 = vector.shape_cast %785 : vector<1x4x13xf32> to vector<4x13xf32>
    %cst_196 = arith.constant dense<0.000000e+00> : vector<4x256xf32>
    %787 = tpu.matmul %786, %776, %cst_196 {dimension_numbers = #tpu.dot_dimension_numbers<[1], [0], [0], [1], [0, 0, 1, 1], [], []>} : vector<4x13xf32>, vector<13x256xf32>, vector<4x256xf32> -> vector<4x256xf32>
    %788 = vector.extract_strided_slice %781 {offsets = [0, 240], sizes = [4, 16], strides = [1, 1]} : vector<4x256xf32> to vector<4x16xf32>
    %789 = vector.extract_strided_slice %781 {offsets = [0, 0], sizes = [4, 240], strides = [1, 1]} : vector<4x256xf32> to vector<4x240xf32>
    %790 = tpu.concatenate %788, %789 in 1 : vector<4x16xf32>, vector<4x240xf32> -> vector<4x256xf32>
    %791 = arith.addf %784, %790 : vector<4x256xf32>
    %792 = vector.extract_strided_slice %787 {offsets = [0, 16], sizes = [4, 240], strides = [1, 1]} : vector<4x256xf32> to vector<4x240xf32>
    %793 = vector.extract_strided_slice %787 {offsets = [0, 0], sizes = [4, 16], strides = [1, 1]} : vector<4x256xf32> to vector<4x16xf32>
    %794 = tpu.concatenate %792, %793 in 1 : vector<4x240xf32>, vector<4x16xf32> -> vector<4x256xf32>
    %795 = arith.addf %791, %794 : vector<4x256xf32>
    %796 = arith.negf %795 : vector<4x256xf32>
    %797 = math.exp %796 : vector<4x256xf32>
    %cst_197 = arith.constant 1.000000e+00 : f32
    %798 = vector.broadcast %cst_197 : f32 to vector<4x256xf32>
    %799 = arith.addf %798, %797 : vector<4x256xf32>
    %800 = arith.divf %798, %799 : vector<4x256xf32>
    %801 = arith.mulf %795, %800 : vector<4x256xf32>
    %c0_198 = arith.constant 0 : index
    %c0_199 = arith.constant 0 : index
    %c0_200 = arith.constant 0 : index
    %802 = vector.load %arg7[%c0_198, %c0_199, %c0_200] : memref<1x4x256xf32, #tpu.memory_space<vmem>>, vector<1x4x256xf32>
    %803 = vector.shape_cast %802 : vector<1x4x256xf32> to vector<4x256xf32>
    %804 = vector.shape_cast %801 : vector<4x256xf32> to vector<1x4x256xf32>
    tpu.vector_store %arg7[%c0_198, %c0_199, %c0_200], %804 {strides = array<i32>} : memref<1x4x256xf32, #tpu.memory_space<vmem>>, vector<1x4x256xf32>,
    return
  }
  func.func @transform_0(%arg0: i32) -> (i32, i32, i32) {
    %c0_i32 = arith.constant 0 : i32
    %c0_i32_0 = arith.constant 0 : i32
    %c0_i32_1 = arith.constant 0 : i32
    return %arg0, %c0_i32, %c0_i32_0 : i32, i32, i32
  }
  func.func @transform_1(%arg0: i32) -> (i32, i32, i32, i32) {
    %c0_i32 = arith.constant 0 : i32
    %c0_i32_0 = arith.constant 0 : i32
    %c0_i32_1 = arith.constant 0 : i32
    %c0_i32_2 = arith.constant 0 : i32
    %c0_i32_3 = arith.constant 0 : i32
    return %c0_i32, %c0_i32_0, %c0_i32_1, %c0_i32_2 : i32, i32, i32, i32
  }
  func.func @transform_2(%arg0: i32) -> (i32, i32) {
    %c0_i32 = arith.constant 0 : i32
    %c0_i32_0 = arith.constant 0 : i32
    %c0_i32_1 = arith.constant 0 : i32
    return %c0_i32, %c0_i32_0 : i32, i32
  }
  func.func @transform_3(%arg0: i32) -> (i32, i32) {
    %c0_i32 = arith.constant 0 : i32
    %c0_i32_0 = arith.constant 0 : i32
    %c0_i32_1 = arith.constant 0 : i32
    return %c0_i32, %c0_i32_0 : i32, i32
  }
  func.func @transform_4(%arg0: i32) -> (i32, i32) {
    %c0_i32 = arith.constant 0 : i32
    %c0_i32_0 = arith.constant 0 : i32
    %c0_i32_1 = arith.constant 0 : i32
    return %c0_i32, %c0_i32_0 : i32, i32
  }
  func.func @transform_5(%arg0: i32) -> (i32, i32) {
    %c0_i32 = arith.constant 0 : i32
    %c0_i32_0 = arith.constant 0 : i32
    %c0_i32_1 = arith.constant 0 : i32
    return %c0_i32, %c0_i32_0 : i32, i32
  }
  func.func @transform_6(%arg0: i32) -> (i32, i32, i32) {
    %c0_i32 = arith.constant 0 : i32
    %c0_i32_0 = arith.constant 0 : i32
    %c0_i32_1 = arith.constant 0 : i32
    return %arg0, %c0_i32, %c0_i32_0 : i32, i32, i32
  }
}

</mosaic_0001>

<bundles_post_ra>
// kernel: autoencoder2d_forward.1
= control target key start
LH: loop header
LB: loop body
LE: loop exit
PB: predicated region body
PF: predicated region fallthrough
CT: control target
= control target key end

     0   :  { %11 = vsyncpa [#allocation3], 0  ;;  %s6192_s21 = smov 0   ;;  %s7206_s0 = inlined_call_operand.vmem [shape: f32[2,4,256], index: 0, kind: input, shape index: {}]   ;;  %s7207_s1 = inlined_call_operand.vmem [shape: f32[12,3,16,49], index: 1, kind: input, shape index: {}]   ;;  %s7208_s2 = inlined_call_operand.vmem [shape: f32[256,64], index: 2, kind: input, shape index: {}]   ;;  %s7209_s3 = inlined_call_operand.vmem [shape: f32[64,16], index: 3, kind: input, shape index: {}]   ;;  %s7210_s4 = inlined_call_operand.vmem [shape: f32[16,64], index: 4, kind: input, shape index: {}]   ;;  %s7211_s5 = inlined_call_operand.hbm [shape: f32[64,256], index: 5, kind: input, shape index: {}]   ;;  %s7212_s6 = inlined_call_operand.vmem [shape: f32[2,4,256], index: 6, kind: output, shape index: {}]  }
   0x1 LB: > { %s6198_s22 = sadd.s32 4294967295, %s6123_s21   ;;  %p4620_p0 = scmp.ge.s32.totalorder %s6123_s21, 1  ;;  %s6123_s21 = sphi %s6192_s21, %s17_s21  }
   0x2   : > { %p179_p1 = scmp.lt.s32.totalorder %s6123_s21, 3  ;;  %s6125_s23 = smov [#allocation2]  }
   0x3   : > { %s203_s24 = sshll.u32 %s6125_s23, 4  ;;  %p7213_p3 = scmp.eq.s32.totalorder %s6198_s22, 0  ;;  %s204_s24 = int_to_ptr.vmem [resolvable:$true] %s203_s24 }
   0x4   : > { %p6202_p2 = pnand %p4620_p0, %p179_p1  ;;  %s6085_s29 = scalar_lea.hbm %s7211_s5, 2048 }
   0x5   : > { %p6086_p6 = scmp.ne.s32.totalorder %s7211_s5, %s6085_s29  ;;  %p6092_p10 = scmp.lt.u32.totalorder %s6085_s29, %s7211_s5 }
   0x6   : > { %s7255_s25 = scalar_select %p6202_p2, 1, 0 }
   0x7   : > { %p5717_p4 = pneg %p6202_p2 }
   0x9   : > { %p6211_p5 = pnand %p7213_p3, %p5717_p4 }
   0xb   : > { %p6087_p7 = pneg %p6211_p5 }
   0xd   : > { %p6088_p8 = pnand %p6087_p7, %p6086_p6 }
   0xf   : > { %p6089_p9 = pneg %p6088_p8 }
  0x11   : > { %p6094_p11 = pnand %p6092_p10, %p6089_p9 }
  0x13   : > { %6097 = shalt.err (!%p6094_p11)
}
  0x14   : > { %s6098_s10 = scalar_lea.vmem %s204_s24, 2048  ;;  %p6106_p1 = scmp.lt.s32.totalorder %s204_s24, %s204_s24 }
  0x15   : > { %p6099_p12 = scmp.ne.s32.totalorder %s204_s24, %s6098_s10  ;;  %p6107_p4 = scmp.lt.s32.totalorder %s6098_s10, %s6098_s10 }
  0x17   : > { %p6101_p13 = pnand %p6099_p12, %p6087_p7  ;;  %p6108_p3 = por %p6107_p4, %p6106_p1 }
  0x19   : > { %p6102_p0 = pneg %p6101_p13 }
  0x1b   : > { %p6109_p2 = pnand %p6108_p3, %p6102_p0 }
  0x1d   : > { %6112 = shalt.err (!%p6109_p2)
}
  0x1e   : > { %s6126_s11 = smov 256   ;;  %s6127_s12 = smov 16  }
  0x1f   : > { %5720 = dma.hbm_to_vmem [thread:$0]  (!%p6211_p5), %s7211_s5, 2048, %s204_s24, [#allocation3], %s6126_s11, %s6126_s11, %s6127_s12  }
  0x20   : > { %p7257_p6 = scmp.ne.s32.totalorder %s7255_s25, 0 }
  0x21   : > { %p7258_p8 = scmp.eq.s32.totalorder (!%p7257_p6), %s6198_s22, 0 }
  0x22   : > { %227 = sbr.rel (%p7257_p6) target bundleno = 6928 (0x1b10), region = 44 }
  0x29   : > { %6118 = dma.done.wait (%p7258_p8), [#allocation3], 2048   ;;  %p7259_p7 = pmov %p7258_p8 }
  0x2a   : > { %p257_p2 = scmp.lt.s32.totalorder %s6198_s22, 1  ;;  %s6128_s19 = smov 15   ;;  %v6130_v4 = vmov 0.0   ;;  %v268_v5 = vlaneseq  ;;  %vm7221_vm0 = vcmask 121856   ;;  %vm7217_vm1 = vcmask 924672   ;;  %v360_v46 = vld [vmem:[%s7207_s1] sm:$0xff] }
  0x2b   : > { %6120 = vsyncadd (%p7259_p7), [#allocation3], 4294965248  ;;  %s6129_s20 = smov 113   ;;  %438 = vmatprep.mubr.f32.mxu0 %v6130_v4  ;;  %512 = vmatprep.mubr.f32.mxu1 %v6130_v4  ;;  %s6131_s23 = smov 127   ;;  %vm7216_vm2 = vcmask 1039360   ;;  %vm7234_vm3 = vcmask 7168  }
  0x2c   : > { %s7403_s22 = smov (!%p257_p2, %s6198_s22), 1  ;;  %s6132_s24 = smov 1   ;;  %v6253_v6 = vand.u32 127, %v268_v5  ;;  %vm7219_vm4 = vcmask 1043456   ;;  %vm367_vm5 = vcmask 1044480   ;;  %v7266_v21 = vmov 0 }
  0x2d   : > { %s7223_s15 = sshll.u32 %s7403_s22, 3  ;;  %vm6133_vm10 = vmmov 1   ;;  %vm7222_vm12 = vcmask 105472   ;;  %v362_v47 = vld [vmem:[%s7207_s1 + $0x20] sm:$0xff]  ;;  %v361_v48 = vld [vmem:[%s7207_s1 + $0x10] sm:$0xff]  ;;  %s7226_s7 = smov 16  }
  0x2e   : > { %s261_s18 = scalar_lea.vmem %s7206_s0, %s7223_s15  ;;  %v270_v7 = vadd.s32 128, %v6253_v6  ;;  %v275_v8 = vand.u32 15, %v6253_v6  ;;  %vm6293_vm11 = vmpackc.low %vm367_vm5, %vm6133_vm10  ;;  %s7224_s8 = smov 112   ;;  %vm7218_vm13 = vcmask 130048   ;;  %vm7215_vm14 = vcmask 916480   ;;  %v4781_v17 = vld [vmem:[%s7207_s1 + $0x210] sm:$0xff] }
  0x2f   : > { %v267_v0 = vld [vmem:[%s261_s18] sm:$0xff]  ;;  %vm7237_vm15 = vcmask 1040384   ;;  %s6137_s26 = smov 57   ;;  %s6138_s27 = smov 121  }
  0x30   : > { %v298_v1 = vcombine.high %v267_v0, %v267_v0  ;;  %v282_v11 = vand.u32 15, %v270_v7  ;;  %vm6257_vm6 = vcmp.eq.s32.totalorder %v275_v8, 0  ;;  %vm6261_vm7 = vcmp.eq.s32.totalorder %v275_v8, 15  ;;  %vm6356_vm5 = vmpackc.low %vm7237_vm15, %vm6133_vm10  ;;  %s6139_s28 = smov 65   ;;  %s6140_s9 = smov 7  }
  0x31   : > { %v353_v22 = vcombine.low %v267_v0, %v267_v0  ;;  %vm7220_vm10 = vcmask 203776   ;;  %s7253_s10 = smov 71   ;;  %s7251_s11 = smov 63  }
  0x32   : > { %v5773_v2 = vpack.i.bf16 %v267_v0, %v298_v1  ;;  %v5763_v3 = vpack.i.bf16 %v298_v1, %v267_v0  ;;  %vm6265_vm8 = vcmp.eq.s32.totalorder %v282_v11, 0  ;;  %vm6269_vm9 = vcmp.eq.s32.totalorder %v282_v11, 15  ;;  %s7245_s13 = smov 72   ;;  %s7247_s14 = smov 8  }
  0x33   : > { %v7267_v21 = vsel %vm6269_vm9, 4294967295, %v7266_v21  ;;  %s7235_s16 = smov 120   ;;  %s7243_s17 = smov 56  }
  0x34   : > { %5774 = vrot.lane.b32.xlu1 %v5773_v2, %s6128_s19  ;;  %5764 = vrot.lane.b32.xlu0 %v5763_v3, %s6129_s20  ;;  %s6148_s18 = smov 13   ;;  %s6149_s25 = smov 125  }
  0x35   : > { %s6150_s29 = smov 3   ;;  %s6151_s30 = smov 115  }
  0x36   : > { %s6156_s12 = smov 124  }
  0x38   : > { %5779 = vrot.lane.b32.xlu1 %v5763_v3, %s6131_s23  ;;  %5769 = vrot.lane.b32.xlu0 %v5773_v2, %s6132_s24 }
  0xa6   : > { %v5775_v9 = vpop.permute.xlu1 %5774  ;;  %v5765_v10 = vpop.permute.xlu0 %5764 }
  0xa7   : > { %v5777_v12 = vunpack.i.h.bf16 %v5775_v9  ;;  %v5776_v13 = vunpack.i.l.bf16 %v5775_v9  ;;  %v5767_v14 = vunpack.i.h.bf16 %v5765_v10  ;;  %v5766_v15 = vunpack.i.l.bf16 %v5765_v10 }
  0xa9   : > { %v333_v27 = vsel %vm7221_vm0, %v5777_v12, %v5776_v13  ;;  %v336_v28 = vsel %vm7221_vm0, %v5776_v13, %v5777_v12  ;;  %v304_v29 = vsel %vm7217_vm1, %v5766_v15, %v5767_v14  ;;  %v308_v30 = vsel %vm7217_vm1, %v5767_v14, %v5766_v15 }
  0xaa   : > { %v5780_v18 = vpop.permute.xlu1 %5779  ;;  %v5770_v19 = vpop.permute.xlu0 %5769 }
  0xab   : > { %v5782_v23 = vunpack.i.h.bf16 %v5780_v18  ;;  %v5781_v24 = vunpack.i.l.bf16 %v5780_v18  ;;  %v5772_v25 = vunpack.i.h.bf16 %v5770_v19  ;;  %v5771_v26 = vunpack.i.l.bf16 %v5770_v19 }
  0xad   : > { %v342_v31 = vsel %vm7216_vm2, %v5781_v24, %v5782_v23  ;;  %v346_v32 = vsel %vm7216_vm2, %v5782_v23, %v5781_v24  ;;  %v315_v33 = vsel %vm7234_vm3, %v5772_v25, %v5771_v26  ;;  %v318_v34 = vsel %vm7234_vm3, %v5771_v26, %v5772_v25 }
  0xae   : > { %v324_v35 = vsel %vm6265_vm8, %v308_v30, %v315_v33  ;;  %v352_v36 = vsel %vm6269_vm9, %v333_v27, %v346_v32  ;;  %v323_v37 = vsel %vm6257_vm6, %v304_v29, %v318_v34  ;;  %v351_v38 = vsel %vm6261_vm7, %v336_v28, %v342_v31 }
  0xaf   : > { %v357_v39 = vsel %vm7219_vm4, %v324_v35, %v267_v0  ;;  %v359_v40 = vsel %vm7219_vm4, %v352_v36, 1.0  ;;  %v356_v42 = vsel %vm7219_vm4, %v323_v37, %v353_v22  ;;  %v358_v43 = vsel %vm7219_vm4, %v351_v38, 1.0 }
  0xb0   : > { %v5342_v44 = vpack.c.bf16 %v359_v40, %v357_v39  ;;  %v5345_v45 = vpack.c.bf16 %v358_v43, %v356_v42 }
  0xb2   : > { %5344 = vmatprep.subr.msk.bf16.mxu0 %vm6293_vm11, %v5342_v44  ;;  %5350 = vmatprep.subr.msk.bf16.mxu1 %vm6293_vm11, %v5342_v44 }
  0xb3   : > { %5347 = vmatpush1.bf16.msk.msra.mxu0 %vm6293_vm11, %v5345_v45  ;;  %5353 = vmatpush1.bf16.msk.msra.mxu1 %vm6293_vm11, %v5345_v45 }
  0xb4   : > { %5356 = vmatprep.subr.msk.bf16.mxu0 %vm6293_vm11, %v5342_v44 }
  0xb6   : > { %4631 = vmatmul.mubr.msk.f32.vlgmr.msra.gmra.mrb[0].mxu0 %vm7222_vm12, %v360_v46  ;;  %4634 = vmatmul.mubr.msk.f32.vlgmr.msra.gmra.mrb[0].mxu1 %vm7222_vm12, %v362_v47 }
  0xb7   : > { %5359 = vmatpush1.bf16.msk.msra.mxu0 %vm6293_vm11, %v5345_v45  ;;  %598 = vmatprep.mubr.f32.mxu0 %v6130_v4 }
  0xb8   : > { %751 = vmatprep.mubr.f32.mxu1 %v6130_v4 }
  0xba   : > { %4637 = vmatmul.mubr.msk.f32.vlgmr.msra.gmra.mrb[2].mxu0 %vm7222_vm12, %v361_v48  ;;  %vm7238_vm12 = vcmask 400384  }
  0xbb   : > { %825 = vmatprep.mubr.f32.mxu0 %v6130_v4 }
 0x189   : > { %v440_v49 = vpop.f32.mrb[0].mxu0  ;;  %v514_v50 = vpop.f32.mrb[0].mxu1 }
 0x18a   : > { %524 = vrot.lane.b32.xlu1 %v440_v49, %s7226_s7  ;;  %v442_v51 = vpop.f32.mrb[1].mxu0  ;;  %v516_v52 = vpop.f32.mrb[1].mxu1  ;;  %v6136_v49 = vmov 1.0  }
 0x18b   : > { %520 = vrot.lane.b32.xlu0 %v442_v51, %s7226_s7 }
 0x18d   : > { %v600_v53 = vpop.f32.mrb[2].mxu0 }
 0x18e   : > { %609 = vrot.lane.b32.xlu1 %v516_v52, %s7224_s8  ;;  %v602_v54 = vpop.f32.mrb[3].mxu0  ;;  %v4640_v52 = vld [vmem:[%s7207_s1 + $0x30] sm:$0xff] }
 0x18f   : > { %607 = vrot.lane.b32.xlu0 %v514_v50, %s7224_s8 }
 0x1fc   : > { %v525_v55 = vpop.permute.xlu1 %524 }
 0x1fd   : > { %v521_v56 = vpop.permute.xlu0 %520 }
 0x1fe   : > { %v530_v57 = vsel %vm7218_vm13, %v521_v56, %v525_v55  ;;  %v527_v58 = vsel %vm7218_vm13, %v525_v55, %v521_v56  ;;  %v960_v55 = vld [vmem:[%s7208_s2 + $0x80] sm:$0xff]  ;;  %v961_v56 = vld [vmem:[%s7208_s2 + $0x88] sm:$0xff] }
 0x1ff   : > { %v601_v60 = vadd.f32 %v600_v53, %v530_v57  ;;  %v603_v61 = vadd.f32 %v602_v54, %v527_v58  ;;  %v4642_v53 = vld [vmem:[%s7207_s1 + $0x50] sm:$0xff]  ;;  %v4641_v54 = vld [vmem:[%s7207_s1 + $0x40] sm:$0xff]  ;;  %v5390_v57 = vpack.c.bf16 %v961_v56, %v960_v55 }
 0x200   : > { %v610_v59 = vpop.permute.xlu1 %609  ;;  %v944_v58 = vld [vmem:[%s7208_s2] sm:$0xff] }
 0x201   : > { %v608_v62 = vpop.permute.xlu0 %607 }
 0x202   : > { %v612_v63 = vsel %vm7215_vm14, %v608_v62, %v610_v59  ;;  %v616_v0 = vsel %vm7215_vm14, %v610_v59, %v608_v62  ;;  %v945_v59 = vld [vmem:[%s7208_s2 + $0x8] sm:$0xff]  ;;  %v963_v62 = vld [vmem:[%s7208_s2 + $0x98] sm:$0xff] }
 0x203   : > { %v617_v1 = vadd.f32 %v612_v63, %v601_v60  ;;  %v618_v2 = vadd.f32 %v616_v0, %v603_v61  ;;  %v5392_v60 = vpack.c.bf16 %v945_v59, %v944_v58  ;;  %v962_v61 = vld [vmem:[%s7208_s2 + $0x90] sm:$0xff] }
 0x204   : > { %v5394_v63 = vpack.c.bf16 %v963_v62, %v962_v61  ;;  %v946_v0 = vld [vmem:[%s7208_s2 + $0x10] sm:$0xff] }
 0x205   : > { %v4638_v3 = vmul.f32 -1.442695, %v617_v1  ;;  %v4639_v5 = vmul.f32 -1.442695, %v618_v2 }
 0x207   : > { %6005 = vpow2.f32 %v4638_v3  ;;  %v964_v3 = vld [vmem:[%s7208_s2 + $0xa0] sm:$0xff] }
 0x208   : > { %6007 = vpow2.f32 %v4639_v5  ;;  %v965_v5 = vld [vmem:[%s7208_s2 + $0xa8] sm:$0xff] }
 0x211   : > { %v6006_v7 = vpop.eup %6005 }
 0x212   : > { %v6008_v8 = vpop.eup %6007  ;;  %v625_v9 = vadd.f32 1.0, %v6006_v7 }
 0x213   : > { %v626_v10 = vadd.f32 1.0, %v6008_v8 }
 0x214   : > { %6009 = vrcp.f32 %v625_v9  ;;  %v5398_v9 = vpack.c.bf16 %v965_v5, %v964_v3 }
 0x215   : > { %6011 = vrcp.f32 %v626_v10  ;;  %v948_v10 = vld [vmem:[%s7208_s2 + $0x20] sm:$0xff] }
 0x21e   : > { %v6010_v11 = vpop.eup %6009 }
 0x21f   : > { %v6012_v12 = vpop.eup %6011  ;;  %v631_v13 = vmul.f32 %v6010_v11, %v617_v1  ;;  %v947_v1 = vld [vmem:[%s7208_s2 + $0x18] sm:$0xff]  ;;  %v949_v11 = vld [vmem:[%s7208_s2 + $0x28] sm:$0xff] }
 0x220   : > { %v632_v14 = vmul.f32 %v6012_v12, %v618_v2  ;;  %v5396_v2 = vpack.c.bf16 %v947_v1, %v946_v0 }
 0x222   : > { %v5788_v15 = vpack.i.bf16 %v631_v13, %v632_v14  ;;  %v5783_v18 = vpack.i.bf16 %v632_v14, %v631_v13 }
 0x224   : > { %5789 = vrot.lane.b32.xlu1 %v5788_v15, %s6132_s24  ;;  %5784 = vrot.lane.b32.xlu0 %v5783_v18, %s6129_s20 }
 0x228   : > { %5799 = vrot.lane.b32.xlu1 %v5783_v18, %s6131_s23  ;;  %5794 = vrot.lane.b32.xlu0 %v5788_v15, %s6128_s19  ;;  %v966_v15 = vld [vmem:[%s7208_s2 + $0xb0] sm:$0xff]  ;;  %v967_v18 = vld [vmem:[%s7208_s2 + $0xb8] sm:$0xff] }
 0x296   : > { %v5790_v19 = vpop.permute.xlu1 %5789  ;;  %v5785_v22 = vpop.permute.xlu0 %5784 }
 0x297   : > { %v5792_v23 = vunpack.i.h.bf16 %v5790_v19  ;;  %v5791_v24 = vunpack.i.l.bf16 %v5790_v19  ;;  %v5787_v25 = vunpack.i.h.bf16 %v5785_v22  ;;  %v5786_v26 = vunpack.i.l.bf16 %v5785_v22  ;;  %v950_v22 = vld [vmem:[%s7208_s2 + $0x30] sm:$0xff] }
 0x298   : > { %v5402_v19 = vpack.c.bf16 %v967_v18, %v966_v15 }
 0x299   : > { %v652_v27 = vsel %vm7234_vm3, %v5791_v24, %v5792_v23  ;;  %v639_v28 = vsel %vm7217_vm1, %v5786_v26, %v5787_v25  ;;  %v643_v29 = vsel %vm7217_vm1, %v5787_v25, %v5786_v26  ;;  %v649_v30 = vsel %vm7234_vm3, %v5792_v23, %v5791_v24  ;;  %v951_v23 = vld [vmem:[%s7208_s2 + $0x38] sm:$0xff]  ;;  %v968_v25 = vld [vmem:[%s7208_s2 + $0xc0] sm:$0xff]  ;;  %v969_v26 = vld [vmem:[%s7208_s2 + $0xc8] sm:$0xff] }
 0x29a   : > { %v5800_v31 = vpop.permute.xlu1 %5799  ;;  %v5795_v32 = vpop.permute.xlu0 %5794  ;;  %v654_v33 = vsel %vm6265_vm8, %v643_v29, %v649_v30  ;;  %v653_v34 = vsel %vm6257_vm6, %v639_v28, %v652_v27  ;;  %v5404_v24 = vpack.c.bf16 %v951_v23, %v950_v22  ;;  %v5406_v28 = vpack.c.bf16 %v969_v26, %v968_v25  ;;  %v952_v29 = vld [vmem:[%s7208_s2 + $0x40] sm:$0xff]  ;;  %v953_v30 = vld [vmem:[%s7208_s2 + $0x48] sm:$0xff] }
 0x29b   : > { %v5802_v35 = vunpack.i.h.bf16 %v5800_v31  ;;  %v5801_v36 = vunpack.i.l.bf16 %v5800_v31  ;;  %v5797_v37 = vunpack.i.h.bf16 %v5795_v32  ;;  %v5796_v38 = vunpack.i.l.bf16 %v5795_v32 }
 0x29c   : > { %v5360_v39 = vpack.c.bf16 %v632_v14, %v654_v33  ;;  %v5362_v40 = vpack.c.bf16 %v631_v13, %v653_v34  ;;  %v5400_v14 = vpack.c.bf16 %v949_v11, %v948_v10  ;;  %v5408_v32 = vpack.c.bf16 %v953_v30, %v952_v29  ;;  %v970_v33 = vld [vmem:[%s7208_s2 + $0xd0] sm:$0xff]  ;;  %v971_v34 = vld [vmem:[%s7208_s2 + $0xd8] sm:$0xff] }
 0x29d   : > { %v668_v42 = vsel %vm7216_vm2, %v5801_v36, %v5802_v35  ;;  %v672_v43 = vsel %vm7216_vm2, %v5802_v35, %v5801_v36  ;;  %v660_v44 = vsel %vm7221_vm0, %v5797_v37, %v5796_v38  ;;  %v663_v45 = vsel %vm7221_vm0, %v5796_v38, %v5797_v37  ;;  %v954_v36 = vld [vmem:[%s7208_s2 + $0x50] sm:$0xff]  ;;  %v955_v37 = vld [vmem:[%s7208_s2 + $0x58] sm:$0xff] }
 0x29e   : > { %v673_v46 = vsel %vm6261_vm7, %v663_v45, %v668_v42  ;;  %5361 = vmatprep.subr.bf16.mxu1 %v5360_v39  ;;  %5371 = vmatprep.subr.bf16.mxu0 %v5360_v39  ;;  %v674_v47 = vsel %vm6269_vm9, %v660_v44, %v672_v43  ;;  %v5410_v35 = vpack.c.bf16 %v971_v34, %v970_v33  ;;  %v956_v43 = vld [vmem:[%s7208_s2 + $0x60] sm:$0xff]  ;;  %v957_v44 = vld [vmem:[%s7208_s2 + $0x68] sm:$0xff]  ;;  %v1050_v22 = vand.u32 7, %v6253_v6 }
 0x29f   : > { %v5367_v50 = vpack.c.bf16 %v6136_v49, %v673_v46  ;;  %5363 = vmatpush1.bf16.msra.mxu1 %v5362_v40  ;;  %5373 = vmatpush1.bf16.msra.mxu0 %v5362_v40  ;;  %v5364_v51 = vpack.c.bf16 %v6136_v49, %v674_v47  ;;  %v5412_v38 = vpack.c.bf16 %v955_v37, %v954_v36  ;;  %v974_v46 = vld [vmem:[%s7208_s2 + $0xf0] sm:$0xff]  ;;  %v975_v47 = vld [vmem:[%s7208_s2 + $0xf8] sm:$0xff]  ;;  %vm7232_vm1 = vcmask 56320   ;;  %v4757_v34 = vld [vmem:[%s7207_s1 + $0x1c0] sm:$0xff] }
 0x2a0   : > { %v5416_v45 = vpack.c.bf16 %v957_v44, %v956_v43  ;;  %vm6504_vm2 = vcmp.eq.s32.totalorder %v1050_v22, 0  ;;  %vm6512_vm4 = vcmp.eq.s32.totalorder %v1050_v22, 7  ;;  %v4658_v43 = vld [vmem:[%s7207_s1 + $0x80] sm:$0xff]  ;;  %v4659_v44 = vld [vmem:[%s7207_s1 + $0x88] sm:$0xff]  ;;  %vm7230_vm0 = vcmask 457728  }
 0x2a1   : > { %5366 = vmatprep.subr.msk.bf16.mxu1 %vm6356_vm5, %v5364_v51  ;;  %5376 = vmatprep.subr.msk.bf16.mxu0 %vm6356_vm5, %v5364_v51 }
 0x2a3   : > { %5369 = vmatpush1.bf16.msk.msra.mxu1 %vm6356_vm5, %v5367_v50  ;;  %5379 = vmatpush1.bf16.msk.msra.mxu0 %vm6356_vm5, %v5367_v50 }
 0x2a4   : > { %5381 = vmatprep.subr.bf16.mxu1 %v5360_v39  ;;  %5391 = vmatprep.subr.bf16.mxu0 %v5390_v57  ;;  %v972_v39 = vld [vmem:[%s7208_s2 + $0xe0] sm:$0xff] }
 0x2a6   : > { %4645 = vmatmul.mubr.msk.f32.vlgmr.msra.gmra.mrb[2].mxu1 %vm7220_vm10, %v4640_v52  ;;  %4648 = vmatmul.mubr.msk.f32.vlgmr.msra.gmra.mrb[4].mxu0 %vm7220_vm10, %v4642_v53  ;;  %v959_v52 = vld [vmem:[%s7208_s2 + $0x78] sm:$0xff] }
 0x2a7   : > { %5383 = vmatpush1.bf16.msra.mxu1 %v5362_v40  ;;  %910 = vmatprep.mubr.f32.mxu1 %v6130_v4  ;;  %v973_v40 = vld [vmem:[%s7208_s2 + $0xe8] sm:$0xff] }
 0x2a8   : > { %5386 = vmatprep.subr.msk.bf16.mxu1 %vm6356_vm5, %v5364_v51  ;;  %5393 = vmatpush3.bf16.msra.mxu0 %v5392_v60  ;;  %v5414_v42 = vpack.c.bf16 %v973_v40, %v972_v39  ;;  %v958_v51 = vld [vmem:[%s7208_s2 + $0x70] sm:$0xff] }
 0x2a9   : > { %5395 = vmatprep.subr.bf16.mxu0 %v5394_v63  ;;  %v5420_v53 = vpack.c.bf16 %v959_v52, %v958_v51 }
 0x2ab   : > { %5389 = vmatpush1.bf16.msk.msra.mxu1 %vm6356_vm5, %v5367_v50  ;;  %v5418_v50 = vpack.c.bf16 %v975_v47, %v974_v46  ;;  %v4657_v46 = vld [vmem:[%s7207_s1 + $0x78] sm:$0xff] }
 0x2ac   : > { %5397 = vmatpush3.bf16.msra.mxu0 %v5396_v2 }
 0x2ad   : > { %5399 = vmatprep.subr.bf16.mxu0 %v5398_v9 }
 0x2ae   : > { %4651 = vmatmul.mubr.msk.f32.vlgmr.msra.gmra.mrb[4].mxu1 %vm7220_vm10, %v4641_v54 }
 0x2b0   : > { %5401 = vmatpush3.bf16.msra.mxu0 %v5400_v14 }
 0x2b1   : > { %5403 = vmatprep.subr.bf16.mxu0 %v5402_v19  ;;  %v4654_v19 = vld [vmem:[%s7207_s1 + $0x60] sm:$0xff] }
 0x2b2   : > { %5012 = vmatprep.mubr.msk.f32.mxu1 %vm7220_vm10, %v4654_v19 }
 0x2b4   : > { %5405 = vmatpush3.bf16.msra.mxu0 %v5404_v24 }
 0x2b5   : > { %5407 = vmatprep.subr.bf16.mxu0 %v5406_v28 }
 0x2b8   : > { %5409 = vmatpush3.bf16.msra.mxu0 %v5408_v32 }
 0x2b9   : > { %5411 = vmatprep.subr.bf16.mxu0 %v5410_v35 }
 0x2bc   : > { %5413 = vmatpush3.bf16.msra.mxu0 %v5412_v38 }
 0x2bd   : > { %5415 = vmatprep.subr.bf16.mxu0 %v5414_v42  ;;  %v4655_v42 = vld [vmem:[%s7207_s1 + $0x68] sm:$0xff] }
 0x2c0   : > { %5417 = vmatpush3.bf16.msra.mxu0 %v5416_v45  ;;  %v4656_v45 = vld [vmem:[%s7207_s1 + $0x70] sm:$0xff] }
 0x2c1   : > { %5419 = vmatprep.subr.bf16.mxu0 %v5418_v50 }
 0x2c4   : > { %5421 = vmatpush3.bf16.msra.mxu0 %v5420_v53 }
 0x379   : > { %v753_v7 = vpop.f32.mrb[2].mxu1  ;;  %v827_v8 = vpop.f32.mrb[4].mxu0 }
 0x37a   : > { %837 = vrot.lane.b32.xlu1 %v753_v7, %s7226_s7  ;;  %v755_v12 = vpop.f32.mrb[3].mxu1  ;;  %v829_v13 = vpop.f32.mrb[5].mxu0 }
 0x37b   : > { %833 = vrot.lane.b32.xlu0 %v755_v12, %s7226_s7  ;;  %s6153_s7 = smov 4  }
 0x37e   : > { %921 = vrot.lane.b32.xlu1 %v829_v13, %s7224_s8 }
 0x37f   : > { %919 = vrot.lane.b32.xlu0 %v827_v8, %s7224_s8  ;;  %s6154_s8 = smov 116  }
 0x381   : > { %v912_v27 = vpop.f32.mrb[4].mxu1 }
 0x382   : > { %v914_v31 = vpop.f32.mrb[5].mxu1 }
 0x3ec   : > { %v838_v54 = vpop.permute.xlu1 %837 }
 0x3ed   : > { %v834_v55 = vpop.permute.xlu0 %833 }
 0x3ee   : > { %v842_v56 = vsel %vm7218_vm13, %v834_v55, %v838_v54  ;;  %v839_v57 = vsel %vm7218_vm13, %v838_v54, %v834_v55  ;;  %vm7231_vm13 = vcmask 515072  }
 0x3ef   : > { %v913_v59 = vadd.f32 %v912_v27, %v842_v56  ;;  %v915_v60 = vadd.f32 %v914_v31, %v839_v57 }
 0x3f0   : > { %v922_v58 = vpop.permute.xlu1 %921 }
 0x3f1   : > { %v920_v61 = vpop.permute.xlu0 %919 }
 0x3f2   : > { %v923_v62 = vsel %vm7215_vm14, %v920_v61, %v922_v58  ;;  %v927_v63 = vsel %vm7215_vm14, %v922_v58, %v920_v61  ;;  %vm7233_vm14 = vcmask 465920  }
 0x3f3   : > { %v928_v0 = vadd.f32 %v923_v62, %v913_v59  ;;  %v929_v1 = vadd.f32 %v927_v63, %v915_v60 }
 0x3f5   : > { %v4652_v2 = vmul.f32 -1.442695, %v928_v0  ;;  %v4653_v3 = vmul.f32 -1.442695, %v929_v1 }
 0x3f7   : > { %6013 = vpow2.f32 %v4652_v2 }
 0x3f8   : > { %6015 = vpow2.f32 %v4653_v3 }
 0x401   : > { %v6014_v5 = vpop.eup %6013 }
 0x402   : > { %v6016_v7 = vpop.eup %6015  ;;  %v936_v8 = vadd.f32 1.0, %v6014_v5 }
 0x403   : > { %v937_v9 = vadd.f32 1.0, %v6016_v7 }
 0x404   : > { %6017 = vrcp.f32 %v936_v8 }
 0x405   : > { %6019 = vrcp.f32 %v937_v9 }
 0x40e   : > { %v6018_v10 = vpop.eup %6017 }
 0x40f   : > { %v6020_v11 = vpop.eup %6019  ;;  %v942_v12 = vmul.f32 %v6018_v10, %v928_v0 }
 0x410   : > { %v943_v13 = vmul.f32 %v6020_v11, %v929_v1 }
 0x412   : > { %1040 = vmatprep.mubr.f32.mxu0 %v943_v13 }
 0x413   : > { %1041 = vmatmul.mubr.f32.vlgmr.msra.gmra.mrb[6].mxu0 %v942_v12 }
 0x4e6   : > { %v4831_v14 = vpop.f32.mrb[6].mxu0 }
 0x4e7   : > { %v4832_v15 = vpop.f32.mrb[7].mxu0 }
 0x4e8   : > { %v4833_v18 = vadd.f32 %v4832_v15, %v4831_v14 }
 0x4ea   : > { %1063 = vrot.lane.b32.xlu1 %v4833_v18, %s6137_s26  ;;  %1060 = vrot.lane.b32.xlu0 %v4833_v18, %s6138_s27 }
 0x4ee   : > { %1071 = vrot.lane.b32.xlu1 %v4833_v18, %s6132_s24  ;;  %1068 = vrot.lane.b32.xlu0 %v4833_v18, %s6139_s28 }
 0x4f2   : > { %1082 = vrot.lane.b32.xlu1 %v4833_v18, %s6140_s9  ;;  %1079 = vrot.lane.b32.xlu0 %v4833_v18, %s7253_s10 }
 0x4f6   : > { %1090 = vrot.lane.b32.xlu1 %v4833_v18, %s7251_s11  ;;  %1087 = vrot.lane.b32.xlu0 %v4833_v18, %s6131_s23 }
 0x55c   : > { %v1064_v23 = vpop.permute.xlu1 %1063  ;;  %v1061_v24 = vpop.permute.xlu0 %1060 }
 0x55d   : > { %v1067_v28 = vsel %vm7233_vm14, %v1061_v24, %v1064_v23 }
 0x560   : > { %v1072_v26 = vpop.permute.xlu1 %1071  ;;  %v1069_v27 = vpop.permute.xlu0 %1068 }
 0x561   : > { %v1074_v29 = vsel %vm7234_vm3, %v1069_v27, %v1072_v26  ;;  %v4671_v26 = vld [vmem:[%s7207_s1 + $0x90] sm:$0xff] }
 0x562   : > { %v1077_v30 = vsel %vm6504_vm2, %v1067_v28, %v1074_v29  ;;  %v4675_v27 = vld [vmem:[%s7207_s1 + $0xb0] sm:$0xff] }
 0x563   : > { %v5422_v31 = vpack.c.bf16 %v4833_v18, %v1077_v30  ;;  %5068 = vmatprep.mubr.msk.f32.mxu0 %vm7238_vm12, %v4675_v27  ;;  %v1762_v27 = vld [vmem:[%s7209_s3 + $0x18] sm:$0xff] }
 0x564   : > { %v1083_v32 = vpop.permute.xlu1 %1082  ;;  %v1080_v33 = vpop.permute.xlu0 %1079 }
 0x565   : > { %5423 = vmatprep.subr.bf16.mxu1 %v5422_v31  ;;  %v1086_v37 = vsel %vm7232_vm1, %v1080_v33, %v1083_v32 }
 0x566   : > { %5425 = vmatpush3.bf16.msra.mxu1 %v5422_v31 }
 0x568   : > { %v1091_v35 = vpop.permute.xlu1 %1090  ;;  %v1088_v36 = vpop.permute.xlu0 %1087 }
 0x569   : > { %v1094_v38 = vsel %vm7231_vm13, %v1088_v36, %v1091_v35 }
 0x56a   : > { %v1097_v39 = vsel %vm6512_vm4, %v1086_v37, %v1094_v38 }
 0x56b   : > { %v5426_v40 = vpack.c.bf16 %v6136_v49, %v1097_v39 }
 0x56d   : > { %5428 = vmatprep.subr.msk.bf16.mxu1 %vm6356_vm5, %v5426_v40 }
 0x56e   : > { %5431 = vmatpush3.bf16.msk.msra.mxu1 %vm6356_vm5, %v5426_v40 }
 0x56f   : > { %5433 = vmatprep.subr.bf16.mxu1 %v5422_v31 }
 0x571   : > { %5013 = vmatmul.mubr.msk.f32.vlgmr.msra.gmra.mrb[6].mxu1 %vm7220_vm10, %v4655_v42 }
 0x572   : > { %5435 = vmatpush3.bf16.msra.mxu1 %v5422_v31  ;;  %5023 = vmatprep.mubr.msk.f32.mxu1 %vm7220_vm10, %v4658_v43 }
 0x573   : > { %5438 = vmatprep.subr.msk.bf16.mxu1 %vm6356_vm5, %v5426_v40 }
 0x576   : > { %5441 = vmatpush3.bf16.msk.msra.mxu1 %vm6356_vm5, %v5426_v40 }
 0x577   : > { %5443 = vmatprep.subr.bf16.mxu1 %v5422_v31 }
 0x579   : > { %5024 = vmatmul.mubr.msk.f32.vlgmr.msra.gmra.mrb[8].mxu1 %vm7220_vm10, %v4659_v44 }
 0x57a   : > { %5445 = vmatpush3.bf16.msra.mxu1 %v5422_v31  ;;  %5034 = vmatprep.mubr.msk.f32.mxu1 %vm7220_vm10, %v4656_v45 }
 0x57b   : > { %5448 = vmatprep.subr.msk.bf16.mxu1 %vm6356_vm5, %v5426_v40 }
 0x57e   : > { %5451 = vmatpush3.bf16.msk.msra.mxu1 %vm6356_vm5, %v5426_v40 }
 0x581   : > { %5035 = vmatmul.mubr.msk.f32.vlgmr.msra.gmra.mrb[10].mxu1 %vm7220_vm10, %v4657_v46  ;;  %vm7228_vm10 = vcmask 64512  }
 0x582   : > { %5051 = vmatprep.mubr.msk.f32.mxu1 %vm7238_vm12, %v4671_v26  ;;  %v1761_v26 = vld [vmem:[%s7209_s3 + $0x10] sm:$0xff] }
 0x644   : > { %v5014_v47 = vpop.f32.mrb[6].mxu1 }
 0x645   : > { %1271 = vrot.lane.b32.xlu1 %v5014_v47, %s7245_s13  ;;  %v1177_v50 = vpop.f32.mrb[7].mxu1 }
 0x646   : > { %1269 = vrot.lane.b32.xlu0 %v1177_v50, %s7245_s13 }
 0x649   : > { %1277 = vrot.lane.b32.xlu1 %v5014_v47, %s7247_s14 }
 0x64a   : > { %1275 = vrot.lane.b32.xlu0 %v1177_v50, %s7247_s14 }
 0x64c   : > { %v5025_v51 = vpop.f32.mrb[8].mxu1 }
 0x64d   : > { %1369 = vrot.lane.b32.xlu1 %v5025_v51, %s7235_s16  ;;  %v1258_v52 = vpop.f32.mrb[9].mxu1 }
 0x64e   : > { %1367 = vrot.lane.b32.xlu0 %v1258_v52, %s7235_s16 }
 0x651   : > { %1375 = vrot.lane.b32.xlu1 %v5025_v51, %s7243_s17 }
 0x652   : > { %1373 = vrot.lane.b32.xlu0 %v1258_v52, %s7243_s17 }
 0x654   : > { %v5036_v53 = vpop.f32.mrb[10].mxu1 }
 0x655   : > { %v1356_v54 = vpop.f32.mrb[11].mxu1 }
 0x6b7   : > { %v1272_v55 = vpop.permute.xlu1 %1271 }
 0x6b8   : > { %v1270_v56 = vpop.permute.xlu0 %1269 }
 0x6bb   : > { %v1278_v57 = vpop.permute.xlu1 %1277 }
 0x6bc   : > { %v1276_v58 = vpop.permute.xlu0 %1275  ;;  %v1283_v60 = vsel %vm7228_vm10, %v1272_v55, %v1278_v57 }
 0x6bd   : > { %v1282_v62 = vsel %vm7228_vm10, %v1270_v56, %v1276_v58  ;;  %v1362_v63 = vadd.f32 %v5036_v53, %v1283_v60 }
 0x6be   : > { %v1357_v1 = vadd.f32 %v1356_v54, %v1282_v62 }
 0x6bf   : > { %v1370_v59 = vpop.permute.xlu1 %1369 }
 0x6c0   : > { %v1368_v61 = vpop.permute.xlu0 %1367 }
 0x6c3   : > { %v1376_v0 = vpop.permute.xlu1 %1375 }
 0x6c4   : > { %v1381_v2 = vsel %vm7230_vm0, %v1370_v59, %v1376_v0  ;;  %v1374_v3 = vpop.permute.xlu0 %1373 }
 0x6c5   : > { %v1383_v5 = vadd.f32 %v1381_v2, %v1362_v63  ;;  %v1380_v7 = vsel %vm7230_vm0, %v1368_v61, %v1374_v3 }
 0x6c6   : > { %v1382_v8 = vadd.f32 %v1380_v7, %v1357_v1 }
 0x6c7   : > { %v4670_v9 = vmul.f32 -1.442695, %v1383_v5 }
 0x6c8   : > { %v4669_v10 = vmul.f32 -1.442695, %v1382_v8 }
 0x6c9   : > { %6021 = vpow2.f32 %v4670_v9  ;;  %v4676_v9 = vld [vmem:[%s7207_s1 + $0xb8] sm:$0xff] }
 0x6ca   : > { %6023 = vpow2.f32 %v4669_v10  ;;  %v4673_v10 = vld [vmem:[%s7207_s1 + $0xa0] sm:$0xff] }
 0x6d3   : > { %v6022_v11 = vpop.eup %6021 }
 0x6d4   : > { %v6024_v12 = vpop.eup %6023  ;;  %v1391_v13 = vadd.f32 1.0, %v6022_v11  ;;  %v4674_v11 = vld [vmem:[%s7207_s1 + $0xa8] sm:$0xff] }
 0x6d5   : > { %v1390_v14 = vadd.f32 1.0, %v6024_v12 }
 0x6d6   : > { %6025 = vrcp.f32 %v1391_v13 }
 0x6d7   : > { %6027 = vrcp.f32 %v1390_v14 }
 0x6e0   : > { %v6026_v15 = vpop.eup %6025 }
 0x6e1   : > { %v6028_v18 = vpop.eup %6027  ;;  %v1397_v19 = vmul.f32 %v6026_v15, %v1383_v5 }
 0x6e2   : > { %v1396_v22 = vmul.f32 %v6028_v18, %v1382_v8  ;;  %v4672_v8 = vld [vmem:[%s7207_s1 + $0x98] sm:$0xff] }
 0x6e4   : > { %v5808_v23 = vpack.i.bf16 %v1397_v19, %v1396_v22  ;;  %v6567_v24 = vpack.c.bf16 %v1397_v19, %v1396_v22  ;;  %v1759_v19 = vld [vmem:[%s7209_s3] sm:$0xff]  ;;  %v1760_v22 = vld [vmem:[%s7209_s3 + $0x8] sm:$0xff] }
 0x6e6   : > { %5809 = vrot.lane.b32.xlu1 %v5808_v23, %s6137_s26  ;;  %5804 = vrot.lane.b32.xlu0 %v5808_v23, %s6138_s27 }
 0x6ea   : > { %5819 = vrot.lane.b32.xlu1 %v5808_v23, %s6132_s24  ;;  %5814 = vrot.lane.b32.xlu0 %v5808_v23, %s6139_s28 }
 0x6ee   : > { %5829 = vrot.lane.b32.xlu1 %v5808_v23, %s6140_s9  ;;  %5824 = vrot.lane.b32.xlu0 %v5808_v23, %s7253_s10  ;;  %s7348_s10 = smov 8  }
 0x6f2   : > { %5839 = vrot.lane.b32.xlu1 %v5808_v23, %s7251_s11  ;;  %5834 = vrot.lane.b32.xlu0 %v5808_v23, %s6131_s23  ;;  %s7349_s11 = smov 72  }
 0x758   : > { %v5810_v28 = vpop.permute.xlu1 %5809  ;;  %v5805_v29 = vpop.permute.xlu0 %5804 }
 0x759   : > { %v5812_v30 = vunpack.i.h.bf16 %v5810_v28  ;;  %v5811_v31 = vunpack.i.l.bf16 %v5810_v28  ;;  %v5807_v32 = vunpack.i.h.bf16 %v5805_v29  ;;  %v5806_v33 = vunpack.i.l.bf16 %v5805_v29  ;;  %v1763_v29 = vld [vmem:[%s7209_s3 + $0x20] sm:$0xff] }
 0x75a   : > { %v5492_v28 = vpack.c.bf16 %v1762_v27, %v1761_v26 }
 0x75b   : > { %v1413_v42 = vsel %vm7233_vm14, %v5807_v32, %v5812_v30  ;;  %v1412_v43 = vsel %vm7233_vm14, %v5806_v33, %v5811_v31  ;;  %v1764_v30 = vld [vmem:[%s7209_s3 + $0x28] sm:$0xff]  ;;  %v1765_v32 = vld [vmem:[%s7209_s3 + $0x30] sm:$0xff]  ;;  %v1766_v33 = vld [vmem:[%s7209_s3 + $0x38] sm:$0xff]  ;;  %vm7282_vm14 = vcmask 121856  }
 0x75c   : > { %v5820_v35 = vpop.permute.xlu1 %5819  ;;  %v5815_v36 = vpop.permute.xlu0 %5814  ;;  %v5496_v31 = vpack.c.bf16 %v1764_v30, %v1763_v29 }
 0x75d   : > { %v5822_v37 = vunpack.i.h.bf16 %v5820_v35  ;;  %v5821_v38 = vunpack.i.l.bf16 %v5820_v35  ;;  %v5817_v39 = vunpack.i.h.bf16 %v5815_v36  ;;  %v5816_v40 = vunpack.i.l.bf16 %v5815_v36 }
 0x75e   : > { %v5500_v35 = vpack.c.bf16 %v1766_v33, %v1765_v32 }
 0x75f   : > { %v1427_v44 = vsel %vm7234_vm3, %v5817_v39, %v5822_v37  ;;  %v1426_v45 = vsel %vm7234_vm3, %v5816_v40, %v5821_v38 }
 0x760   : > { %v1428_v46 = vsel %vm6504_vm2, %v1412_v43, %v1426_v45  ;;  %v1429_v47 = vsel %vm6504_vm2, %v1413_v42, %v1427_v44  ;;  %v5830_v50 = vpop.permute.xlu1 %5829  ;;  %v5825_v51 = vpop.permute.xlu0 %5824 }
 0x761   : > { %v5452_v52 = vpack.c.bf16 %v1429_v47, %v1428_v46  ;;  %v5832_v53 = vunpack.i.h.bf16 %v5830_v50  ;;  %v5831_v54 = vunpack.i.l.bf16 %v5830_v50  ;;  %v5827_v55 = vunpack.i.h.bf16 %v5825_v51 }
 0x762   : > { %v5826_v56 = vunpack.i.l.bf16 %v5825_v51 }
 0x763   : > { %5453 = vmatprep.subr.bf16.mxu1 %v5452_v52  ;;  %5465 = vmatprep.subr.bf16.mxu0 %v5452_v52  ;;  %v1443_v63 = vsel %vm7232_vm1, %v5827_v55, %v5832_v53 }
 0x764   : > { %v5840_v57 = vpop.permute.xlu1 %5839  ;;  %v5835_v58 = vpop.permute.xlu0 %5834  ;;  %5455 = vmatpush3.bf16.msra.mxu1 %v5452_v52  ;;  %5467 = vmatpush3.bf16.msra.mxu0 %v5452_v52  ;;  %v1442_v0 = vsel %vm7232_vm1, %v5826_v56, %v5831_v54 }
 0x765   : > { %v5842_v59 = vunpack.i.h.bf16 %v5840_v57  ;;  %v5841_v60 = vunpack.i.l.bf16 %v5840_v57  ;;  %v5837_v61 = vunpack.i.h.bf16 %v5835_v58  ;;  %v5836_v62 = vunpack.i.l.bf16 %v5835_v58  ;;  %5457 = vmatprep.subr.bf16.mxu1 %v6567_v24  ;;  %5469 = vmatprep.subr.bf16.mxu0 %v6567_v24 }
 0x767   : > { %v1457_v1 = vsel %vm7231_vm13, %v5837_v61, %v5842_v59  ;;  %v1456_v2 = vsel %vm7231_vm13, %v5836_v62, %v5841_v60  ;;  %vm7278_vm13 = vcmask 105472  }
 0x768   : > { %v1458_v3 = vsel %vm6512_vm4, %v1442_v0, %v1456_v2  ;;  %v1459_v5 = vsel %vm6512_vm4, %v1443_v63, %v1457_v1  ;;  %5459 = vmatpush3.bf16.msra.mxu1 %v6567_v24  ;;  %5471 = vmatpush3.bf16.msra.mxu0 %v6567_v24  ;;  %vm7279_vm1 = vmmov %vm7278_vm13 }
 0x769   : > { %v5460_v7 = vpack.c.bf16 %v1459_v5, %v1458_v3  ;;  %v6147_v5 = vmov 0.0|0.0  }
 0x76b   : > { %5461 = vmatprep.subr.bf16.mxu1 %v5460_v7  ;;  %5473 = vmatprep.subr.bf16.mxu0 %v5460_v7 }
 0x76c   : > { %5463 = vmatpush3.bf16.msra.mxu1 %v5460_v7  ;;  %5475 = vmatpush3.bf16.msra.mxu0 %v5460_v7 }
 0x76d   : > { %5049 = vmatprep.subr.msk.mxu1 %vm7237_vm15, %v6136_v49  ;;  %5066 = vmatprep.subr.msk.mxu0 %vm7237_vm15, %v6136_v49 }
 0x770   : > { %5050 = vmatpush3.msk.msra.mxu1 %vm7237_vm15, %v6136_v49  ;;  %5067 = vmatpush3.msk.msra.mxu0 %vm7237_vm15, %v6136_v49 }
 0x771   : > { %5052 = vmatmul.mubr.msk.f32.vlgmr.msra.gmra.mrb[12].mxu1 %vm7238_vm12, %v4672_v8  ;;  %5477 = vmatprep.subr.bf16.mxu1 %v5452_v52 }
 0x772   : > { %5479 = vmatpush3.bf16.msra.mxu1 %v5452_v52  ;;  %5069 = vmatmul.mubr.msk.f32.vlgmr.msra.gmra.mrb[8].mxu0 %vm7238_vm12, %v4676_v9 }
 0x773   : > { %5481 = vmatprep.subr.bf16.mxu1 %v6567_v24  ;;  %5085 = vmatprep.mubr.msk.f32.mxu1 %vm7238_vm12, %v4673_v10  ;;  %v1853_v10 = vand.u32 3, %v6253_v6 }
 0x776   : > { %5483 = vmatpush3.bf16.msra.mxu1 %v6567_v24  ;;  %v5488_v24 = vpack.c.bf16 %v1760_v22, %v1759_v19 }
 0x777   : > { %5485 = vmatprep.subr.bf16.mxu1 %v5460_v7 }
 0x778   : > { %5489 = vmatprep.subr.bf16.mxu0 %v5488_v24 }
 0x779   : > { %5491 = vmatpush3.bf16.msra.mxu0 %v5488_v24 }
 0x77a   : > { %5487 = vmatpush3.bf16.msra.mxu1 %v5460_v7  ;;  %5493 = vmatprep.subr.bf16.mxu0 %v5492_v28 }
 0x77b   : > { %5083 = vmatprep.subr.msk.mxu1 %vm7237_vm15, %v6136_v49 }
 0x77d   : > { %5495 = vmatpush3.bf16.msra.mxu0 %v5492_v28 }
 0x77e   : > { %5084 = vmatpush3.msk.msra.mxu1 %vm7237_vm15, %v6136_v49  ;;  %5497 = vmatprep.subr.bf16.mxu0 %v5496_v31 }
 0x77f   : > { %5086 = vmatmul.mubr.msk.f32.vlgmr.msra.gmra.mrb[14].mxu1 %vm7238_vm12, %v4674_v11  ;;  %5504 = vmatprep.subr.bf16.mxu1 %v6147_v5 }
 0x781   : > { %5499 = vmatpush3.bf16.msra.mxu0 %v5496_v31 }
 0x782   : > { %5501 = vmatprep.subr.bf16.mxu0 %v5500_v35 }
 0x785   : > { %5503 = vmatpush3.bf16.msra.mxu0 %v5500_v35 }
 0x786   : > { %5513 = vmatprep.subr.bf16.mxu0 %v6147_v5 }
 0x844   : > { %v5053_v12 = vpop.f32.mrb[12].mxu1 }
 0x845   : > { %1640 = vrot.lane.b32.xlu1 %v5053_v12, %s7247_s14  ;;  %1634 = vrot.lane.b32.xlu0 %v5053_v12, %s7245_s13  ;;  %v1540_v13 = vpop.f32.mrb[13].mxu1  ;;  %v5070_v14 = vpop.f32.mrb[8].mxu0 }
 0x846   : > { %v1621_v15 = vpop.f32.mrb[9].mxu0 }
 0x849   : > { %1638 = vrot.lane.b32.xlu1 %v1540_v13, %s7247_s14  ;;  %1632 = vrot.lane.b32.xlu0 %v1540_v13, %s7245_s13  ;;  %s7376_s13 = smov 16   ;;  %s7377_s14 = smov 112  }
 0x84d   : > { %1735 = vrot.lane.b32.xlu1 %v1621_v15, %s7243_s17  ;;  %1729 = vrot.lane.b32.xlu0 %v1621_v15, %s7235_s16 }
 0x851   : > { %1737 = vrot.lane.b32.xlu1 %v5070_v14, %s7243_s17  ;;  %1731 = vrot.lane.b32.xlu0 %v5070_v14, %s7235_s16  ;;  %s6155_s16 = smov 12  }
 0x852   : > { %v5087_v18 = vpop.f32.mrb[14].mxu1 }
 0x853   : > { %v1718_v23 = vpop.f32.mrb[15].mxu1 }
 0x8b7   : > { %v1641_v36 = vpop.permute.xlu1 %1640  ;;  %v1635_v37 = vpop.permute.xlu0 %1634 }
 0x8b8   : > { %v1645_v45 = vsel %vm7228_vm10, %v1635_v37, %v1641_v36 }
 0x8b9   : > { %v1724_v50 = vadd.f32 %v5087_v18, %v1645_v45 }
 0x8bb   : > { %v1639_v38 = vpop.permute.xlu1 %1638  ;;  %v1633_v39 = vpop.permute.xlu0 %1632 }
 0x8bc   : > { %v1644_v40 = vsel %vm7228_vm10, %v1633_v39, %v1639_v38  ;;  %vm7229_vm10 = vcmask 523264  }
 0x8bd   : > { %v1719_v42 = vadd.f32 %v1718_v23, %v1644_v40 }
 0x8bf   : > { %v1736_v43 = vpop.permute.xlu1 %1735  ;;  %v1730_v44 = vpop.permute.xlu0 %1729 }
 0x8c0   : > { %v1741_v46 = vsel %vm7230_vm0, %v1730_v44, %v1736_v43  ;;  %v4728_v43 = vld [vmem:[%s7207_s1 + $0x158] sm:$0xff] }
 0x8c1   : > { %v1743_v47 = vadd.f32 %v1741_v46, %v1719_v42 }
 0x8c3   : > { %v4686_v51 = vmul.f32 -1.442695, %v1743_v47  ;;  %v1738_v52 = vpop.permute.xlu1 %1737  ;;  %v1732_v53 = vpop.permute.xlu0 %1731 }
 0x8c4   : > { %v1742_v54 = vsel %vm7230_vm0, %v1732_v53, %v1738_v52  ;;  %vm6688_vm0 = vcmp.eq.s32.totalorder %v1853_v10, 0 }
 0x8c5   : > { %6029 = vpow2.f32 %v4686_v51  ;;  %v1744_v55 = vadd.f32 %v1742_v54, %v1724_v50 }
 0x8c7   : > { %v4687_v56 = vmul.f32 -1.442695, %v1744_v55 }
 0x8c9   : > { %6031 = vpow2.f32 %v4687_v56 }
 0x8cf   : > { %v6030_v57 = vpop.eup %6029 }
 0x8d0   : > { %v1751_v58 = vadd.f32 1.0, %v6030_v57  ;;  %v4690_v57 = vld [vmem:[%s7207_s1 + $0xc0] sm:$0xff] }
 0x8d2   : > { %6033 = vrcp.f32 %v1751_v58  ;;  %v4692_v58 = vld [vmem:[%s7207_s1 + $0xe0] sm:$0xff] }
 0x8d3   : > { %v6032_v59 = vpop.eup %6031 }
 0x8d4   : > { %v1752_v60 = vadd.f32 1.0, %v6032_v59  ;;  %v4691_v59 = vld [vmem:[%s7207_s1 + $0xd0] sm:$0xff] }
 0x8d6   : > { %6035 = vrcp.f32 %v1752_v60 }
 0x8dc   : > { %v6034_v61 = vpop.eup %6033 }
 0x8dd   : > { %v1757_v62 = vmul.f32 %v6034_v61, %v1743_v47 }
 0x8df   : > { %5104 = vmatprep.mubr.msk.f32.mxu0 %vm7229_vm10, %v1757_v62 }
 0x8e0   : > { %v6036_v63 = vpop.eup %6035 }
 0x8e1   : > { %v1758_v0 = vmul.f32 %v6036_v63, %v1744_v55 }
 0x8e3   : > { %5105 = vmatmul.mubr.msk.f32.vlgmr.msra.gmra.mrb[10].mxu0 %vm7229_vm10, %v1758_v0  ;;  %vm7241_vm10 = vmmov 0  }
 0x8e4   : > { %5121 = vmatprep.mubr.msk.f32.mxu1 %vm7241_vm10, %v6130_v4  ;;  %5138 = vmatprep.mubr.msk.f32.mxu0 %vm7241_vm10, %v6130_v4 }
 0x9b6   : > { %v5106_v1 = vpop.f32.mrb[10].mxu0 }
 0x9b7   : > { %v1840_v2 = vpop.f32.mrb[11].mxu0 }
 0x9b8   : > { %v5848_v3 = vpack.i.bf16 %v5106_v1, %v1840_v2  ;;  %v6675_v7 = vpack.c.bf16 %v5106_v1, %v1840_v2 }
 0x9ba   : > { %5849 = vrot.lane.b32.xlu1 %v5848_v3, %s6148_s18  ;;  %5844 = vrot.lane.b32.xlu0 %v5848_v3, %s6149_s25 }
 0x9be   : > { %5859 = vrot.lane.b32.xlu1 %v5848_v3, %s6132_s24  ;;  %5854 = vrot.lane.b32.xlu0 %v5848_v3, %s6129_s20 }
 0x9c2   : > { %5869 = vrot.lane.b32.xlu1 %v5848_v3, %s6150_s29  ;;  %5864 = vrot.lane.b32.xlu0 %v5848_v3, %s6151_s30 }
 0x9c6   : > { %5879 = vrot.lane.b32.xlu1 %v5848_v3, %s6128_s19  ;;  %5874 = vrot.lane.b32.xlu0 %v5848_v3, %s6131_s23 }
 0xa2c   : > { %v5850_v8 = vpop.permute.xlu1 %5849  ;;  %v5845_v9 = vpop.permute.xlu0 %5844 }
 0xa2d   : > { %v5852_v11 = vunpack.i.h.bf16 %v5850_v8  ;;  %v5851_v12 = vunpack.i.l.bf16 %v5850_v8  ;;  %v5847_v13 = vunpack.i.h.bf16 %v5845_v9  ;;  %v5846_v14 = vunpack.i.l.bf16 %v5845_v9 }
 0xa2f   : > { %v1877_v27 = vsel %vm7278_vm13, %v5847_v13, %v5852_v11  ;;  %v1876_v28 = vsel %vm7279_vm1, %v5846_v14, %v5851_v12  ;;  %vm1909_vm13 = vcmask 23552   ;;  %vm6700_vm1 = vcmp.eq.s32.totalorder %v1853_v10, 3 }
 0xa30   : > { %v5860_v15 = vpop.permute.xlu1 %5859  ;;  %v5855_v18 = vpop.permute.xlu0 %5854 }
 0xa31   : > { %v5862_v22 = vunpack.i.h.bf16 %v5860_v15  ;;  %v5861_v23 = vunpack.i.l.bf16 %v5860_v15  ;;  %v5857_v24 = vunpack.i.h.bf16 %v5855_v18  ;;  %v5856_v26 = vunpack.i.l.bf16 %v5855_v18 }
 0xa33   : > { %v1891_v6 = vsel %vm7234_vm3, %v5857_v24, %v5862_v22  ;;  %v1890_v29 = vsel %vm7234_vm3, %v5856_v26, %v5861_v23  ;;  %vm7283_vm3 = vmmov %vm7282_vm14 }
 0xa34   : > { %v5870_v30 = vpop.permute.xlu1 %5869  ;;  %v5865_v31 = vpop.permute.xlu0 %5864  ;;  %v1894_v32 = vsel %vm6688_vm0, %v1876_v28, %v1890_v29  ;;  %v1895_v33 = vsel %vm6688_vm0, %v1877_v27, %v1891_v6 }
 0xa35   : > { %v5505_v35 = vpack.c.bf16 %v1895_v33, %v1894_v32  ;;  %v5872_v36 = vunpack.i.h.bf16 %v5870_v30  ;;  %v5871_v37 = vunpack.i.l.bf16 %v5870_v30  ;;  %v5867_v38 = vunpack.i.h.bf16 %v5865_v31 }
 0xa36   : > { %v5866_v39 = vunpack.i.l.bf16 %v5865_v31 }
 0xa37   : > { %5506 = vmatpush3.bf16.msra.mxu1 %v5505_v35  ;;  %5515 = vmatpush3.bf16.msra.mxu0 %v5505_v35  ;;  %v1911_v50 = vsel %vm1909_vm13, %v5867_v38, %v5872_v36 }
 0xa38   : > { %v5880_v40 = vpop.permute.xlu1 %5879  ;;  %v5875_v42 = vpop.permute.xlu0 %5874  ;;  %5507 = vmatprep.subr.bf16.mxu1 %v6147_v5  ;;  %5516 = vmatprep.subr.bf16.mxu0 %v6147_v5  ;;  %v1910_v51 = vsel %vm1909_vm13, %v5866_v39, %v5871_v37 }
 0xa39   : > { %v5882_v44 = vunpack.i.h.bf16 %v5880_v40  ;;  %v5881_v45 = vunpack.i.l.bf16 %v5880_v40  ;;  %v5877_v46 = vunpack.i.h.bf16 %v5875_v42  ;;  %v5876_v47 = vunpack.i.l.bf16 %v5875_v42 }
 0xa3b   : > { %v1925_v52 = vsel %vm7282_vm14, %v5877_v46, %v5882_v44  ;;  %v1924_v53 = vsel %vm7283_vm3, %v5876_v47, %v5881_v45  ;;  %5509 = vmatpush3.bf16.msra.mxu1 %v6675_v7  ;;  %5518 = vmatpush3.bf16.msra.mxu0 %v6675_v7  ;;  %vm7240_vm3 = vcmask 31744   ;;  %vm7239_vm14 = vcmask 97280   ;;  %v4700_v44 = vld [vmem:[%s7207_s1 + $0xf0] sm:$0xff]  ;;  %v4701_v46 = vld [vmem:[%s7207_s1 + $0x100] sm:$0xff] }
 0xa3c   : > { %v1928_v54 = vsel %vm6700_vm1, %v1910_v51, %v1924_v53  ;;  %v1929_v55 = vsel %vm6700_vm1, %v1911_v50, %v1925_v52  ;;  %5510 = vmatprep.subr.bf16.mxu1 %v6147_v5  ;;  %5519 = vmatprep.subr.bf16.mxu0 %v6147_v5  ;;  %v4702_v45 = vld [vmem:[%s7207_s1 + $0x110] sm:$0xff] }
 0xa3d   : > { %v5511_v56 = vpack.c.bf16 %v1929_v55, %v1928_v54 }
 0xa3f   : > { %5512 = vmatpush3.bf16.msra.mxu1 %v5511_v56  ;;  %5521 = vmatpush3.bf16.msra.mxu0 %v5511_v56 }
 0xa40   : > { %5119 = vmatprep.subr.mxu1 %v6130_v4  ;;  %5136 = vmatprep.subr.mxu0 %v6130_v4 }
 0xa43   : > { %5120 = vmatpush3.msk.msra.mxu1 %vm7237_vm15, %v6136_v49  ;;  %5137 = vmatpush3.msk.msra.mxu0 %vm7237_vm15, %v6136_v49 }
 0xa44   : > { %5122 = vmatmul.mubr.msk.f32.vlgmr.msra.gmra.mrb[16].mxu1 %vm7238_vm12, %v4690_v57  ;;  %5522 = vmatprep.subr.bf16.mxu1 %v6147_v5 }
 0xa45   : > { %5524 = vmatpush3.bf16.msra.mxu1 %v5505_v35  ;;  %5139 = vmatmul.mubr.msk.f32.vlgmr.msra.gmra.mrb[12].mxu0 %vm7238_vm12, %v4692_v58 }
 0xa46   : > { %5525 = vmatprep.subr.bf16.mxu1 %v6147_v5  ;;  %5155 = vmatprep.mubr.msk.f32.mxu1 %vm7241_vm10, %v6130_v4 }
 0xa47   : > { %5531 = vmatprep.subr.bf16.mxu0 %v6147_v5  ;;  %5162 = vmatprep.mubr.msk.f32.mxu0 %vm7241_vm10, %v6130_v4 }
 0xa49   : > { %5527 = vmatpush3.bf16.msra.mxu1 %v6675_v7 }
 0xa4a   : > { %5528 = vmatprep.subr.bf16.mxu1 %v6147_v5 }
 0xa4d   : > { %5530 = vmatpush3.bf16.msra.mxu1 %v5511_v56 }
 0xa4e   : > { %5153 = vmatprep.subr.mxu1 %v6130_v4 }
 0xa51   : > { %5154 = vmatpush3.msk.msra.mxu1 %vm7237_vm15, %v6136_v49  ;;  %vm7284_vm15 = vcmask 7168  }
 0xa52   : > { %5156 = vmatmul.mubr.msk.f32.vlgmr.msra.gmra.mrb[18].mxu1 %vm7238_vm12, %v4691_v59  ;;  %vm7285_vm12 = vcmask 105472  }
 0xb17   : > { %v2003_v60 = vpop.f32.mrb[16].mxu1 }
 0xb18   : > { %2084 = vrot.lane.b32.xlu1 %v2003_v60, %s6153_s7  ;;  %2081 = vrot.lane.b32.xlu0 %v2003_v60, %s6154_s8  ;;  %v5123_v61 = vpop.f32.mrb[17].mxu1  ;;  %v2076_v62 = vpop.f32.mrb[12].mxu0 }
 0xb19   : > { %v5140_v63 = vpop.f32.mrb[13].mxu0 }
 0xb1c   : > { %2166 = vrot.lane.b32.xlu1 %v2076_v62, %s6155_s16  ;;  %2163 = vrot.lane.b32.xlu0 %v2076_v62, %s6156_s12 }
 0xb25   : > { %v2158_v0 = vpop.f32.mrb[18].mxu1 }
 0xb26   : > { %v5157_v1 = vpop.f32.mrb[19].mxu1 }
 0xb8a   : > { %v2085_v2 = vpop.permute.xlu1 %2084  ;;  %v2082_v3 = vpop.permute.xlu0 %2081 }
 0xb8b   : > { %v2088_v7 = vsel %vm7240_vm3, %v2082_v3, %v2085_v2  ;;  %vm7287_vm3 = vcmask 1043456  }
 0xb8c   : > { %v2159_v8 = vadd.f32 %v2158_v0, %v2088_v7  ;;  %vm7288_vm10 = vmmov %vm7287_vm3  ;;  %v4710_v7 = vld [vmem:[%s7207_s1 + $0x120] sm:$0xff] }
 0xb8e   : > { %v2167_v9 = vpop.permute.xlu1 %2166  ;;  %v2164_v10 = vpop.permute.xlu0 %2163 }
 0xb8f   : > { %v2170_v11 = vsel %vm7239_vm14, %v2164_v10, %v2167_v9  ;;  %vm7286_vm14 = vcmask 121856  }
 0xb90   : > { %v2171_v12 = vadd.f32 %v2170_v11, %v2159_v8  ;;  %v4714_v8 = vld [vmem:[%s7207_s1 + $0x140] sm:$0xff] }
 0xb92   : > { %v4699_v13 = vmul.f32 -1.442695, %v2171_v12 }
 0xb94   : > { %6037 = vpow2.f32 %v4699_v13 }
 0xb9e   : > { %v6038_v14 = vpop.eup %6037 }
 0xb9f   : > { %v2175_v15 = vadd.f32 1.0, %v6038_v14 }
 0xba1   : > { %6039 = vrcp.f32 %v2175_v15 }
 0xbab   : > { %v6040_v18 = vpop.eup %6039 }
 0xbac   : > { %v2178_v22 = vmul.f32 %v6040_v18, %v2171_v12 }
 0xbae   : > { %2183 = vrot.lane.b32.xlu1 %v2178_v22, %s6148_s18  ;;  %2180 = vrot.lane.b32.xlu0 %v2178_v22, %s6149_s25  ;;  %v2210_v35 = vrot.slane %v2178_v22, 4 }
 0xbb2   : > { %2190 = vrot.lane.b32.xlu1 %v2178_v22, %s6132_s24  ;;  %2187 = vrot.lane.b32.xlu0 %v2178_v22, %s6129_s20 }
 0xbb6   : > { %2198 = vrot.lane.b32.xlu1 %v2178_v22, %s6150_s29  ;;  %2195 = vrot.lane.b32.xlu0 %v2178_v22, %s6151_s30 }
 0xbba   : > { %2205 = vrot.lane.b32.xlu1 %v2178_v22, %s6128_s19  ;;  %2202 = vrot.lane.b32.xlu0 %v2178_v22, %s6131_s23 }
 0xc20   : > { %v2184_v23 = vpop.permute.xlu1 %2183  ;;  %v2181_v24 = vpop.permute.xlu0 %2180 }
 0xc21   : > { %v2186_v30 = vsel %vm7285_vm12, %v2181_v24, %v2184_v23 }
 0xc24   : > { %v2191_v26 = vpop.permute.xlu1 %2190  ;;  %v2188_v27 = vpop.permute.xlu0 %2187 }
 0xc25   : > { %v2193_v29 = vsel %vm7284_vm15, %v2188_v27, %v2191_v26  ;;  %vm7289_vm15 = vmmov 0  }
 0xc26   : > { %v2194_v31 = vsel %vm6688_vm0, %v2186_v30, %v2193_v29 }
 0xc27   : > { %v2212_v39 = vsel %vm7287_vm3, %v2194_v31, %v2210_v35  ;;  %v4712_v35 = vld [vmem:[%s7207_s1 + $0x130] sm:$0xff] }
 0xc28   : > { %v2199_v28 = vpop.permute.xlu1 %2198  ;;  %v2196_v6 = vpop.permute.xlu0 %2195 }
 0xc29   : > { %v2201_v36 = vsel %vm1909_vm13, %v2196_v6, %v2199_v28 }
 0xc2c   : > { %v2206_v32 = vpop.permute.xlu1 %2205  ;;  %v2203_v33 = vpop.permute.xlu0 %2202 }
 0xc2d   : > { %v2208_v37 = vsel %vm7286_vm14, %v2203_v33, %v2206_v32  ;;  %vm7292_vm14 = vcmask 31744   ;;  %v4711_v32 = vld [vmem:[%s7207_s1 + $0x128] sm:$0xff] }
 0xc2e   : > { %v2209_v38 = vsel %vm6700_vm1, %v2201_v36, %v2208_v37  ;;  %v4715_v33 = vld [vmem:[%s7207_s1 + $0x148] sm:$0xff]  ;;  %v4713_v36 = vld [vmem:[%s7207_s1 + $0x138] sm:$0xff] }
 0xc2f   : > { %v2213_v40 = vsel %vm7288_vm10, %v2209_v38, 1.0  ;;  %vm7290_vm10 = vmmov %vm7285_vm12 }
 0xc30   : > { %v5532_v42 = vpack.c.bf16 %v2213_v40, %v2212_v39  ;;  %vm7291_vm3 = vmmov %vm7290_vm10 }
 0xc32   : > { %5534 = vmatpush3.bf16.msk.msra.mxu0 %vm6293_vm11, %v5532_v42 }
 0xc33   : > { %5535 = vmatprep.subr.bf16.mxu0 %v6147_v5 }
 0xc35   : > { %5163 = vmatmul.mubr.msk.f32.vlgmr.msra.gmra.mrb[14].mxu0 %vm7285_vm12, %v4700_v44  ;;  %vm7293_vm12 = vcmask 97280  }
 0xc36   : > { %5538 = vmatpush3.bf16.msk.msra.mxu0 %vm6293_vm11, %v5532_v42  ;;  %5169 = vmatprep.mubr.msk.f32.mxu0 %vm7289_vm15, %v6130_v4 }
 0xc37   : > { %5539 = vmatprep.subr.bf16.mxu0 %v6147_v5 }
 0xc39   : > { %5170 = vmatmul.mubr.msk.f32.vlgmr.msra.gmra.mrb[16].mxu0 %vm7290_vm10, %v4702_v45  ;;  %vm7294_vm10 = vmmov %vm7291_vm3 }
 0xc3a   : > { %5542 = vmatpush3.bf16.msk.msra.mxu0 %vm6293_vm11, %v5532_v42  ;;  %5176 = vmatprep.mubr.msk.f32.mxu0 %vm7289_vm15, %v6130_v4 }
 0xc3b   : > { %5183 = vmatprep.mubr.msk.f32.mxu1 %vm7294_vm10, %v4710_v7  ;;  %vm7297_vm10 = vcmask 121856  }
 0xc3d   : > { %5177 = vmatmul.mubr.msk.f32.vlgmr.msra.gmra.mrb[18].mxu0 %vm7291_vm3, %v4701_v46 }
 0xc3e   : > { %5190 = vmatprep.mubr.msk.f32.mxu0 %vm7291_vm3, %v4714_v8 }
 0xd08   : > { %v2290_v47 = vpop.f32.mrb[14].mxu0 }
 0xd09   : > { %2371 = vrot.lane.b32.xlu1 %v2290_v47, %s6153_s7  ;;  %2368 = vrot.lane.b32.xlu0 %v2290_v47, %s6154_s8  ;;  %v5164_v50 = vpop.f32.mrb[15].mxu0 }
 0xd0c   : > { %v2363_v51 = vpop.f32.mrb[16].mxu0 }
 0xd0d   : > { %2452 = vrot.lane.b32.xlu1 %v2363_v51, %s6155_s16  ;;  %2449 = vrot.lane.b32.xlu0 %v2363_v51, %s6156_s12  ;;  %v5171_v52 = vpop.f32.mrb[17].mxu0 }
 0xd10   : > { %v2444_v53 = vpop.f32.mrb[18].mxu0 }
 0xd11   : > { %v5178_v54 = vpop.f32.mrb[19].mxu0 }
 0xd7b   : > { %v2372_v55 = vpop.permute.xlu1 %2371  ;;  %v2369_v56 = vpop.permute.xlu0 %2368 }
 0xd7c   : > { %v2374_v57 = vsel %vm7292_vm14, %v2369_v56, %v2372_v55  ;;  %vm7295_vm14 = vcmask 7168  }
 0xd7d   : > { %v2445_v58 = vadd.f32 %v2444_v53, %v2374_v57 }
 0xd7f   : > { %v2453_v59 = vpop.permute.xlu1 %2452  ;;  %v2450_v60 = vpop.permute.xlu0 %2449 }
 0xd80   : > { %v2455_v61 = vsel %vm7293_vm12, %v2450_v60, %v2453_v59  ;;  %vm7296_vm12 = vmmov %vm7291_vm3  ;;  %vm7298_vm3 = vcmask 1043456  }
 0xd81   : > { %v2456_v62 = vadd.f32 %v2455_v61, %v2445_v58  ;;  %vm7299_vm9 = vmmov %vm7298_vm3 }
 0xd83   : > { %v4709_v63 = vmul.f32 -1.442695, %v2456_v62 }
 0xd85   : > { %6041 = vpow2.f32 %v4709_v63 }
 0xd8f   : > { %v6042_v0 = vpop.eup %6041 }
 0xd90   : > { %v2460_v1 = vadd.f32 1.0, %v6042_v0 }
 0xd92   : > { %6043 = vrcp.f32 %v2460_v1 }
 0xd9c   : > { %v6044_v2 = vpop.eup %6043 }
 0xd9d   : > { %v2463_v3 = vmul.f32 %v6044_v2, %v2456_v62 }
 0xd9f   : > { %2468 = vrot.lane.b32.xlu1 %v2463_v3, %s6148_s18  ;;  %2465 = vrot.lane.b32.xlu0 %v2463_v3, %s6149_s25  ;;  %v2495_v26 = vrot.slane %v2463_v3, 4 }
 0xda3   : > { %2475 = vrot.lane.b32.xlu1 %v2463_v3, %s6132_s24  ;;  %2472 = vrot.lane.b32.xlu0 %v2463_v3, %s6129_s20 }
 0xda7   : > { %2483 = vrot.lane.b32.xlu1 %v2463_v3, %s6150_s29  ;;  %2480 = vrot.lane.b32.xlu0 %v2463_v3, %s6151_s30 }
 0xdab   : > { %2490 = vrot.lane.b32.xlu1 %v2463_v3, %s6128_s19  ;;  %2487 = vrot.lane.b32.xlu0 %v2463_v3, %s6131_s23 }
 0xe11   : > { %v2469_v9 = vpop.permute.xlu1 %2468  ;;  %v2466_v10 = vpop.permute.xlu0 %2465 }
 0xe12   : > { %v2471_v18 = vsel %vm7296_vm12, %v2466_v10, %v2469_v9 }
 0xe15   : > { %v2476_v11 = vpop.permute.xlu1 %2475  ;;  %v2473_v12 = vpop.permute.xlu0 %2472 }
 0xe16   : > { %v2478_v15 = vsel %vm7295_vm14, %v2473_v12, %v2476_v11 }
 0xe17   : > { %v2479_v22 = vsel %vm6688_vm0, %v2471_v18, %v2478_v15  ;;  %v4731_v15 = vld [vmem:[%s7207_s1 + $0x170] sm:$0xff] }
 0xe18   : > { %v2497_v29 = vsel %vm7298_vm3, %v2479_v22, %v2495_v26  ;;  %vm7304_vm3 = vcmask 31744  }
 0xe19   : > { %v2484_v13 = vpop.permute.xlu1 %2483  ;;  %v2481_v14 = vpop.permute.xlu0 %2480 }
 0xe1a   : > { %v2486_v27 = vsel %vm1909_vm13, %v2481_v14, %v2484_v13  ;;  %v4727_v14 = vld [vmem:[%s7207_s1 + $0x150] sm:$0xff] }
 0xe1d   : > { %v2491_v23 = vpop.permute.xlu1 %2490  ;;  %v2488_v24 = vpop.permute.xlu0 %2487 }
 0xe1e   : > { %v2493_v28 = vsel %vm7297_vm10, %v2488_v24, %v2491_v23 }
 0xe1f   : > { %v2494_v6 = vsel %vm6700_vm1, %v2486_v27, %v2493_v28 }
 0xe20   : > { %v2498_v30 = vsel %vm7299_vm9, %v2494_v6, 1.0  ;;  %vm7300_vm9 = vmmov %vm7296_vm12 }
 0xe21   : > { %v5543_v31 = vpack.c.bf16 %v2498_v30, %v2497_v29  ;;  %vm7301_vm14 = vmmov %vm7300_vm9 }
 0xe22   : > { %vm7302_vm12 = vmmov %vm7300_vm9 }
 0xe23   : > { %5545 = vmatprep.subr.msk.bf16.mxu1 %vm6293_vm11, %v5543_v31  ;;  %5551 = vmatprep.subr.msk.bf16.mxu0 %vm6293_vm11, %v5543_v31  ;;  %vm7303_vm10 = vmmov %vm7300_vm9 }
 0xe24   : > { %5548 = vmatpush3.bf16.msk.msra.mxu1 %vm6293_vm11, %v5543_v31  ;;  %5554 = vmatpush3.bf16.msk.msra.mxu0 %vm6293_vm11, %v5543_v31 }
 0xe25   : > { %5557 = vmatprep.subr.msk.bf16.mxu1 %vm6293_vm11, %v5543_v31 }
 0xe27   : > { %5184 = vmatmul.mubr.msk.f32.vlgmr.msra.gmra.mrb[20].mxu1 %vm7300_vm9, %v4711_v32  ;;  %5191 = vmatmul.mubr.msk.f32.vlgmr.msra.gmra.mrb[20].mxu0 %vm7301_vm14, %v4715_v33  ;;  %vm7305_vm9 = vmmov %vm7304_vm3  ;;  %vm7306_vm14 = vcmask 97280  }
 0xe28   : > { %5560 = vmatpush3.bf16.msk.msra.mxu1 %vm6293_vm11, %v5543_v31  ;;  %5197 = vmatprep.mubr.msk.f32.mxu1 %vm7302_vm12, %v4712_v35  ;;  %vm7307_vm12 = vmmov %vm7306_vm14 }
 0xe2b   : > { %5198 = vmatmul.mubr.msk.f32.vlgmr.msra.gmra.mrb[22].mxu1 %vm7303_vm10, %v4713_v36  ;;  %vm7308_vm10 = vcmask 400384  }
 0xe2c   : > { %5214 = vmatprep.mubr.msk.f32.mxu0 %vm7308_vm10, %v4727_v14 }
 0xefa   : > { %v5185_v37 = vpop.f32.mrb[20].mxu1  ;;  %v5192_v38 = vpop.f32.mrb[20].mxu0 }
 0xefb   : > { %2675 = vrot.lane.b32.xlu1 %v5185_v37, %s6154_s8  ;;  %v2581_v39 = vpop.f32.mrb[21].mxu1  ;;  %v2662_v40 = vpop.f32.mrb[21].mxu0 }
 0xefc   : > { %2673 = vrot.lane.b32.xlu0 %v2581_v39, %s6154_s8 }
 0xefe   : > { %v5199_v42 = vpop.f32.mrb[22].mxu1 }
 0xeff   : > { %2681 = vrot.lane.b32.xlu1 %v5185_v37, %s6153_s7  ;;  %v2759_v44 = vpop.f32.mrb[23].mxu1 }
 0xf00   : > { %2679 = vrot.lane.b32.xlu0 %v2581_v39, %s6153_s7 }
 0xf03   : > { %2772 = vrot.lane.b32.xlu1 %v5192_v38, %s6156_s12 }
 0xf04   : > { %2770 = vrot.lane.b32.xlu0 %v2662_v40, %s6156_s12 }
 0xf07   : > { %2778 = vrot.lane.b32.xlu1 %v5192_v38, %s6155_s16 }
 0xf08   : > { %2776 = vrot.lane.b32.xlu0 %v2662_v40, %s6155_s16 }
 0xf6d   : > { %v2676_v45 = vpop.permute.xlu1 %2675 }
 0xf6e   : > { %v2674_v46 = vpop.permute.xlu0 %2673 }
 0xf71   : > { %v2682_v47 = vpop.permute.xlu1 %2681 }
 0xf72   : > { %v2680_v50 = vpop.permute.xlu0 %2679  ;;  %v2686_v52 = vsel %vm7304_vm3, %v2676_v45, %v2682_v47  ;;  %vm7309_vm3 = vmmov %vm7308_vm10 }
 0xf73   : > { %v2685_v54 = vsel %vm7305_vm9, %v2674_v46, %v2680_v50  ;;  %v2765_v55 = vadd.f32 %v5199_v42, %v2686_v52  ;;  %5231 = vmatprep.mubr.msk.f32.mxu1 %vm7309_vm3, %v4731_v15  ;;  %vm7310_vm9 = vcmask 105472  }
 0xf74   : > { %v2760_v57 = vadd.f32 %v2759_v44, %v2685_v54 }
 0xf75   : > { %v2773_v51 = vpop.permute.xlu1 %2772 }
 0xf76   : > { %v2771_v53 = vpop.permute.xlu0 %2770 }
 0xf79   : > { %v2779_v56 = vpop.permute.xlu1 %2778 }
 0xf7a   : > { %v2783_v58 = vsel %vm7306_vm14, %v2773_v51, %v2779_v56  ;;  %v2777_v59 = vpop.permute.xlu0 %2776  ;;  %vm7311_vm14 = vmmov %vm7310_vm9 }
 0xf7b   : > { %v2785_v60 = vadd.f32 %v2783_v58, %v2765_v55  ;;  %v2782_v61 = vsel %vm7307_vm12, %v2771_v53, %v2777_v59  ;;  %vm7312_vm12 = vcmask 7168  }
 0xf7c   : > { %v2784_v62 = vadd.f32 %v2782_v61, %v2760_v57  ;;  %vm7313_vm10 = vmmov %vm7312_vm12 }
 0xf7d   : > { %v4726_v63 = vmul.f32 -1.442695, %v2785_v60 }
 0xf7e   : > { %v4725_v0 = vmul.f32 -1.442695, %v2784_v62 }
 0xf7f   : > { %6045 = vpow2.f32 %v4726_v63  ;;  %v4732_v63 = vld [vmem:[%s7207_s1 + $0x178] sm:$0xff] }
 0xf80   : > { %6047 = vpow2.f32 %v4725_v0  ;;  %v4729_v0 = vld [vmem:[%s7207_s1 + $0x160] sm:$0xff] }
 0xf89   : > { %v6046_v1 = vpop.eup %6045 }
 0xf8a   : > { %v6048_v2 = vpop.eup %6047  ;;  %v2793_v3 = vadd.f32 1.0, %v6046_v1  ;;  %v4730_v1 = vld [vmem:[%s7207_s1 + $0x168] sm:$0xff] }
 0xf8b   : > { %v2792_v7 = vadd.f32 1.0, %v6048_v2 }
 0xf8c   : > { %6049 = vrcp.f32 %v2793_v3 }
 0xf8d   : > { %6051 = vrcp.f32 %v2792_v7 }
 0xf96   : > { %v6050_v8 = vpop.eup %6049 }
 0xf97   : > { %v6052_v9 = vpop.eup %6051  ;;  %v2799_v10 = vmul.f32 %v6050_v8, %v2785_v60 }
 0xf98   : > { %v2798_v11 = vmul.f32 %v6052_v9, %v2784_v62 }
 0xf9a   : > { %v5888_v12 = vpack.i.bf16 %v2799_v10, %v2798_v11  ;;  %v6870_v13 = vpack.c.bf16 %v2799_v10, %v2798_v11  ;;  %v3160_v11 = vld [vmem:[%s7210_s4] sm:$0xff] }
 0xf9c   : > { %5889 = vrot.lane.b32.xlu1 %v5888_v12, %s6148_s18  ;;  %5884 = vrot.lane.b32.xlu0 %v5888_v12, %s6149_s25  ;;  %s7350_s18 = smov 56   ;;  %s7351_s25 = smov 120  }
 0xfa0   : > { %5899 = vrot.lane.b32.xlu1 %v5888_v12, %s6132_s24  ;;  %5894 = vrot.lane.b32.xlu0 %v5888_v12, %s6129_s20 }
 0xfa4   : > { %5909 = vrot.lane.b32.xlu1 %v5888_v12, %s6150_s29  ;;  %5904 = vrot.lane.b32.xlu0 %v5888_v12, %s6151_s30 }
 0xfa8   : > { %5919 = vrot.lane.b32.xlu1 %v5888_v12, %s6128_s19  ;;  %5914 = vrot.lane.b32.xlu0 %v5888_v12, %s6131_s23  ;;  %v3161_v12 = vld [vmem:[%s7210_s4 + $0x8] sm:$0xff] }
0x100e   : > { %v5890_v18 = vpop.permute.xlu1 %5889  ;;  %v5885_v22 = vpop.permute.xlu0 %5884 }
0x100f   : > { %v5892_v23 = vunpack.i.h.bf16 %v5890_v18  ;;  %v5891_v24 = vunpack.i.l.bf16 %v5890_v18  ;;  %v5887_v26 = vunpack.i.h.bf16 %v5885_v22  ;;  %v5886_v27 = vunpack.i.l.bf16 %v5885_v22 }
0x1011   : > { %v2815_v33 = vsel %vm7310_vm9, %v5887_v26, %v5892_v23  ;;  %v2814_v35 = vsel %vm7311_vm14, %v5886_v27, %v5891_v24 }
0x1012   : > { %v5900_v28 = vpop.permute.xlu1 %5899  ;;  %v5895_v6 = vpop.permute.xlu0 %5894 }
0x1013   : > { %v5902_v29 = vunpack.i.h.bf16 %v5900_v28  ;;  %v5901_v30 = vunpack.i.l.bf16 %v5900_v28  ;;  %v5897_v31 = vunpack.i.h.bf16 %v5895_v6  ;;  %v5896_v32 = vunpack.i.l.bf16 %v5895_v6 }
0x1015   : > { %v2829_v36 = vsel %vm7312_vm12, %v5897_v31, %v5902_v29  ;;  %v2828_v37 = vsel %vm7313_vm10, %v5896_v32, %v5901_v30  ;;  %vm7320_vm12 = vcmask 400384  }
0x1016   : > { %v2830_v38 = vsel %vm6688_vm0, %v2814_v35, %v2828_v37  ;;  %v2831_v39 = vsel %vm6688_vm0, %v2815_v33, %v2829_v36  ;;  %v5910_v40 = vpop.permute.xlu1 %5909  ;;  %v5905_v42 = vpop.permute.xlu0 %5904  ;;  %vm7314_vm0 = vcmask 121856   ;;  %vm7321_vm10 = vmmov %vm7320_vm12 }
0x1017   : > { %v5561_v44 = vpack.c.bf16 %v2831_v39, %v2830_v38  ;;  %v5912_v45 = vunpack.i.h.bf16 %v5910_v40  ;;  %v5911_v46 = vunpack.i.l.bf16 %v5910_v40  ;;  %v5907_v47 = vunpack.i.h.bf16 %v5905_v42  ;;  %vm7315_vm3 = vmmov %vm7314_vm0 }
0x1018   : > { %v5906_v50 = vunpack.i.l.bf16 %v5905_v42 }
0x1019   : > { %5562 = vmatprep.subr.bf16.mxu0 %v5561_v44  ;;  %5574 = vmatprep.subr.bf16.mxu1 %v5561_v44  ;;  %v2845_v19 = vsel %vm1909_vm13, %v5907_v47, %v5912_v45 }
0x101a   : > { %v5920_v51 = vpop.permute.xlu1 %5919  ;;  %v5915_v52 = vpop.permute.xlu0 %5914  ;;  %5564 = vmatpush3.bf16.msra.mxu0 %v5561_v44  ;;  %5576 = vmatpush3.bf16.msra.mxu1 %v5561_v44  ;;  %v2844_v57 = vsel %vm1909_vm13, %v5906_v50, %v5911_v46  ;;  %vm7316_vm13 = vcmask 1040384  }
0x101b   : > { %v5922_v53 = vunpack.i.h.bf16 %v5920_v51  ;;  %v5921_v54 = vunpack.i.l.bf16 %v5920_v51  ;;  %v5917_v55 = vunpack.i.h.bf16 %v5915_v52  ;;  %v5916_v56 = vunpack.i.l.bf16 %v5915_v52  ;;  %5566 = vmatprep.subr.bf16.mxu0 %v6870_v13  ;;  %5578 = vmatprep.subr.bf16.mxu1 %v6870_v13  ;;  %vm7317_vm9 = vmmov %vm7316_vm13 }
0x101d   : > { %v2859_v58 = vsel %vm7314_vm0, %v5917_v55, %v5922_v53  ;;  %v2858_v59 = vsel %vm7315_vm3, %v5916_v56, %v5921_v54  ;;  %vm7322_vm0 = vmmov %vm7321_vm10 }
0x101e   : > { %v2860_v60 = vsel %vm6700_vm1, %v2844_v57, %v2858_v59  ;;  %v2861_v61 = vsel %vm6700_vm1, %v2845_v19, %v2859_v58  ;;  %5568 = vmatpush3.bf16.msra.mxu0 %v6870_v13  ;;  %5580 = vmatpush3.bf16.msra.mxu1 %v6870_v13  ;;  %vm7318_vm1 = vmmov %vm7317_vm9 }
0x101f   : > { %v5569_v62 = vpack.c.bf16 %v2861_v61, %v2860_v60  ;;  %vm7319_vm14 = vmmov %vm7318_vm1 }
0x1020   : > { %vm7323_vm3 = vmmov %vm7318_vm1 }
0x1021   : > { %5570 = vmatprep.subr.bf16.mxu0 %v5569_v62  ;;  %5582 = vmatprep.subr.bf16.mxu1 %v5569_v62 }
0x1022   : > { %5572 = vmatpush3.bf16.msra.mxu0 %v5569_v62  ;;  %5584 = vmatpush3.bf16.msra.mxu1 %v5569_v62 }
0x1023   : > { %5212 = vmatprep.subr.msk.mxu0 %vm7316_vm13, %v6136_v49  ;;  %5229 = vmatprep.subr.msk.mxu1 %vm7317_vm9, %v6136_v49  ;;  %vm7324_vm13 = vmmov %vm7318_vm1 }
0x1024   : > { %vm7325_vm9 = vmmov %vm7322_vm0 }
0x1026   : > { %5213 = vmatpush3.msk.msra.mxu0 %vm7318_vm1, %v6136_v49  ;;  %5230 = vmatpush3.msk.msra.mxu1 %vm7319_vm14, %v6136_v49  ;;  %vm7326_vm1 = vcmask 31744  }
0x1027   : > { %5215 = vmatmul.mubr.msk.f32.vlgmr.msra.gmra.mrb[22].mxu0 %vm7320_vm12, %v4728_v43  ;;  %5586 = vmatprep.subr.bf16.mxu0 %v5561_v44  ;;  %vm7327_vm14 = vmmov %vm7326_vm1  ;;  %vm7328_vm12 = vcmask 97280  }
0x1028   : > { %5588 = vmatpush3.bf16.msra.mxu0 %v5561_v44  ;;  %5232 = vmatmul.mubr.msk.f32.vlgmr.msra.gmra.mrb[24].mxu1 %vm7321_vm10, %v4732_v63  ;;  %vm7329_vm10 = vmmov %vm7328_vm12 }
0x1029   : > { %5590 = vmatprep.subr.bf16.mxu0 %v6870_v13  ;;  %5248 = vmatprep.mubr.msk.f32.mxu0 %vm7322_vm0, %v4729_v0  ;;  %vm7330_vm0 = vcmask 130048  }
0x102c   : > { %5592 = vmatpush3.bf16.msra.mxu0 %v6870_v13  ;;  %v5597_v13 = vpack.c.bf16 %v3161_v12, %v3160_v11 }
0x102d   : > { %5594 = vmatprep.subr.bf16.mxu0 %v5569_v62 }
0x102e   : > { %5598 = vmatprep.subr.bf16.mxu1 %v5597_v13 }
0x102f   : > { %5600 = vmatpush3.bf16.msra.mxu1 %v5597_v13 }
0x1030   : > { %5596 = vmatpush3.bf16.msra.mxu0 %v5569_v62  ;;  %5601 = vmatprep.subr.bf16.mxu1 %v6147_v5 }
0x1031   : > { %5246 = vmatprep.subr.msk.mxu0 %vm7323_vm3, %v6136_v49  ;;  %vm7331_vm3 = vmmov %vm7330_vm0 }
0x1034   : > { %5247 = vmatpush3.msk.msra.mxu0 %vm7324_vm13, %v6136_v49  ;;  %vm7334_vm13 = vcmask 465920  }
0x1035   : > { %5249 = vmatmul.mubr.msk.f32.vlgmr.msra.gmra.mrb[24].mxu0 %vm7325_vm9, %v4730_v1  ;;  %5610 = vmatprep.subr.bf16.mxu0 %v6147_v5  ;;  %vm7335_vm9 = vmmov %vm7334_vm13 }
0x1036   : > { %5289 = vmatprep.mubr.msk.f32.mxu0 %vm7289_vm15, %v6130_v4 }
0x10fa   : > { %v5216_v2 = vpop.f32.mrb[22].mxu0 }
0x10fb   : > { %3041 = vrot.lane.b32.xlu1 %v5216_v2, %s6153_s7  ;;  %3035 = vrot.lane.b32.xlu0 %v5216_v2, %s6154_s8  ;;  %v2941_v3 = vpop.f32.mrb[23].mxu0  ;;  %v5233_v7 = vpop.f32.mrb[24].mxu1 }
0x10fc   : > { %v3022_v8 = vpop.f32.mrb[25].mxu1 }
0x10ff   : > { %3039 = vrot.lane.b32.xlu1 %v2941_v3, %s6153_s7  ;;  %3033 = vrot.lane.b32.xlu0 %v2941_v3, %s6154_s8  ;;  %s7333_s7 = smov 63  }
0x1103   : > { %3136 = vrot.lane.b32.xlu1 %v3022_v8, %s6155_s16  ;;  %3130 = vrot.lane.b32.xlu0 %v3022_v8, %s6156_s12 }
0x1107   : > { %3138 = vrot.lane.b32.xlu1 %v5233_v7, %s6155_s16  ;;  %3132 = vrot.lane.b32.xlu0 %v5233_v7, %s6156_s12  ;;  %s7332_s16 = smov 71  }
0x1108   : > { %v5250_v9 = vpop.f32.mrb[24].mxu0 }
0x1109   : > { %v3119_v10 = vpop.f32.mrb[25].mxu0 }
0x116d   : > { %v3042_v14 = vpop.permute.xlu1 %3041  ;;  %v3036_v15 = vpop.permute.xlu0 %3035 }
0x116e   : > { %v3046_v28 = vsel %vm7327_vm14, %v3036_v15, %v3042_v14 }
0x116f   : > { %v3125_v30 = vadd.f32 %v5250_v9, %v3046_v28 }
0x1171   : > { %v3040_v18 = vpop.permute.xlu1 %3039  ;;  %v3034_v22 = vpop.permute.xlu0 %3033 }
0x1172   : > { %v3045_v23 = vsel %vm7326_vm1, %v3034_v22, %v3040_v18  ;;  %vm7336_vm1 = vcmask 7168  }
0x1173   : > { %v3120_v24 = vadd.f32 %v3119_v10, %v3045_v23  ;;  %vm7337_vm14 = vmmov %vm7336_vm1 }
0x1175   : > { %v3137_v26 = vpop.permute.xlu1 %3136  ;;  %v3131_v27 = vpop.permute.xlu0 %3130 }
0x1176   : > { %v3142_v6 = vsel %vm7328_vm12, %v3131_v27, %v3137_v26  ;;  %vm7338_vm12 = vcmask 56320  }
0x1177   : > { %v3144_v29 = vadd.f32 %v3142_v6, %v3120_v24 }
0x1179   : > { %v4742_v31 = vmul.f32 -1.442695, %v3144_v29  ;;  %v3139_v32 = vpop.permute.xlu1 %3138  ;;  %v3133_v33 = vpop.permute.xlu0 %3132 }
0x117a   : > { %v3143_v35 = vsel %vm7329_vm10, %v3133_v33, %v3139_v32  ;;  %vm7339_vm10 = vmmov %vm7338_vm12 }
0x117b   : > { %6053 = vpow2.f32 %v4742_v31  ;;  %v3145_v36 = vadd.f32 %v3143_v35, %v3125_v30  ;;  %v4746_v35 = vld [vmem:[%s7207_s1 + $0x180] sm:$0xff] }
0x117d   : > { %v4743_v37 = vmul.f32 -1.442695, %v3145_v36 }
0x117f   : > { %6055 = vpow2.f32 %v4743_v37  ;;  %v4747_v37 = vld [vmem:[%s7207_s1 + $0x190] sm:$0xff] }
0x1185   : > { %v6054_v38 = vpop.eup %6053 }
0x1186   : > { %v3152_v39 = vadd.f32 1.0, %v6054_v38 }
0x1188   : > { %6057 = vrcp.f32 %v3152_v39 }
0x1189   : > { %v6056_v40 = vpop.eup %6055 }
0x118a   : > { %v3153_v42 = vadd.f32 1.0, %v6056_v40 }
0x118c   : > { %6059 = vrcp.f32 %v3153_v42 }
0x1192   : > { %v6058_v44 = vpop.eup %6057 }
0x1193   : > { %v3158_v45 = vmul.f32 %v6058_v44, %v3144_v29 }
0x1195   : > { %5255 = vmatprep.mubr.msk.f32.mxu1 %vm7330_vm0, %v3158_v45  ;;  %vm7340_vm0 = vcmask 515072  }
0x1196   : > { %v6060_v46 = vpop.eup %6059 }
0x1197   : > { %v3159_v47 = vmul.f32 %v6060_v46, %v3145_v36  ;;  %v4748_v36 = vld [vmem:[%s7207_s1 + $0x1a0] sm:$0xff] }
0x1199   : > { %5256 = vmatmul.mubr.msk.f32.vlgmr.msra.gmra.mrb[26].mxu1 %vm7331_vm3, %v3159_v47  ;;  %vm7341_vm3 = vmmov %vm7340_vm0 }
0x119a   : > { %5272 = vmatprep.mubr.msk.f32.mxu1 %vm7289_vm15, %v6130_v4 }
0x126c   : > { %v5257_v50 = vpop.f32.mrb[26].mxu1 }
0x126d   : > { %v3234_v51 = vpop.f32.mrb[27].mxu1 }
0x126e   : > { %v5928_v52 = vpack.i.bf16 %v5257_v50, %v3234_v51  ;;  %v6964_v53 = vpack.c.bf16 %v5257_v50, %v3234_v51 }
0x1270   : > { %5929 = vrot.lane.b32.xlu1 %v5928_v52, %s6137_s26  ;;  %5924 = vrot.lane.b32.xlu0 %v5928_v52, %s6138_s27 }
0x1274   : > { %5939 = vrot.lane.b32.xlu1 %v5928_v52, %s6132_s24  ;;  %5934 = vrot.lane.b32.xlu0 %v5928_v52, %s6139_s28 }
0x1278   : > { %5949 = vrot.lane.b32.xlu1 %v5928_v52, %s6140_s9  ;;  %5944 = vrot.lane.b32.xlu0 %v5928_v52, %s7332_s16 }
0x127c   : > { %5959 = vrot.lane.b32.xlu1 %v5928_v52, %s7333_s7  ;;  %5954 = vrot.lane.b32.xlu0 %v5928_v52, %s6131_s23 }
0x12e2   : > { %v5930_v54 = vpop.permute.xlu1 %5929  ;;  %v5925_v55 = vpop.permute.xlu0 %5924 }
0x12e3   : > { %v5932_v56 = vunpack.i.h.bf16 %v5930_v54  ;;  %v5931_v19 = vunpack.i.l.bf16 %v5930_v54  ;;  %v5927_v57 = vunpack.i.h.bf16 %v5925_v55  ;;  %v5926_v58 = vunpack.i.l.bf16 %v5925_v55 }
0x12e5   : > { %v3258_v0 = vsel %vm7334_vm13, %v5927_v57, %v5932_v56  ;;  %v3257_v1 = vsel %vm7335_vm9, %v5926_v58, %v5931_v19  ;;  %vm7342_vm13 = vcmask 1040384  }
0x12e6   : > { %v5940_v59 = vpop.permute.xlu1 %5939  ;;  %v5935_v60 = vpop.permute.xlu0 %5934  ;;  %vm7343_vm9 = vmmov %vm7342_vm13 }
0x12e7   : > { %v5942_v61 = vunpack.i.h.bf16 %v5940_v59  ;;  %v5941_v62 = vunpack.i.l.bf16 %v5940_v59  ;;  %v5937_v43 = vunpack.i.h.bf16 %v5935_v60  ;;  %v5936_v63 = vunpack.i.l.bf16 %v5935_v60 }
0x12e9   : > { %v3272_v2 = vsel %vm7336_vm1, %v5937_v43, %v5942_v61  ;;  %v3271_v3 = vsel %vm7337_vm14, %v5936_v63, %v5941_v62  ;;  %vm7344_vm1 = vcmask 400384  }
0x12ea   : > { %v5950_v7 = vpop.permute.xlu1 %5949  ;;  %v5945_v8 = vpop.permute.xlu0 %5944  ;;  %v3273_v9 = vsel %vm6504_vm2, %v3257_v1, %v3271_v3  ;;  %v3274_v10 = vsel %vm6504_vm2, %v3258_v0, %v3272_v2  ;;  %vm7345_vm14 = vmmov %vm7344_vm1 }
0x12eb   : > { %v5602_v11 = vpack.c.bf16 %v3274_v10, %v3273_v9  ;;  %v5952_v12 = vunpack.i.h.bf16 %v5950_v7  ;;  %v5951_v13 = vunpack.i.l.bf16 %v5950_v7  ;;  %v5947_v14 = vunpack.i.h.bf16 %v5945_v8 }
0x12ec   : > { %v5946_v15 = vunpack.i.l.bf16 %v5945_v8 }
0x12ed   : > { %5603 = vmatpush3.bf16.msra.mxu1 %v5602_v11  ;;  %5612 = vmatpush3.bf16.msra.mxu0 %v5602_v11  ;;  %v3288_v28 = vsel %vm7338_vm12, %v5947_v14, %v5952_v12  ;;  %vm7346_vm12 = vmmov %vm7343_vm9  ;;  %v4758_v14 = vld [vmem:[%s7207_s1 + $0x1d0] sm:$0xff] }
0x12ee   : > { %v5960_v18 = vpop.permute.xlu1 %5959  ;;  %v5955_v22 = vpop.permute.xlu0 %5954  ;;  %5604 = vmatprep.subr.bf16.mxu1 %v6147_v5  ;;  %5613 = vmatprep.subr.bf16.mxu0 %v6147_v5  ;;  %v3287_v6 = vsel %vm7339_vm10, %v5946_v15, %v5951_v13  ;;  %vm7347_vm10 = vmmov %vm7344_vm1  ;;  %v4756_v13 = vld [vmem:[%s7207_s1 + $0x1b0] sm:$0xff] }
0x12ef   : > { %v5962_v23 = vunpack.i.h.bf16 %v5960_v18  ;;  %v5961_v24 = vunpack.i.l.bf16 %v5960_v18  ;;  %v5957_v26 = vunpack.i.h.bf16 %v5955_v22  ;;  %v5956_v27 = vunpack.i.l.bf16 %v5955_v22 }
0x12f1   : > { %v3302_v29 = vsel %vm7340_vm0, %v5957_v26, %v5962_v23  ;;  %v3301_v30 = vsel %vm7341_vm3, %v5956_v27, %v5961_v24  ;;  %5606 = vmatpush3.bf16.msra.mxu1 %v6964_v53  ;;  %5615 = vmatpush3.bf16.msra.mxu0 %v6964_v53  ;;  %vm7352_vm0 = vcmask 64512   ;;  %vm7353_vm3 = vcmask 457728   ;;  %v3831_v23 = vld [vmem:[#allocation2 + $0x8] sm:$0xff]  ;;  %v3833_v24 = vld [vmem:[#allocation2 + $0x18] sm:$0xff]  ;;  %v3830_v27 = vld [vmem:[#allocation2] sm:$0xff] }
0x12f2   : > { %v3303_v31 = vsel %vm6512_vm4, %v3287_v6, %v3301_v30  ;;  %v3304_v32 = vsel %vm6512_vm4, %v3288_v28, %v3302_v29  ;;  %5607 = vmatprep.subr.bf16.mxu1 %v6147_v5  ;;  %5616 = vmatprep.subr.bf16.mxu0 %v6147_v5  ;;  %v5649_v26 = vpack.c.bf16 %v3833_v24, %v3831_v23  ;;  %v3832_v28 = vld [vmem:[#allocation2 + $0x10] sm:$0xff] }
0x12f3   : > { %v5608_v33 = vpack.c.bf16 %v3304_v32, %v3303_v31  ;;  %v5651_v6 = vpack.c.bf16 %v3832_v28, %v3830_v27  ;;  %v3835_v31 = vld [vmem:[#allocation2 + $0x28] sm:$0xff]  ;;  %v3837_v32 = vld [vmem:[#allocation2 + $0x38] sm:$0xff] }
0x12f5   : > { %5609 = vmatpush3.bf16.msra.mxu1 %v5608_v33  ;;  %5618 = vmatpush3.bf16.msra.mxu0 %v5608_v33 }
0x12f6   : > { %5270 = vmatprep.subr.mxu1 %v6130_v4  ;;  %5287 = vmatprep.subr.mxu0 %v6130_v4 }
0x12f9   : > { %5271 = vmatpush3.msk.msra.mxu1 %vm7342_vm13, %v6136_v49  ;;  %5288 = vmatpush3.msk.msra.mxu0 %vm7343_vm9, %v6136_v49  ;;  %vm7354_vm13 = vcmask 465920   ;;  %vm7355_vm9 = vcmask 7168  }
0x12fa   : > { %5273 = vmatmul.mubr.msk.f32.vlgmr.msra.gmra.mrb[28].mxu1 %vm7344_vm1, %v4746_v35  ;;  %5619 = vmatprep.subr.bf16.mxu1 %v6147_v5  ;;  %vm7356_vm1 = vcmask 56320   ;;  %v3834_v35 = vld [vmem:[#allocation2 + $0x20] sm:$0xff] }
0x12fb   : > { %5621 = vmatpush3.bf16.msra.mxu1 %v5602_v11  ;;  %5290 = vmatmul.mubr.msk.f32.vlgmr.msra.gmra.mrb[26].mxu0 %vm7345_vm14, %v4748_v36  ;;  %vm7357_vm14 = vcmask 515072   ;;  %v3836_v36 = vld [vmem:[#allocation2 + $0x30] sm:$0xff] }
0x12fc   : > { %5622 = vmatprep.subr.bf16.mxu1 %v6147_v5  ;;  %5306 = vmatprep.mubr.msk.f32.mxu1 %vm7289_vm15, %v6130_v4 }
0x12fd   : > { %5628 = vmatprep.subr.bf16.mxu0 %v6147_v5  ;;  %5317 = vmatprep.mubr.msk.f32.mxu0 %vm7289_vm15, %v6130_v4 }
0x12ff   : > { %5624 = vmatpush3.bf16.msra.mxu1 %v6964_v53 }
0x1300   : > { %5625 = vmatprep.subr.bf16.mxu1 %v6147_v5 }
0x1303   : > { %5627 = vmatpush3.bf16.msra.mxu1 %v5608_v33  ;;  %v5653_v33 = vpack.c.bf16 %v3837_v32, %v3835_v31 }
0x1304   : > { %5304 = vmatprep.subr.mxu1 %v6130_v4 }
0x1307   : > { %5305 = vmatpush3.msk.msra.mxu1 %vm7346_vm12, %v6136_v49 }
0x1308   : > { %5307 = vmatmul.mubr.msk.f32.vlgmr.msra.gmra.mrb[30].mxu1 %vm7347_vm10, %v4747_v37  ;;  %5635 = vmatprep.subr.bf16.mxu1 %v6147_v5  ;;  %v5655_v37 = vpack.c.bf16 %v3836_v36, %v3834_v35  ;;  %vm7362_vm10 = vmmov %vm7353_vm3 }
0x1309   : > { %5328 = vmatprep.mubr.msk.f32.mxu1 %vm7289_vm15, %v6130_v4 }
0x13cd   : > { %v3378_v38 = vpop.f32.mrb[28].mxu1 }
0x13ce   : > { %3459 = vrot.lane.b32.xlu1 %v3378_v38, %s7348_s10  ;;  %3456 = vrot.lane.b32.xlu0 %v3378_v38, %s7349_s11  ;;  %v5274_v39 = vpop.f32.mrb[29].mxu1  ;;  %v3451_v40 = vpop.f32.mrb[26].mxu0  ;;  %v3839_v38 = vld [vmem:[#allocation2 + $0x48] sm:$0xff] }
0x13cf   : > { %v5291_v42 = vpop.f32.mrb[27].mxu0  ;;  %v3841_v39 = vld [vmem:[#allocation2 + $0x58] sm:$0xff] }
0x13d0   : > { %v3838_v42 = vld [vmem:[#allocation2 + $0x40] sm:$0xff] }
0x13d2   : > { %3540 = vrot.lane.b32.xlu1 %v3451_v40, %s7350_s18  ;;  %3537 = vrot.lane.b32.xlu0 %v3451_v40, %s7351_s25  ;;  %v5657_v40 = vpack.c.bf16 %v3841_v39, %v3839_v38  ;;  %v4767_v39 = vld [vmem:[%s7207_s1 + $0x1e0] sm:$0xff] }
0x13db   : > { %v3532_v44 = vpop.f32.mrb[30].mxu1 }
0x13dc   : > { %v5308_v45 = vpop.f32.mrb[31].mxu1 }
0x1440   : > { %v3460_v46 = vpop.permute.xlu1 %3459  ;;  %v3457_v47 = vpop.permute.xlu0 %3456 }
0x1441   : > { %v3462_v50 = vsel %vm7352_vm0, %v3457_v47, %v3460_v46  ;;  %v3843_v46 = vld [vmem:[#allocation2 + $0x68] sm:$0xff]  ;;  %v3845_v47 = vld [vmem:[#allocation2 + $0x78] sm:$0xff] }
0x1442   : > { %v3533_v51 = vadd.f32 %v3532_v44, %v3462_v50  ;;  %v3840_v44 = vld [vmem:[#allocation2 + $0x50] sm:$0xff]  ;;  %v5661_v50 = vpack.c.bf16 %v3845_v47, %v3843_v46 }
0x1443   : > { %v5659_v45 = vpack.c.bf16 %v3840_v44, %v3838_v42 }
0x1444   : > { %v3541_v52 = vpop.permute.xlu1 %3540  ;;  %v3538_v53 = vpop.permute.xlu0 %3537 }
0x1445   : > { %v3543_v54 = vsel %vm7353_vm3, %v3538_v53, %v3541_v52  ;;  %v3844_v52 = vld [vmem:[#allocation2 + $0x70] sm:$0xff]  ;;  %vm7364_vm3 = vmmov %vm7355_vm9 }
0x1446   : > { %v3544_v55 = vadd.f32 %v3543_v54, %v3533_v51  ;;  %v3842_v51 = vld [vmem:[#allocation2 + $0x60] sm:$0xff] }
0x1447   : > { %v5663_v53 = vpack.c.bf16 %v3844_v52, %v3842_v51 }
0x1448   : > { %v4755_v56 = vmul.f32 -1.442695, %v3544_v55 }
0x144a   : > { %6061 = vpow2.f32 %v4755_v56 }
0x1454   : > { %v6062_v19 = vpop.eup %6061 }
0x1455   : > { %v3548_v57 = vadd.f32 1.0, %v6062_v19 }
0x1457   : > { %6063 = vrcp.f32 %v3548_v57 }
0x1461   : > { %v6064_v58 = vpop.eup %6063 }
0x1462   : > { %v3551_v59 = vmul.f32 %v6064_v58, %v3544_v55 }
0x1464   : > { %3556 = vrot.lane.b32.xlu1 %v3551_v59, %s6137_s26  ;;  %3553 = vrot.lane.b32.xlu0 %v3551_v59, %s6138_s27 }
0x1468   : > { %3563 = vrot.lane.b32.xlu1 %v3551_v59, %s6132_s24  ;;  %3560 = vrot.lane.b32.xlu0 %v3551_v59, %s6139_s28 }
0x146c   : > { %3571 = vrot.lane.b32.xlu1 %v3551_v59, %s6140_s9  ;;  %3568 = vrot.lane.b32.xlu0 %v3551_v59, %s7332_s16 }
0x1470   : > { %3578 = vrot.lane.b32.xlu1 %v3551_v59, %s7333_s7  ;;  %3575 = vrot.lane.b32.xlu0 %v3551_v59, %s6131_s23 }
0x14d6   : > { %v3557_v60 = vpop.permute.xlu1 %3556  ;;  %v3554_v61 = vpop.permute.xlu0 %3553 }
0x14d7   : > { %v3559_v63 = vsel %vm7354_vm13, %v3554_v61, %v3557_v60  ;;  %vm7365_vm13 = vmmov %vm7364_vm3 }
0x14da   : > { %v3564_v62 = vpop.permute.xlu1 %3563  ;;  %v3561_v43 = vpop.permute.xlu0 %3560 }
0x14db   : > { %v3566_v0 = vsel %vm7355_vm9, %v3561_v43, %v3564_v62  ;;  %vm7366_vm9 = vcmask 924672  }
0x14dc   : > { %v3567_v1 = vsel %vm6504_vm2, %v3559_v63, %v3566_v0  ;;  %vm7358_vm2 = vcmask 203776  }
0x14dd   : > { %v5629_v2 = vpack.c.bf16 %v3551_v59, %v3567_v1  ;;  %vm7360_vm12 = vmmov %vm7358_vm2 }
0x14de   : > { %v3572_v3 = vpop.permute.xlu1 %3571  ;;  %v3569_v7 = vpop.permute.xlu0 %3568 }
0x14df   : > { %5630 = vmatpush3.bf16.msra.mxu0 %v5629_v2  ;;  %5637 = vmatpush3.bf16.msra.mxu1 %v5629_v2  ;;  %v3574_v10 = vsel %vm7356_vm1, %v3569_v7, %v3572_v3  ;;  %vm7367_vm1 = vmmov %vm7366_vm9 }
0x14e0   : > { %5631 = vmatprep.subr.bf16.mxu0 %v6147_v5  ;;  %5638 = vmatprep.subr.bf16.mxu1 %v6147_v5 }
0x14e2   : > { %v3579_v8 = vpop.permute.xlu1 %3578  ;;  %v3576_v9 = vpop.permute.xlu0 %3575 }
0x14e3   : > { %v3581_v11 = vsel %vm7357_vm14, %v3576_v9, %v3579_v8  ;;  %vm7368_vm14 = vcmask 1039360  }
0x14e4   : > { %v3582_v12 = vsel %vm6512_vm4, %v3574_v10, %v3581_v11  ;;  %vm7359_vm4 = vmmov %vm7358_vm2 }
0x14e5   : > { %v5632_v25 = vpack.c.bf16 %v6136_v49, %v3582_v12 }
0x14e7   : > { %5634 = vmatpush3.bf16.msk.msra.mxu0 %vm6356_vm5, %v5632_v25  ;;  %5641 = vmatpush3.bf16.msk.msra.mxu1 %vm6356_vm5, %v5632_v25 }
0x14e8   : > { %5642 = vmatprep.subr.bf16.mxu0 %v6147_v5  ;;  %5650 = vmatprep.subr.bf16.mxu1 %v5649_v26 }
0x14ea   : > { %5318 = vmatmul.mubr.msk.f32.vlgmr.msra.gmra.mrb[28].mxu0 %vm7358_vm2, %v4756_v13  ;;  %5329 = vmatmul.mubr.msk.f32.vlgmr.msra.gmra.mrb[32].mxu1 %vm7359_vm4, %v4758_v14  ;;  %vm7369_vm2 = vmmov %vm7368_vm14  ;;  %vm7370_vm4 = vcmask 121856  }
0x14eb   : > { %5644 = vmatpush3.bf16.msra.mxu0 %v5629_v2  ;;  %5339 = vmatprep.mubr.msk.f32.mxu0 %vm7289_vm15, %v6130_v4  ;;  %vm7361_vm15 = vmmov %vm7352_vm0  ;;  %vm7363_vm0 = vcmask 523264  }
0x14ec   : > { %5645 = vmatprep.subr.bf16.mxu0 %v6147_v5  ;;  %3913 = vmatprep.mubr.f32.mxu1 %v6130_v4 }
0x14ed   : > { %5652 = vmatpush1.bf16.msra.mxu1 %v5651_v6 }
0x14ee   : > { %5654 = vmatprep.subr.bf16.mxu1 %v5653_v33 }
0x14ef   : > { %5648 = vmatpush3.bf16.msk.msra.mxu0 %vm6356_vm5, %v5632_v25 }
0x14f1   : > { %5656 = vmatpush1.bf16.msra.mxu1 %v5655_v37 }
0x14f2   : > { %5340 = vmatmul.mubr.msk.f32.vlgmr.msra.gmra.mrb[30].mxu0 %vm7360_vm12, %v4757_v34  ;;  %5658 = vmatprep.subr.bf16.mxu1 %v5657_v40  ;;  %vm7371_vm12 = vmmov %vm7370_vm4  ;;  %v4769_v40 = vld [vmem:[%s7207_s1 + $0x200] sm:$0xff] }
0x14f3   : > { %4033 = vmatprep.mubr.f32.mxu0 %v6130_v4 }
0x14f5   : > { %5660 = vmatpush1.bf16.msra.mxu1 %v5659_v45 }
0x14f6   : > { %5662 = vmatprep.subr.bf16.mxu1 %v5661_v50 }
0x14f9   : > { %5664 = vmatpush1.bf16.msra.mxu1 %v5663_v53 }
0x15bd   : > { %v3656_v15 = vpop.f32.mrb[28].mxu0  ;;  %v3729_v18 = vpop.f32.mrb[32].mxu1 }
0x15be   : > { %3737 = vrot.lane.b32.xlu1 %v3656_v15, %s7348_s10  ;;  %3734 = vrot.lane.b32.xlu0 %v3656_v15, %s7349_s11  ;;  %v5319_v5 = vpop.f32.mrb[29].mxu0  ;;  %v5330_v22 = vpop.f32.mrb[33].mxu1 }
0x15c2   : > { %3818 = vrot.lane.b32.xlu1 %v3729_v18, %s7350_s18  ;;  %3815 = vrot.lane.b32.xlu0 %v3729_v18, %s7351_s25  ;;  %s7401_s18 = sshll.u32 %s7403_s22, 3 }
0x15c3   : > { %s266_s27 = scalar_lea.vmem %s7212_s6, %s7401_s18 }
0x15c5   : > { %v3810_v29 = vpop.f32.mrb[30].mxu0 }
0x15c6   : > { %v5341_v30 = vpop.f32.mrb[31].mxu0 }
0x1630   : > { %v3738_v54 = vpop.permute.xlu1 %3737  ;;  %v3735_v55 = vpop.permute.xlu0 %3734 }
0x1631   : > { %v3740_v56 = vsel %vm7361_vm15, %v3735_v55, %v3738_v54  ;;  %vm7372_vm15 = vnez %v7267_v21  ;;  %v4782_v21 = vld [vmem:[%s7207_s1 + $0x220] sm:$0xff] }
0x1632   : > { %v3811_v19 = vadd.f32 %v3810_v29, %v3740_v56 }
0x1634   : > { %v3819_v57 = vpop.permute.xlu1 %3818  ;;  %v3816_v58 = vpop.permute.xlu0 %3815 }
0x1635   : > { %v3821_v59 = vsel %vm7362_vm10, %v3816_v58, %v3819_v57  ;;  %vm7373_vm10 = vcmask 203776  }
0x1636   : > { %v3822_v60 = vadd.f32 %v3821_v59, %v3811_v19 }
0x1638   : > { %v4765_v61 = vmul.f32 -1.442695, %v3822_v60 }
0x163a   : > { %6065 = vpow2.f32 %v4765_v61 }
0x1644   : > { %v6066_v62 = vpop.eup %6065 }
0x1645   : > { %v3826_v43 = vadd.f32 1.0, %v6066_v62 }
0x1647   : > { %6067 = vrcp.f32 %v3826_v43 }
0x1651   : > { %v6068_v63 = vpop.eup %6067 }
0x1652   : > { %v3829_v0 = vmul.f32 %v6068_v63, %v3822_v60 }
0x1654   : > { %4766 = vmatmul.mubr.msk.f32.vlgmr.msra.gmra.mrb[34].mxu1 %vm7363_vm0, %v3829_v0  ;;  %vm7374_vm0 = vmmov %vm7373_vm10 }
0x1655   : > { %4192 = vmatprep.mubr.f32.mxu1 %v6130_v4 }
0x1727   : > { %v3915_v1 = vpop.f32.mrb[34].mxu1 }
0x1728   : > { %v3917_v2 = vpop.f32.mrb[35].mxu1 }
0x1729   : > { %v5968_v3 = vpack.i.bf16 %v3915_v1, %v3917_v2  ;;  %v5963_v7 = vpack.i.bf16 %v3917_v2, %v3915_v1 }
0x172b   : > { %5969 = vrot.lane.b32.xlu1 %v5968_v3, %s6132_s24  ;;  %5964 = vrot.lane.b32.xlu0 %v5963_v7, %s6129_s20 }
0x172f   : > { %5979 = vrot.lane.b32.xlu1 %v5963_v7, %s6131_s23  ;;  %5974 = vrot.lane.b32.xlu0 %v5968_v3, %s6128_s19 }
0x179d   : > { %v5970_v8 = vpop.permute.xlu1 %5969  ;;  %v5965_v9 = vpop.permute.xlu0 %5964 }
0x179e   : > { %v5972_v10 = vunpack.i.h.bf16 %v5970_v8  ;;  %v5971_v11 = vunpack.i.l.bf16 %v5970_v8  ;;  %v5967_v12 = vunpack.i.h.bf16 %v5965_v9  ;;  %v5966_v25 = vunpack.i.l.bf16 %v5965_v9 }
0x17a0   : > { %v3936_v13 = vsel %vm7364_vm3, %v5972_v10, %v5971_v11  ;;  %v3939_v14 = vsel %vm7365_vm13, %v5971_v11, %v5972_v10  ;;  %v3926_v34 = vsel %vm7366_vm9, %v5966_v25, %v5967_v12  ;;  %v3930_v15 = vsel %vm7367_vm1, %v5967_v12, %v5966_v25  ;;  %vm7375_vm3 = vmmov %vm7374_vm0 }
0x17a1   : > { %v5980_v18 = vpop.permute.xlu1 %5979  ;;  %v5975_v5 = vpop.permute.xlu0 %5974  ;;  %v3941_v22 = vsel %vm6265_vm8, %v3930_v15, %v3936_v13  ;;  %v3940_v23 = vsel %vm6257_vm6, %v3926_v34, %v3939_v14  ;;  %vm7380_vm9 = vcmask 916480  }
0x17a2   : > { %v5982_v24 = vunpack.i.h.bf16 %v5980_v18  ;;  %v5981_v26 = vunpack.i.l.bf16 %v5980_v18  ;;  %v5977_v27 = vunpack.i.h.bf16 %v5975_v5  ;;  %v5976_v28 = vunpack.i.l.bf16 %v5975_v5  ;;  %vm7381_vm1 = vmmov %vm7380_vm9 }
0x17a3   : > { %v5665_v6 = vpack.c.bf16 %v3917_v2, %v3941_v22  ;;  %v5667_v29 = vpack.c.bf16 %v3915_v1, %v3940_v23 }
0x17a4   : > { %v3955_v30 = vsel %vm7368_vm14, %v5981_v26, %v5982_v24  ;;  %v3959_v31 = vsel %vm7369_vm2, %v5982_v24, %v5981_v26  ;;  %v3947_v32 = vsel %vm7370_vm4, %v5977_v27, %v5976_v28  ;;  %v3950_v33 = vsel %vm7371_vm12, %v5976_v28, %v5977_v27 }
0x17a5   : > { %v3960_v35 = vsel %vm6261_vm7, %v3950_v33, %v3955_v30  ;;  %5666 = vmatprep.subr.bf16.mxu0 %v5665_v6  ;;  %5686 = vmatprep.subr.bf16.mxu1 %v5665_v6  ;;  %v3961_v36 = vsel %vm7372_vm15, %v3947_v32, %v3959_v31  ;;  %vm7382_vm14 = vcmask 7168   ;;  %vm7384_vm4 = vcmask 924672  }
0x17a6   : > { %v5672_v37 = vpack.c.bf16 %v6136_v49, %v3960_v35  ;;  %5668 = vmatpush1.bf16.msra.mxu0 %v5667_v29  ;;  %5688 = vmatpush1.bf16.msra.mxu1 %v5667_v29  ;;  %v5669_v38 = vpack.c.bf16 %v6136_v49, %v3961_v36  ;;  %v4768_v49 = vld [vmem:[%s7207_s1 + $0x1f0] sm:$0xff]  ;;  %vm7383_vm2 = vmmov %vm7382_vm14 }
0x17a7   : > { %vm7385_vm12 = vmmov %vm7384_vm4 }
0x17a8   : > { %5671 = vmatprep.subr.msk.bf16.mxu0 %vm6356_vm5, %v5669_v38  ;;  %5691 = vmatprep.subr.msk.bf16.mxu1 %vm6356_vm5, %v5669_v38 }
0x17aa   : > { %5674 = vmatpush1.bf16.msk.msra.mxu0 %vm6356_vm5, %v5672_v37  ;;  %5694 = vmatpush1.bf16.msk.msra.mxu1 %vm6356_vm5, %v5672_v37 }
0x17ab   : > { %5676 = vmatprep.subr.bf16.mxu0 %v5665_v6 }
0x17ad   : > { %4772 = vmatmul.mubr.msk.f32.vlgmr.msra.gmra.mrb[32].mxu0 %vm7373_vm10, %v4767_v39  ;;  %4778 = vmatmul.mubr.msk.f32.vlgmr.msra.gmra.mrb[36].mxu1 %vm7374_vm0, %v4768_v49  ;;  %vm7386_vm10 = vcmask 1039360  }
0x17ae   : > { %5678 = vmatpush1.bf16.msra.mxu0 %v5667_v29  ;;  %4107 = vmatprep.mubr.f32.mxu0 %v6130_v4  ;;  %vm7387_vm0 = vmmov %vm7386_vm10 }
0x17af   : > { %5681 = vmatprep.subr.msk.bf16.mxu0 %vm6356_vm5, %v5669_v38  ;;  %4512 = vmatprep.mubr.f32.mxu1 %v6130_v4 }
0x17b2   : > { %5684 = vmatpush1.bf16.msk.msra.mxu0 %vm6356_vm5, %v5672_v37  ;;  %vm7378_vm5 = vcmask 130048  }
0x17b3   : > { %vm7379_vm13 = vmmov %vm7378_vm5 }
0x17b5   : > { %4775 = vmatmul.mubr.msk.f32.vlgmr.msra.gmra.mrb[34].mxu0 %vm7375_vm3, %v4769_v40  ;;  %vm7388_vm3 = vcmask 121856  }
0x17b6   : > { %4353 = vmatprep.mubr.f32.mxu0 %v6130_v4 }
0x1880   : > { %v4035_v42 = vpop.f32.mrb[32].mxu0  ;;  %v4194_v44 = vpop.f32.mrb[36].mxu1 }
0x1881   : > { %v4037_v45 = vpop.f32.mrb[33].mxu0  ;;  %4119 = vrot.lane.b32.xlu1 %v4035_v42, %s7376_s13  ;;  %v4196_v46 = vpop.f32.mrb[37].mxu1 }
0x1882   : > { %4115 = vrot.lane.b32.xlu0 %v4037_v45, %s7376_s13  ;;  %v4783_v45 = vld [vmem:[%s7207_s1 + $0x230] sm:$0xff] }
0x1888   : > { %v4109_v47 = vpop.f32.mrb[34].mxu0 }
0x1889   : > { %4201 = vrot.lane.b32.xlu0 %v4109_v47, %s7377_s14  ;;  %v4111_v48 = vpop.f32.mrb[35].mxu0 }
0x188a   : > { %4203 = vrot.lane.b32.xlu1 %v4111_v48, %s7377_s14 }
0x18f3   : > { %v4120_v50 = vpop.permute.xlu1 %4119 }
0x18f4   : > { %v4116_v51 = vpop.permute.xlu0 %4115 }
0x18f5   : > { %v4124_v52 = vsel %vm7378_vm5, %v4116_v51, %v4120_v50  ;;  %v4121_v53 = vsel %vm7379_vm13, %v4120_v50, %v4116_v51  ;;  %vm7389_vm5 = vmmov %vm7388_vm3 }
0x18f6   : > { %v4195_v55 = vadd.f32 %v4194_v44, %v4124_v52  ;;  %v4197_v56 = vadd.f32 %v4196_v46, %v4121_v53 }
0x18fb   : > { %v4202_v54 = vpop.permute.xlu0 %4201 }
0x18fc   : > { %v4204_v19 = vpop.permute.xlu1 %4203 }
0x18fd   : > { %v4205_v57 = vsel %vm7380_vm9, %v4202_v54, %v4204_v19  ;;  %v4209_v58 = vsel %vm7381_vm1, %v4204_v19, %v4202_v54 }
0x18fe   : > { %v4210_v59 = vadd.f32 %v4205_v57, %v4195_v55  ;;  %v4211_v60 = vadd.f32 %v4209_v58, %v4197_v56 }
0x1900   : > { %v4779_v61 = vmul.f32 -1.442695, %v4210_v59  ;;  %v4780_v62 = vmul.f32 -1.442695, %v4211_v60 }
0x1902   : > { %6069 = vpow2.f32 %v4779_v61 }
0x1903   : > { %6071 = vpow2.f32 %v4780_v62 }
0x190c   : > { %v6070_v43 = vpop.eup %6069 }
0x190d   : > { %v6072_v63 = vpop.eup %6071  ;;  %v4218_v0 = vadd.f32 1.0, %v6070_v43 }
0x190e   : > { %v4219_v1 = vadd.f32 1.0, %v6072_v63 }
0x190f   : > { %6073 = vrcp.f32 %v4218_v0 }
0x1910   : > { %6075 = vrcp.f32 %v4219_v1 }
0x1919   : > { %v6074_v2 = vpop.eup %6073 }
0x191a   : > { %v6076_v3 = vpop.eup %6075  ;;  %v4224_v7 = vmul.f32 %v6074_v2, %v4210_v59 }
0x191b   : > { %v4225_v8 = vmul.f32 %v6076_v3, %v4211_v60 }
0x191c   : > { %v4268_v33 = vrot.slane %v4224_v7, 4 }
0x191d   : > { %v5988_v9 = vpack.i.bf16 %v4224_v7, %v4225_v8  ;;  %v5983_v10 = vpack.i.bf16 %v4225_v8, %v4224_v7  ;;  %v4269_v37 = vrot.slane %v4225_v8, 4 }
0x191f   : > { %5989 = vrot.lane.b32.xlu1 %v5988_v9, %s6132_s24  ;;  %5984 = vrot.lane.b32.xlu0 %v5983_v10, %s6129_s20 }
0x1923   : > { %5999 = vrot.lane.b32.xlu1 %v5983_v10, %s6131_s23  ;;  %5994 = vrot.lane.b32.xlu0 %v5988_v9, %s6128_s19 }
0x1991   : > { %v5990_v11 = vpop.permute.xlu1 %5989  ;;  %v5985_v12 = vpop.permute.xlu0 %5984 }
0x1992   : > { %v5992_v25 = vunpack.i.h.bf16 %v5990_v11  ;;  %v5991_v13 = vunpack.i.l.bf16 %v5990_v11  ;;  %v5987_v14 = vunpack.i.h.bf16 %v5985_v12  ;;  %v5986_v34 = vunpack.i.l.bf16 %v5985_v12 }
0x1994   : > { %v4242_v15 = vsel %vm7382_vm14, %v5992_v25, %v5991_v13  ;;  %v4245_v18 = vsel %vm7383_vm2, %v5991_v13, %v5992_v25  ;;  %v4232_v5 = vsel %vm7384_vm4, %v5986_v34, %v5987_v14  ;;  %v4236_v22 = vsel %vm7385_vm12, %v5987_v14, %v5986_v34 }
0x1995   : > { %v6000_v23 = vpop.permute.xlu1 %5999  ;;  %v5995_v24 = vpop.permute.xlu0 %5994  ;;  %v4246_v29 = vsel %vm6257_vm6, %v4232_v5, %v4245_v18  ;;  %v4247_v30 = vsel %vm6265_vm8, %v4236_v22, %v4242_v15  ;;  %vm7390_vm6 = vcmask 1043456   ;;  %vm7399_vm2 = vcmask 916480  }
0x1996   : > { %v6002_v26 = vunpack.i.h.bf16 %v6000_v23  ;;  %v6001_v27 = vunpack.i.l.bf16 %v6000_v23  ;;  %v5997_v28 = vunpack.i.h.bf16 %v5995_v24  ;;  %v5996_v6 = vunpack.i.l.bf16 %v5995_v24  ;;  %vm7391_vm13 = vmmov %vm7390_vm6 }
0x1997   : > { %v4272_v39 = vsel %vm7390_vm6, %v4246_v29, %v4268_v33  ;;  %vm7392_vm8 = vmmov %vm7390_vm6 }
0x1998   : > { %v4261_v31 = vsel %vm7386_vm10, %v6001_v27, %v6002_v26  ;;  %v4265_v32 = vsel %vm7387_vm0, %v6002_v26, %v6001_v27  ;;  %v4253_v35 = vsel %vm7388_vm3, %v5997_v28, %v5996_v6  ;;  %v4256_v36 = vsel %vm7389_vm5, %v5996_v6, %v5997_v28  ;;  %vm7393_vm9 = vmmov %vm7390_vm6 }
0x1999   : > { %v4266_v38 = vsel %vm6261_vm7, %v4256_v36, %v4261_v31  ;;  %v4267_v16 = vsel %vm7372_vm15, %v4253_v35, %v4265_v32  ;;  %v4273_v49 = vsel %vm7392_vm8, %v4247_v30, %v4269_v37  ;;  %vm7394_vm7 = vcmask 105472   ;;  %vm7400_vm4 = vmmov %vm7399_vm2 }
0x199a   : > { %v4274_v20 = vsel %vm7391_vm13, %v4266_v38, 1.0  ;;  %v4275_v40 = vsel %vm7393_vm9, %v4267_v16, 1.0  ;;  %vm7395_vm15 = vmmov %vm7394_vm7 }
0x199b   : > { %v5698_v42 = vpack.c.bf16 %v4274_v20, %v4272_v39  ;;  %v5695_v44 = vpack.c.bf16 %v4275_v40, %v4273_v49  ;;  %vm7396_vm1 = vmmov %vm7394_vm7 }
0x199d   : > { %5697 = vmatprep.subr.msk.bf16.mxu0 %vm6293_vm11, %v5695_v44  ;;  %5709 = vmatprep.subr.msk.bf16.mxu1 %vm6293_vm11, %v5695_v44 }
0x199e   : > { %5700 = vmatpush1.bf16.msk.msra.mxu0 %vm6293_vm11, %v5698_v42  ;;  %5712 = vmatpush1.bf16.msk.msra.mxu1 %vm6293_vm11, %v5698_v42 }
0x199f   : > { %5703 = vmatprep.subr.msk.bf16.mxu0 %vm6293_vm11, %v5695_v44 }
0x19a1   : > { %4786 = vmatmul.mubr.msk.f32.vlgmr.msra.gmra.mrb[36].mxu0 %vm7394_vm7, %v4781_v17  ;;  %4792 = vmatmul.mubr.msk.f32.vlgmr.msra.gmra.mrb[38].mxu1 %vm7395_vm15, %v4782_v21 }
0x19a2   : > { %5706 = vmatpush1.bf16.msk.msra.mxu0 %vm6293_vm11, %v5698_v42  ;;  %4427 = vmatprep.mubr.f32.mxu0 %v6130_v4  ;;  %vm7397_vm11 = vcmask 130048  }
0x19a3   : > { %vm7398_vm14 = vmmov %vm7397_vm11 }
0x19a5   : > { %4789 = vmatmul.mubr.msk.f32.vlgmr.msra.gmra.mrb[38].mxu0 %vm7396_vm1, %v4783_v45 }
0x1a74   : > { %v4355_v46 = vpop.f32.mrb[36].mxu0  ;;  %v4514_v47 = vpop.f32.mrb[38].mxu1 }
0x1a75   : > { %v4357_v48 = vpop.f32.mrb[37].mxu0  ;;  %4439 = vrot.lane.b32.xlu1 %v4355_v46, %s7376_s13  ;;  %v4516_v50 = vpop.f32.mrb[39].mxu1 }
0x1a76   : > { %4435 = vrot.lane.b32.xlu0 %v4357_v48, %s7376_s13 }
0x1a78   : > { %v4429_v51 = vpop.f32.mrb[38].mxu0 }
0x1a79   : > { %v4431_v52 = vpop.f32.mrb[39].mxu0 }
0x1a7a   : > { %4521 = vrot.lane.b32.xlu0 %v4429_v51, %s7377_s14  ;;  %4523 = vrot.lane.b32.xlu1 %v4431_v52, %s7377_s14 }
0x1ae7   : > { %v4440_v4 = vpop.permute.xlu1 %4439 }
0x1ae8   : > { %v4436_v41 = vpop.permute.xlu0 %4435 }
0x1ae9   : > { %v4444_v53 = vsel %vm7397_vm11, %v4436_v41, %v4440_v4  ;;  %v4441_v54 = vsel %vm7398_vm14, %v4440_v4, %v4436_v41 }
0x1aea   : > { %v4515_v55 = vadd.f32 %v4514_v47, %v4444_v53  ;;  %v4517_v56 = vadd.f32 %v4516_v50, %v4441_v54 }
0x1aec   : > { %v4522_v19 = vpop.permute.xlu0 %4521  ;;  %v4524_v57 = vpop.permute.xlu1 %4523 }
0x1aed   : > { %v4525_v58 = vsel %vm7399_vm2, %v4522_v19, %v4524_v57  ;;  %v4529_v59 = vsel %vm7400_vm4, %v4524_v57, %v4522_v19 }
0x1aee   : > { %v4530_v60 = vadd.f32 %v4525_v58, %v4515_v55  ;;  %v4531_v61 = vadd.f32 %v4529_v59, %v4517_v56 }
0x1af0   : > { %v4793_v62 = vmul.f32 -1.442695, %v4530_v60  ;;  %v4794_v43 = vmul.f32 -1.442695, %v4531_v61 }
0x1af2   : > { %6077 = vpow2.f32 %v4793_v62 }
0x1af3   : > { %6079 = vpow2.f32 %v4794_v43 }
0x1afc   : > { %v6078_v63 = vpop.eup %6077 }
0x1afd   : > { %v6080_v0 = vpop.eup %6079  ;;  %v4538_v1 = vadd.f32 1.0, %v6078_v63 }
0x1afe   : > { %v4539_v2 = vadd.f32 1.0, %v6080_v0 }
0x1aff   : > { %6081 = vrcp.f32 %v4538_v1 }
0x1b00   : > { %6083 = vrcp.f32 %v4539_v2 }
0x1b09   : > { %v6082_v3 = vpop.eup %6081 }
0x1b0a   : > { %v6084_v7 = vpop.eup %6083  ;;  %v4544_v8 = vmul.f32 %v6082_v3, %v4530_v60 }
0x1b0b   : > { %v4545_v9 = vmul.f32 %v6084_v7, %v4531_v61 }
0x1b0d   : > { %v4548_v10 = vcombine.low %v4544_v8, %v4545_v9 }
0x1b0f   : > { %4550 = vst [vmem:[%s266_s27] sm:$0xff] %v4548_v10 }
0x1b10 PF: > { %s17_s21 = sadd.s32 1, %s6123_s21  }
0x1b11   : > { %p14_p3 = scmp.ge.s32.totalorder %s17_s21, 4  }
0x1b13   :  { %16 = sbr.rel (!%p14_p3) target bundleno = 1 (0x1), region = 90 }
0x1b1a   :  { %4572 = vsyncpa [#allocation3], 1 }
0x1b1b   :  { %4574 = vsyncpa [#allocation3 + $0x1], 1 }

</bundles_post_ra>
